<compile_context>
chip_gen: v7x
topology: tpu7x:2x2x1
jax: 0.10.0
libtpu: 0.0.40
codegen_flags: <defaults>
</compile_context>

<pallas_src>
import functools

import jax
import jax.numpy as jnp
import numpy as np
from jax.experimental import pallas as pl
from jax.experimental.pallas import tpu as pltpu

_PI = 3.1415926          # matches the reference module constant

_LANE = 128              # lanes per vreg
_MAX_SUB = 64            # max sublanes per grid step (64*128 = 8192 boxes)

# CCW corner offsets: (+,+) -> (-,+) -> (-,-) -> (+,-)
_OFFX = (0.5, -0.5, -0.5, 0.5)
_OFFY = (0.5, 0.5, -0.5, -0.5)


def _oiou_kernel(p_ref, t_ref, o_ref, *, eps: float):
    # p_ref / t_ref: (7, sub, 128) rows [x, y, w, h, theta, cos, sin]
    px, py, pw, ph, pth = p_ref[0], p_ref[1], p_ref[2], p_ref[3], p_ref[4]
    pcos, psin = p_ref[5], p_ref[6]
    tx, ty, tw, th, tth = t_ref[0], t_ref[1], t_ref[2], t_ref[3], t_ref[4]
    tcos, tsin = t_ref[5], t_ref[6]

    zero = jnp.zeros_like(px)
    one = jnp.ones_like(px)

    # ---- rotated box corners (CCW), matches mmcv box2corners ---------------
    def corners(cx0, cy0, w, h, c, s):
        xs, ys = [], []
        for ox, oy in zip(_OFFX, _OFFY):
            lx = ox * w
            ly = oy * h
            xs.append(cx0 + lx * c - ly * s)
            ys.append(cy0 + lx * s + ly * c)
        return xs, ys

    ax1, ay1 = corners(px, py, pw, ph, pcos, psin)   # pred box
    ax2, ay2 = corners(tx, ty, tw, th, tcos, tsin)   # target box

    # ---- Green's-theorem clipping: sum over directed edges of CCW polygon P
    #      (clipped by the 4 half-planes of CCW convex polygon Q) of
    #      cross(entry, exit).  Exact; pure VALU + a few EUP divides.
    def clip_sum(pxs, pys, qxs, qys):
        qdx = [qxs[(j + 1) % 4] - qxs[j] for j in range(4)]
        qdy = [qys[(j + 1) % 4] - qys[j] for j in range(4)]
        # signed (scaled) distance of every P corner to every Q half-plane,
        # computed once and reused for both endpoints of each edge.
        f = [[qdx[j] * (pys[c] - qys[j]) - qdy[j] * (pxs[c] - qxs[j])
              for j in range(4)] for c in range(4)]
        total = zero
        for e in range(4):
            a_x, a_y = pxs[e], pys[e]
            b_x, b_y = pxs[(e + 1) % 4], pys[(e + 1) % 4]
            t_lo = zero
            t_hi = one
            for j in range(4):
                f0 = f[e][j]                       # f(t) = f0 - t*den
                f1 = f[(e + 1) % 4][j]
                den = f0 - f1
                t_star = jnp.clip(f0 / jnp.where(den == 0.0, 1.0, den),
                                  -1.0, 2.0)       # finite, semantics-preserving
                # den<0: f increasing  -> lower bound t >= t_star
                # den>0: f decreasing  -> upper bound t <= t_star
                # den==0 (or f0<0)     : whole edge in / out
                lb = jnp.where(den < 0.0, t_star,
                               jnp.where(f0 < 0.0, 2.0, 0.0))
                ub = jnp.where(den > 0.0, t_star, 1.0)
                t_lo = jnp.maximum(t_lo, lb)
                t_hi = jnp.minimum(t_hi, ub)
            ex = b_x - a_x
            ey = b_y - a_y
            sx = a_x + t_lo * ex
            sy = a_y + t_lo * ey
            gx = a_x + t_hi * ex
            gy = a_y + t_hi * ey
            contrib = sx * gy - sy * gx
            total = total + jnp.where(t_lo < t_hi, contrib, 0.0)
        return total

    twice_inter = (clip_sum(ax1, ay1, ax2, ay2) +
                   clip_sum(ax2, ay2, ax1, ay1))
    inter = 0.5 * jnp.abs(twice_inter)

    # ---- rotated IoU --------------------------------------------------------
    area1 = pw * ph
    area2 = tw * th
    union = area1 + area2 - inter
    # clip to [eps, 1]: upper clip only triggers for degenerate exactly-shared
    # boundaries (pred == target), where the two passes double-count the shared
    # edge; it keeps those lanes finite and equal to the true IoU of 1.
    iou = jnp.clip(inter / jnp.maximum(union, 1e-12), eps, 1.0)

    # ---- OIoU distance / angle penalty (rbox2hbox + center distance) --------
    dtheta = (pth - tth) * (1.0 / _PI)
    xb1 = jnp.abs(0.5 * pw * pcos) + jnp.abs(0.5 * ph * psin)
    yb1 = jnp.abs(0.5 * pw * psin) + jnp.abs(0.5 * ph * pcos)
    xb2 = jnp.abs(0.5 * tw * tcos) + jnp.abs(0.5 * th * tsin)
    yb2 = jnp.abs(0.5 * tw * tsin) + jnp.abs(0.5 * th * tcos)
    b1x1, b1y1, b1x2, b1y2 = px - xb1, py - yb1, px + xb1, py + yb1
    b2x1, b2y1, b2x2, b2y2 = tx - xb2, ty - yb2, tx + xb2, ty + yb2

    dx = (b2x1 + b2x2 - (b1x1 + b1x2)) ** 2 * 0.25
    dy = (b2y1 + b2y2 - (b1y1 + b1y2)) ** 2 * 0.25
    ew = jnp.maximum(jnp.maximum(b1x2, b2x2) - jnp.minimum(b1x1, b2x1), 0.0)
    eh = jnp.maximum(jnp.maximum(b1y2, b2y2) - jnp.minimum(b1y1, b2y1), 0.0)
    c2 = ew * ew + eh * eh + eps
    distance = (dx + dy) / c2 * jnp.exp(jnp.abs(dtheta) - 1.0)

    o_ref[...] = 1.0 - iou + distance


def _boxes_to_rows(boxes):
    """(n, 5) -> (7, n) rows [x, y, w, h, theta, cos, sin] (plain-JAX glue)."""
    rows = jnp.asarray(boxes, jnp.float32).T                     # (5, n)
    theta = rows[4:5]
    return jnp.concatenate([rows, jnp.cos(theta), jnp.sin(theta)], axis=0)


def _tiling(n):
    """Pick (total sublane rows, sublanes per block); both multiples of 8."""
    rows_needed = max(1, (n + _LANE - 1) // _LANE)
    if rows_needed <= _MAX_SUB:
        sub = ((rows_needed + 7) // 8) * 8
        rows = sub
    else:
        sub = _MAX_SUB
        rows = ((rows_needed + sub - 1) // sub) * sub
    return rows, sub


def oiou_loss_per_box(pred, target, eps=1e-6):
    """Per-box OIoU loss, shape (n,). Heavy math runs in the Pallas kernel."""
    n = pred.shape[0]
    rows, sub = _tiling(n)
    n_pad = rows * _LANE

    p7 = _boxes_to_rows(pred)
    t7 = _boxes_to_rows(target)
    if n_pad > n:
        # benign, non-overlapping padding boxes (finite loss, no NaN/Inf)
        pad_p = jnp.array([0., 0., 1., 1., 0., 1., 0.], jnp.float32)[:, None]
        pad_t = jnp.array([8., 8., 1., 1., 0., 1., 0.], jnp.float32)[:, None]
        p7 = jnp.concatenate([p7, jnp.broadcast_to(pad_p, (7, n_pad - n))], 1)
        t7 = jnp.concatenate([t7, jnp.broadcast_to(pad_t, (7, n_pad - n))], 1)

    p3 = p7.reshape(7, rows, _LANE)
    t3 = t7.reshape(7, rows, _LANE)

    out = pl.pallas_call(
        functools.partial(_oiou_kernel, eps=eps),
        out_shape=jax.ShapeDtypeStruct((rows, _LANE), jnp.float32),
        grid=(rows // sub,),
        in_specs=[
            pl.BlockSpec((7, sub, _LANE), lambda i: (0, i, 0)),
            pl.BlockSpec((7, sub, _LANE), lambda i: (0, i, 0)),
        ],
        out_specs=pl.BlockSpec((sub, _LANE), lambda i: (i, 0)),
        compiler_params=pltpu.CompilerParams(
            dimension_semantics=("parallel",)),
    )(p3, t3)
    return out.reshape(n_pad)[:n]


def oiou_loss_forward(pred, target, weight=None, avg_factor=None,
                      reduction='mean', eps=1e-6, loss_weight=1.0):
    """Equivalent of OIoULoss.forward (weighted_loss handling in plain JAX)."""
    assert reduction in ('none', 'mean', 'sum')
    # TODO(synk): the data-dependent early return when a weight tensor is given
    # and torch.any(weight > 0) is False cannot be expressed for traced weights.
    if weight is not None and weight.ndim > 1:
        weight = weight.mean(-1)
    loss = oiou_loss_per_box(pred, target, eps=eps)
    if weight is not None:
        loss = loss * weight
    if reduction == 'mean':
        loss = loss.sum() / avg_factor if avg_factor is not None else loss.mean()
    elif reduction == 'sum':
        loss = loss.sum()
    return loss_weight * loss


# ---------------------------- numpy reference -------------------------------
def _ref_loss_per_box(pred, target, eps=1e-6):
    pred = np.asarray(pred, np.float64)
    target = np.asarray(target, np.float64)

    def corners(b):
        x, y, w, h, a = b
        ox = np.array(_OFFX) * w
        oy = np.array(_OFFY) * h
        c, s = np.cos(a), np.sin(a)
        return np.stack([x + ox * c - oy * s, y + ox * s + oy * c], axis=-1)

    def clip(subject, clipper):
        out = [tuple(v) for v in subject]
        m = len(clipper)
        for i in range(m):
            a, b = clipper[i], clipper[(i + 1) % m]
            inp, out = out, []
            if not inp:
                break
            def side(p):
                return (b[0] - a[0]) * (p[1] - a[1]) - (b[1] - a[1]) * (p[0] - a[0])
            for j in range(len(inp)):
                p, q = inp[j], inp[(j + 1) % len(inp)]
                sp, sq = side(p), side(q)
                if sp >= 0:
                    out.append(p)
                if sp * sq < 0:
                    t = sp / (sp - sq)
                    out.append((p[0] + t * (q[0] - p[0]), p[1] + t * (q[1] - p[1])))
        return out

    def shoelace(poly):
        if len(poly) < 3:
            return 0.0
        s = 0.0
        for j in range(len(poly)):
            p, q = poly[j], poly[(j + 1) % len(poly)]
            s += p[0] * q[1] - p[1] * q[0]
        return abs(s) / 2.0

    def hbox(b):
        x, y, w, h, a = b
        xb = abs(w / 2 * np.cos(a)) + abs(h / 2 * np.sin(a))
        yb = abs(w / 2 * np.sin(a)) + abs(h / 2 * np.cos(a))
        return x - xb, y - yb, x + xb, y + yb

    losses = []
    for p, t in zip(pred, target):
        inter = shoelace(clip(corners(p), corners(t)))
        union = p[2] * p[3] + t[2] * t[3] - inter
        iou = max(inter / union, eps)
        b1, b2 = hbox(p), hbox(t)
        dx = (b2[0] + b2[2] - (b1[0] + b1[2])) ** 2 / 4
        dy = (b2[1] + b2[3] - (b1[1] + b1[3])) ** 2 / 4
        ew = max(max(b1[2], b2[2]) - min(b1[0], b2[0]), 0.0)
        eh = max(max(b1[3], b2[3]) - min(b1[1], b2[1]), 0.0)
        c2 = ew ** 2 + eh ** 2 + eps
        dtheta = (p[4] - t[4]) / _PI
        losses.append(1 - iou + (dx + dy) / c2 * np.exp(abs(dtheta) - 1))
    return np.array(losses)


if __name__ == "__main__":
    key = jax.random.PRNGKey(0)
    k1, k2, k3, k4 = jax.random.split(key, 4)
    n = 8
    ctr = jax.random.uniform(k1, (n, 2), minval=0.0, maxval=8.0)
    wh = jax.random.uniform(k2, (n, 2), minval=2.0, maxval=6.0)
    ang = jax.random.uniform(k3, (n, 1), minval=-1.2, maxval=1.2)
    pred = jnp.concatenate([ctr, wh, ang], axis=-1)               # (8, 5)
    delta = jax.random.uniform(k4, (n, 5), minval=-0.5, maxval=0.5)
    target = pred + delta * jnp.array([1.0, 1.0, 0.8, 0.8, 0.6])  # overlapping

    # per-box loss from the Pallas kernel (reduction='none' path)
    per_box = jax.block_until_ready(oiou_loss_per_box(pred, target))
    ref = _ref_loss_per_box(np.asarray(pred), np.asarray(target))
    assert np.all(np.isfinite(np.asarray(per_box)))
    assert np.allclose(np.asarray(per_box), ref, rtol=2e-3, atol=2e-3), (
        per_box, ref)

    # full module forward: mean reduction, loss_weight=1.0
    loss = jax.block_until_ready(
        oiou_loss_forward(pred, target, reduction='mean'))
    assert np.isfinite(float(loss))
    assert abs(float(loss) - float(ref.mean())) < 2e-3

    print("KERNEL_OK")
</pallas_src>

<mosaic_0001>
module attributes {stable_mosaic.version = 11 : i64} {
  func.func @_oiou_kernel(%arg0: i32, %arg1: memref<7x8x128xf32, #tpu.memory_space<vmem>>, %arg2: memref<7x8x128xf32, #tpu.memory_space<vmem>>, %arg3: memref<8x128xf32, #tpu.memory_space<vmem>>) attributes {dimension_semantics = [#tpu.dimension_semantics<parallel>], iteration_bounds = array<i64: 1>, scalar_prefetch = 0 : i64, scratch_operands = 0 : i64, tpu.core_type = #tpu.core_type<tc>, window_params = [{transform_indices = @transform_0, window_bounds = array<i64: 7, 8, 128>}, {transform_indices = @transform_1, window_bounds = array<i64: 7, 8, 128>}, {transform_indices = @transform_2, window_bounds = array<i64: 8, 128>}]} {
    %c0 = arith.constant 0 : index
    %c0_0 = arith.constant 0 : index
    %c0_1 = arith.constant 0 : index
    %0 = vector.load %arg1[%c0, %c0_0, %c0_1] : memref<7x8x128xf32, #tpu.memory_space<vmem>>, vector<1x8x128xf32>
    %1 = vector.shape_cast %0 : vector<1x8x128xf32> to vector<8x128xf32>
    %c1 = arith.constant 1 : index
    %c0_2 = arith.constant 0 : index
    %c0_3 = arith.constant 0 : index
    %2 = vector.load %arg1[%c1, %c0_2, %c0_3] : memref<7x8x128xf32, #tpu.memory_space<vmem>>, vector<1x8x128xf32>
    %3 = vector.shape_cast %2 : vector<1x8x128xf32> to vector<8x128xf32>
    %c2 = arith.constant 2 : index
    %c0_4 = arith.constant 0 : index
    %c0_5 = arith.constant 0 : index
    %4 = vector.load %arg1[%c2, %c0_4, %c0_5] : memref<7x8x128xf32, #tpu.memory_space<vmem>>, vector<1x8x128xf32>
    %5 = vector.shape_cast %4 : vector<1x8x128xf32> to vector<8x128xf32>
    %c3 = arith.constant 3 : index
    %c0_6 = arith.constant 0 : index
    %c0_7 = arith.constant 0 : index
    %6 = vector.load %arg1[%c3, %c0_6, %c0_7] : memref<7x8x128xf32, #tpu.memory_space<vmem>>, vector<1x8x128xf32>
    %7 = vector.shape_cast %6 : vector<1x8x128xf32> to vector<8x128xf32>
    %c4 = arith.constant 4 : index
    %c0_8 = arith.constant 0 : index
    %c0_9 = arith.constant 0 : index
    %8 = vector.load %arg1[%c4, %c0_8, %c0_9] : memref<7x8x128xf32, #tpu.memory_space<vmem>>, vector<1x8x128xf32>
    %9 = vector.shape_cast %8 : vector<1x8x128xf32> to vector<8x128xf32>
    %c5 = arith.constant 5 : index
    %c0_10 = arith.constant 0 : index
    %c0_11 = arith.constant 0 : index
    %10 = vector.load %arg1[%c5, %c0_10, %c0_11] : memref<7x8x128xf32, #tpu.memory_space<vmem>>, vector<1x8x128xf32>
    %11 = vector.shape_cast %10 : vector<1x8x128xf32> to vector<8x128xf32>
    %c6 = arith.constant 6 : index
    %c0_12 = arith.constant 0 : index
    %c0_13 = arith.constant 0 : index
    %12 = vector.load %arg1[%c6, %c0_12, %c0_13] : memref<7x8x128xf32, #tpu.memory_space<vmem>>, vector<1x8x128xf32>
    %13 = vector.shape_cast %12 : vector<1x8x128xf32> to vector<8x128xf32>
    %c0_14 = arith.constant 0 : index
    %c0_15 = arith.constant 0 : index
    %c0_16 = arith.constant 0 : index
    %14 = vector.load %arg2[%c0_14, %c0_15, %c0_16] : memref<7x8x128xf32, #tpu.memory_space<vmem>>, vector<1x8x128xf32>
    %15 = vector.shape_cast %14 : vector<1x8x128xf32> to vector<8x128xf32>
    %c1_17 = arith.constant 1 : index
    %c0_18 = arith.constant 0 : index
    %c0_19 = arith.constant 0 : index
    %16 = vector.load %arg2[%c1_17, %c0_18, %c0_19] : memref<7x8x128xf32, #tpu.memory_space<vmem>>, vector<1x8x128xf32>
    %17 = vector.shape_cast %16 : vector<1x8x128xf32> to vector<8x128xf32>
    %c2_20 = arith.constant 2 : index
    %c0_21 = arith.constant 0 : index
    %c0_22 = arith.constant 0 : index
    %18 = vector.load %arg2[%c2_20, %c0_21, %c0_22] : memref<7x8x128xf32, #tpu.memory_space<vmem>>, vector<1x8x128xf32>
    %19 = vector.shape_cast %18 : vector<1x8x128xf32> to vector<8x128xf32>
    %c3_23 = arith.constant 3 : index
    %c0_24 = arith.constant 0 : index
    %c0_25 = arith.constant 0 : index
    %20 = vector.load %arg2[%c3_23, %c0_24, %c0_25] : memref<7x8x128xf32, #tpu.memory_space<vmem>>, vector<1x8x128xf32>
    %21 = vector.shape_cast %20 : vector<1x8x128xf32> to vector<8x128xf32>
    %c4_26 = arith.constant 4 : index
    %c0_27 = arith.constant 0 : index
    %c0_28 = arith.constant 0 : index
    %22 = vector.load %arg2[%c4_26, %c0_27, %c0_28] : memref<7x8x128xf32, #tpu.memory_space<vmem>>, vector<1x8x128xf32>
    %23 = vector.shape_cast %22 : vector<1x8x128xf32> to vector<8x128xf32>
    %c5_29 = arith.constant 5 : index
    %c0_30 = arith.constant 0 : index
    %c0_31 = arith.constant 0 : index
    %24 = vector.load %arg2[%c5_29, %c0_30, %c0_31] : memref<7x8x128xf32, #tpu.memory_space<vmem>>, vector<1x8x128xf32>
    %25 = vector.shape_cast %24 : vector<1x8x128xf32> to vector<8x128xf32>
    %c6_32 = arith.constant 6 : index
    %c0_33 = arith.constant 0 : index
    %c0_34 = arith.constant 0 : index
    %26 = vector.load %arg2[%c6_32, %c0_33, %c0_34] : memref<7x8x128xf32, #tpu.memory_space<vmem>>, vector<1x8x128xf32>
    %27 = vector.shape_cast %26 : vector<1x8x128xf32> to vector<8x128xf32>
    %cst = arith.constant 0.000000e+00 : f32
    %28 = vector.broadcast %cst : f32 to vector<8x128xf32>
    %cst_35 = arith.constant 1.000000e+00 : f32
    %29 = vector.broadcast %cst_35 : f32 to vector<8x128xf32>
    %cst_36 = arith.constant 5.000000e-01 : f32
    %30 = vector.broadcast %cst_36 : f32 to vector<8x128xf32>
    %31 = arith.mulf %30, %5 : vector<8x128xf32>
    %cst_37 = arith.constant 5.000000e-01 : f32
    %32 = vector.broadcast %cst_37 : f32 to vector<8x128xf32>
    %33 = arith.mulf %32, %7 : vector<8x128xf32>
    %34 = arith.mulf %31, %11 : vector<8x128xf32>
    %35 = arith.addf %1, %34 : vector<8x128xf32>
    %36 = arith.mulf %33, %13 : vector<8x128xf32>
    %37 = arith.subf %35, %36 : vector<8x128xf32>
    %38 = arith.mulf %31, %13 : vector<8x128xf32>
    %39 = arith.addf %3, %38 : vector<8x128xf32>
    %40 = arith.mulf %33, %11 : vector<8x128xf32>
    %41 = arith.addf %39, %40 : vector<8x128xf32>
    %cst_38 = arith.constant -5.000000e-01 : f32
    %42 = vector.broadcast %cst_38 : f32 to vector<8x128xf32>
    %43 = arith.mulf %42, %5 : vector<8x128xf32>
    %cst_39 = arith.constant 5.000000e-01 : f32
    %44 = vector.broadcast %cst_39 : f32 to vector<8x128xf32>
    %45 = arith.mulf %44, %7 : vector<8x128xf32>
    %46 = arith.mulf %43, %11 : vector<8x128xf32>
    %47 = arith.addf %1, %46 : vector<8x128xf32>
    %48 = arith.mulf %45, %13 : vector<8x128xf32>
    %49 = arith.subf %47, %48 : vector<8x128xf32>
    %50 = arith.mulf %43, %13 : vector<8x128xf32>
    %51 = arith.addf %3, %50 : vector<8x128xf32>
    %52 = arith.mulf %45, %11 : vector<8x128xf32>
    %53 = arith.addf %51, %52 : vector<8x128xf32>
    %cst_40 = arith.constant -5.000000e-01 : f32
    %54 = vector.broadcast %cst_40 : f32 to vector<8x128xf32>
    %55 = arith.mulf %54, %5 : vector<8x128xf32>
    %cst_41 = arith.constant -5.000000e-01 : f32
    %56 = vector.broadcast %cst_41 : f32 to vector<8x128xf32>
    %57 = arith.mulf %56, %7 : vector<8x128xf32>
    %58 = arith.mulf %55, %11 : vector<8x128xf32>
    %59 = arith.addf %1, %58 : vector<8x128xf32>
    %60 = arith.mulf %57, %13 : vector<8x128xf32>
    %61 = arith.subf %59, %60 : vector<8x128xf32>
    %62 = arith.mulf %55, %13 : vector<8x128xf32>
    %63 = arith.addf %3, %62 : vector<8x128xf32>
    %64 = arith.mulf %57, %11 : vector<8x128xf32>
    %65 = arith.addf %63, %64 : vector<8x128xf32>
    %cst_42 = arith.constant 5.000000e-01 : f32
    %66 = vector.broadcast %cst_42 : f32 to vector<8x128xf32>
    %67 = arith.mulf %66, %5 : vector<8x128xf32>
    %cst_43 = arith.constant -5.000000e-01 : f32
    %68 = vector.broadcast %cst_43 : f32 to vector<8x128xf32>
    %69 = arith.mulf %68, %7 : vector<8x128xf32>
    %70 = arith.mulf %67, %11 : vector<8x128xf32>
    %71 = arith.addf %1, %70 : vector<8x128xf32>
    %72 = arith.mulf %69, %13 : vector<8x128xf32>
    %73 = arith.subf %71, %72 : vector<8x128xf32>
    %74 = arith.mulf %67, %13 : vector<8x128xf32>
    %75 = arith.addf %3, %74 : vector<8x128xf32>
    %76 = arith.mulf %69, %11 : vector<8x128xf32>
    %77 = arith.addf %75, %76 : vector<8x128xf32>
    %cst_44 = arith.constant 5.000000e-01 : f32
    %78 = vector.broadcast %cst_44 : f32 to vector<8x128xf32>
    %79 = arith.mulf %78, %19 : vector<8x128xf32>
    %cst_45 = arith.constant 5.000000e-01 : f32
    %80 = vector.broadcast %cst_45 : f32 to vector<8x128xf32>
    %81 = arith.mulf %80, %21 : vector<8x128xf32>
    %82 = arith.mulf %79, %25 : vector<8x128xf32>
    %83 = arith.addf %15, %82 : vector<8x128xf32>
    %84 = arith.mulf %81, %27 : vector<8x128xf32>
    %85 = arith.subf %83, %84 : vector<8x128xf32>
    %86 = arith.mulf %79, %27 : vector<8x128xf32>
    %87 = arith.addf %17, %86 : vector<8x128xf32>
    %88 = arith.mulf %81, %25 : vector<8x128xf32>
    %89 = arith.addf %87, %88 : vector<8x128xf32>
    %cst_46 = arith.constant -5.000000e-01 : f32
    %90 = vector.broadcast %cst_46 : f32 to vector<8x128xf32>
    %91 = arith.mulf %90, %19 : vector<8x128xf32>
    %cst_47 = arith.constant 5.000000e-01 : f32
    %92 = vector.broadcast %cst_47 : f32 to vector<8x128xf32>
    %93 = arith.mulf %92, %21 : vector<8x128xf32>
    %94 = arith.mulf %91, %25 : vector<8x128xf32>
    %95 = arith.addf %15, %94 : vector<8x128xf32>
    %96 = arith.mulf %93, %27 : vector<8x128xf32>
    %97 = arith.subf %95, %96 : vector<8x128xf32>
    %98 = arith.mulf %91, %27 : vector<8x128xf32>
    %99 = arith.addf %17, %98 : vector<8x128xf32>
    %100 = arith.mulf %93, %25 : vector<8x128xf32>
    %101 = arith.addf %99, %100 : vector<8x128xf32>
    %cst_48 = arith.constant -5.000000e-01 : f32
    %102 = vector.broadcast %cst_48 : f32 to vector<8x128xf32>
    %103 = arith.mulf %102, %19 : vector<8x128xf32>
    %cst_49 = arith.constant -5.000000e-01 : f32
    %104 = vector.broadcast %cst_49 : f32 to vector<8x128xf32>
    %105 = arith.mulf %104, %21 : vector<8x128xf32>
    %106 = arith.mulf %103, %25 : vector<8x128xf32>
    %107 = arith.addf %15, %106 : vector<8x128xf32>
    %108 = arith.mulf %105, %27 : vector<8x128xf32>
    %109 = arith.subf %107, %108 : vector<8x128xf32>
    %110 = arith.mulf %103, %27 : vector<8x128xf32>
    %111 = arith.addf %17, %110 : vector<8x128xf32>
    %112 = arith.mulf %105, %25 : vector<8x128xf32>
    %113 = arith.addf %111, %112 : vector<8x128xf32>
    %cst_50 = arith.constant 5.000000e-01 : f32
    %114 = vector.broadcast %cst_50 : f32 to vector<8x128xf32>
    %115 = arith.mulf %114, %19 : vector<8x128xf32>
    %cst_51 = arith.constant -5.000000e-01 : f32
    %116 = vector.broadcast %cst_51 : f32 to vector<8x128xf32>
    %117 = arith.mulf %116, %21 : vector<8x128xf32>
    %118 = arith.mulf %115, %25 : vector<8x128xf32>
    %119 = arith.addf %15, %118 : vector<8x128xf32>
    %120 = arith.mulf %117, %27 : vector<8x128xf32>
    %121 = arith.subf %119, %120 : vector<8x128xf32>
    %122 = arith.mulf %115, %27 : vector<8x128xf32>
    %123 = arith.addf %17, %122 : vector<8x128xf32>
    %124 = arith.mulf %117, %25 : vector<8x128xf32>
    %125 = arith.addf %123, %124 : vector<8x128xf32>
    %126 = arith.subf %97, %85 : vector<8x128xf32>
    %127 = arith.subf %109, %97 : vector<8x128xf32>
    %128 = arith.subf %121, %109 : vector<8x128xf32>
    %129 = arith.subf %85, %121 : vector<8x128xf32>
    %130 = arith.subf %101, %89 : vector<8x128xf32>
    %131 = arith.subf %113, %101 : vector<8x128xf32>
    %132 = arith.subf %125, %113 : vector<8x128xf32>
    %133 = arith.subf %89, %125 : vector<8x128xf32>
    %134 = arith.subf %41, %89 : vector<8x128xf32>
    %135 = arith.mulf %126, %134 : vector<8x128xf32>
    %136 = arith.subf %37, %85 : vector<8x128xf32>
    %137 = arith.mulf %130, %136 : vector<8x128xf32>
    %138 = arith.subf %135, %137 : vector<8x128xf32>
    %139 = arith.subf %41, %101 : vector<8x128xf32>
    %140 = arith.mulf %127, %139 : vector<8x128xf32>
    %141 = arith.subf %37, %97 : vector<8x128xf32>
    %142 = arith.mulf %131, %141 : vector<8x128xf32>
    %143 = arith.subf %140, %142 : vector<8x128xf32>
    %144 = arith.subf %41, %113 : vector<8x128xf32>
    %145 = arith.mulf %128, %144 : vector<8x128xf32>
    %146 = arith.subf %37, %109 : vector<8x128xf32>
    %147 = arith.mulf %132, %146 : vector<8x128xf32>
    %148 = arith.subf %145, %147 : vector<8x128xf32>
    %149 = arith.subf %41, %125 : vector<8x128xf32>
    %150 = arith.mulf %129, %149 : vector<8x128xf32>
    %151 = arith.subf %37, %121 : vector<8x128xf32>
    %152 = arith.mulf %133, %151 : vector<8x128xf32>
    %153 = arith.subf %150, %152 : vector<8x128xf32>
    %154 = arith.subf %53, %89 : vector<8x128xf32>
    %155 = arith.mulf %126, %154 : vector<8x128xf32>
    %156 = arith.subf %49, %85 : vector<8x128xf32>
    %157 = arith.mulf %130, %156 : vector<8x128xf32>
    %158 = arith.subf %155, %157 : vector<8x128xf32>
    %159 = arith.subf %53, %101 : vector<8x128xf32>
    %160 = arith.mulf %127, %159 : vector<8x128xf32>
    %161 = arith.subf %49, %97 : vector<8x128xf32>
    %162 = arith.mulf %131, %161 : vector<8x128xf32>
    %163 = arith.subf %160, %162 : vector<8x128xf32>
    %164 = arith.subf %53, %113 : vector<8x128xf32>
    %165 = arith.mulf %128, %164 : vector<8x128xf32>
    %166 = arith.subf %49, %109 : vector<8x128xf32>
    %167 = arith.mulf %132, %166 : vector<8x128xf32>
    %168 = arith.subf %165, %167 : vector<8x128xf32>
    %169 = arith.subf %53, %125 : vector<8x128xf32>
    %170 = arith.mulf %129, %169 : vector<8x128xf32>
    %171 = arith.subf %49, %121 : vector<8x128xf32>
    %172 = arith.mulf %133, %171 : vector<8x128xf32>
    %173 = arith.subf %170, %172 : vector<8x128xf32>
    %174 = arith.subf %65, %89 : vector<8x128xf32>
    %175 = arith.mulf %126, %174 : vector<8x128xf32>
    %176 = arith.subf %61, %85 : vector<8x128xf32>
    %177 = arith.mulf %130, %176 : vector<8x128xf32>
    %178 = arith.subf %175, %177 : vector<8x128xf32>
    %179 = arith.subf %65, %101 : vector<8x128xf32>
    %180 = arith.mulf %127, %179 : vector<8x128xf32>
    %181 = arith.subf %61, %97 : vector<8x128xf32>
    %182 = arith.mulf %131, %181 : vector<8x128xf32>
    %183 = arith.subf %180, %182 : vector<8x128xf32>
    %184 = arith.subf %65, %113 : vector<8x128xf32>
    %185 = arith.mulf %128, %184 : vector<8x128xf32>
    %186 = arith.subf %61, %109 : vector<8x128xf32>
    %187 = arith.mulf %132, %186 : vector<8x128xf32>
    %188 = arith.subf %185, %187 : vector<8x128xf32>
    %189 = arith.subf %65, %125 : vector<8x128xf32>
    %190 = arith.mulf %129, %189 : vector<8x128xf32>
    %191 = arith.subf %61, %121 : vector<8x128xf32>
    %192 = arith.mulf %133, %191 : vector<8x128xf32>
    %193 = arith.subf %190, %192 : vector<8x128xf32>
    %194 = arith.subf %77, %89 : vector<8x128xf32>
    %195 = arith.mulf %126, %194 : vector<8x128xf32>
    %196 = arith.subf %73, %85 : vector<8x128xf32>
    %197 = arith.mulf %130, %196 : vector<8x128xf32>
    %198 = arith.subf %195, %197 : vector<8x128xf32>
    %199 = arith.subf %77, %101 : vector<8x128xf32>
    %200 = arith.mulf %127, %199 : vector<8x128xf32>
    %201 = arith.subf %73, %97 : vector<8x128xf32>
    %202 = arith.mulf %131, %201 : vector<8x128xf32>
    %203 = arith.subf %200, %202 : vector<8x128xf32>
    %204 = arith.subf %77, %113 : vector<8x128xf32>
    %205 = arith.mulf %128, %204 : vector<8x128xf32>
    %206 = arith.subf %73, %109 : vector<8x128xf32>
    %207 = arith.mulf %132, %206 : vector<8x128xf32>
    %208 = arith.subf %205, %207 : vector<8x128xf32>
    %209 = arith.subf %77, %125 : vector<8x128xf32>
    %210 = arith.mulf %129, %209 : vector<8x128xf32>
    %211 = arith.subf %73, %121 : vector<8x128xf32>
    %212 = arith.mulf %133, %211 : vector<8x128xf32>
    %213 = arith.subf %210, %212 : vector<8x128xf32>
    %214 = arith.subf %138, %158 : vector<8x128xf32>
    %cst_52 = arith.constant 0.000000e+00 : f32
    %215 = vector.broadcast %cst_52 : f32 to vector<8x128xf32>
    %216 = arith.cmpf oeq, %214, %215 : vector<8x128xf32>
    %cst_53 = arith.constant 1.000000e+00 : f32
    %217 = vector.broadcast %cst_53 : f32 to vector<8x128xf32>
    %218 = arith.select %216, %217, %214 : vector<8x128xi1>, vector<8x128xf32>
    %219 = arith.divf %138, %218 : vector<8x128xf32>
    %cst_54 = arith.constant -1.000000e+00 : f32
    %cst_55 = arith.constant 2.000000e+00 : f32
    %220 = vector.broadcast %cst_54 : f32 to vector<8x128xf32>
    %221 = arith.maximumf %220, %219 : vector<8x128xf32>
    %222 = vector.broadcast %cst_55 : f32 to vector<8x128xf32>
    %223 = arith.minimumf %222, %221 : vector<8x128xf32>
    %cst_56 = arith.constant 0.000000e+00 : f32
    %224 = vector.broadcast %cst_56 : f32 to vector<8x128xf32>
    %225 = arith.cmpf olt, %214, %224 : vector<8x128xf32>
    %cst_57 = arith.constant 0.000000e+00 : f32
    %226 = vector.broadcast %cst_57 : f32 to vector<8x128xf32>
    %227 = arith.cmpf olt, %138, %226 : vector<8x128xf32>
    %cst_58 = arith.constant 2.000000e+00 : f32
    %cst_59 = arith.constant 0.000000e+00 : f32
    %228 = vector.broadcast %cst_58 : f32 to vector<8x128xf32>
    %229 = vector.broadcast %cst_59 : f32 to vector<8x128xf32>
    %230 = arith.select %227, %228, %229 : vector<8x128xi1>, vector<8x128xf32>
    %231 = arith.select %225, %223, %230 : vector<8x128xi1>, vector<8x128xf32>
    %cst_60 = arith.constant 0.000000e+00 : f32
    %232 = vector.broadcast %cst_60 : f32 to vector<8x128xf32>
    %233 = arith.cmpf ogt, %214, %232 : vector<8x128xf32>
    %cst_61 = arith.constant 1.000000e+00 : f32
    %234 = vector.broadcast %cst_61 : f32 to vector<8x128xf32>
    %235 = arith.select %233, %223, %234 : vector<8x128xi1>, vector<8x128xf32>
    %236 = arith.maximumf %28, %231 : vector<8x128xf32>
    %237 = arith.minimumf %29, %235 : vector<8x128xf32>
    %238 = arith.subf %143, %163 : vector<8x128xf32>
    %cst_62 = arith.constant 0.000000e+00 : f32
    %239 = vector.broadcast %cst_62 : f32 to vector<8x128xf32>
    %240 = arith.cmpf oeq, %238, %239 : vector<8x128xf32>
    %cst_63 = arith.constant 1.000000e+00 : f32
    %241 = vector.broadcast %cst_63 : f32 to vector<8x128xf32>
    %242 = arith.select %240, %241, %238 : vector<8x128xi1>, vector<8x128xf32>
    %243 = arith.divf %143, %242 : vector<8x128xf32>
    %cst_64 = arith.constant -1.000000e+00 : f32
    %cst_65 = arith.constant 2.000000e+00 : f32
    %244 = vector.broadcast %cst_64 : f32 to vector<8x128xf32>
    %245 = arith.maximumf %244, %243 : vector<8x128xf32>
    %246 = vector.broadcast %cst_65 : f32 to vector<8x128xf32>
    %247 = arith.minimumf %246, %245 : vector<8x128xf32>
    %cst_66 = arith.constant 0.000000e+00 : f32
    %248 = vector.broadcast %cst_66 : f32 to vector<8x128xf32>
    %249 = arith.cmpf olt, %238, %248 : vector<8x128xf32>
    %cst_67 = arith.constant 0.000000e+00 : f32
    %250 = vector.broadcast %cst_67 : f32 to vector<8x128xf32>
    %251 = arith.cmpf olt, %143, %250 : vector<8x128xf32>
    %cst_68 = arith.constant 2.000000e+00 : f32
    %cst_69 = arith.constant 0.000000e+00 : f32
    %252 = vector.broadcast %cst_68 : f32 to vector<8x128xf32>
    %253 = vector.broadcast %cst_69 : f32 to vector<8x128xf32>
    %254 = arith.select %251, %252, %253 : vector<8x128xi1>, vector<8x128xf32>
    %255 = arith.select %249, %247, %254 : vector<8x128xi1>, vector<8x128xf32>
    %cst_70 = arith.constant 0.000000e+00 : f32
    %256 = vector.broadcast %cst_70 : f32 to vector<8x128xf32>
    %257 = arith.cmpf ogt, %238, %256 : vector<8x128xf32>
    %cst_71 = arith.constant 1.000000e+00 : f32
    %258 = vector.broadcast %cst_71 : f32 to vector<8x128xf32>
    %259 = arith.select %257, %247, %258 : vector<8x128xi1>, vector<8x128xf32>
    %260 = arith.maximumf %236, %255 : vector<8x128xf32>
    %261 = arith.minimumf %237, %259 : vector<8x128xf32>
    %262 = arith.subf %148, %168 : vector<8x128xf32>
    %cst_72 = arith.constant 0.000000e+00 : f32
    %263 = vector.broadcast %cst_72 : f32 to vector<8x128xf32>
    %264 = arith.cmpf oeq, %262, %263 : vector<8x128xf32>
    %cst_73 = arith.constant 1.000000e+00 : f32
    %265 = vector.broadcast %cst_73 : f32 to vector<8x128xf32>
    %266 = arith.select %264, %265, %262 : vector<8x128xi1>, vector<8x128xf32>
    %267 = arith.divf %148, %266 : vector<8x128xf32>
    %cst_74 = arith.constant -1.000000e+00 : f32
    %cst_75 = arith.constant 2.000000e+00 : f32
    %268 = vector.broadcast %cst_74 : f32 to vector<8x128xf32>
    %269 = arith.maximumf %268, %267 : vector<8x128xf32>
    %270 = vector.broadcast %cst_75 : f32 to vector<8x128xf32>
    %271 = arith.minimumf %270, %269 : vector<8x128xf32>
    %cst_76 = arith.constant 0.000000e+00 : f32
    %272 = vector.broadcast %cst_76 : f32 to vector<8x128xf32>
    %273 = arith.cmpf olt, %262, %272 : vector<8x128xf32>
    %cst_77 = arith.constant 0.000000e+00 : f32
    %274 = vector.broadcast %cst_77 : f32 to vector<8x128xf32>
    %275 = arith.cmpf olt, %148, %274 : vector<8x128xf32>
    %cst_78 = arith.constant 2.000000e+00 : f32
    %cst_79 = arith.constant 0.000000e+00 : f32
    %276 = vector.broadcast %cst_78 : f32 to vector<8x128xf32>
    %277 = vector.broadcast %cst_79 : f32 to vector<8x128xf32>
    %278 = arith.select %275, %276, %277 : vector<8x128xi1>, vector<8x128xf32>
    %279 = arith.select %273, %271, %278 : vector<8x128xi1>, vector<8x128xf32>
    %cst_80 = arith.constant 0.000000e+00 : f32
    %280 = vector.broadcast %cst_80 : f32 to vector<8x128xf32>
    %281 = arith.cmpf ogt, %262, %280 : vector<8x128xf32>
    %cst_81 = arith.constant 1.000000e+00 : f32
    %282 = vector.broadcast %cst_81 : f32 to vector<8x128xf32>
    %283 = arith.select %281, %271, %282 : vector<8x128xi1>, vector<8x128xf32>
    %284 = arith.maximumf %260, %279 : vector<8x128xf32>
    %285 = arith.minimumf %261, %283 : vector<8x128xf32>
    %286 = arith.subf %153, %173 : vector<8x128xf32>
    %cst_82 = arith.constant 0.000000e+00 : f32
    %287 = vector.broadcast %cst_82 : f32 to vector<8x128xf32>
    %288 = arith.cmpf oeq, %286, %287 : vector<8x128xf32>
    %cst_83 = arith.constant 1.000000e+00 : f32
    %289 = vector.broadcast %cst_83 : f32 to vector<8x128xf32>
    %290 = arith.select %288, %289, %286 : vector<8x128xi1>, vector<8x128xf32>
    %291 = arith.divf %153, %290 : vector<8x128xf32>
    %cst_84 = arith.constant -1.000000e+00 : f32
    %cst_85 = arith.constant 2.000000e+00 : f32
    %292 = vector.broadcast %cst_84 : f32 to vector<8x128xf32>
    %293 = arith.maximumf %292, %291 : vector<8x128xf32>
    %294 = vector.broadcast %cst_85 : f32 to vector<8x128xf32>
    %295 = arith.minimumf %294, %293 : vector<8x128xf32>
    %cst_86 = arith.constant 0.000000e+00 : f32
    %296 = vector.broadcast %cst_86 : f32 to vector<8x128xf32>
    %297 = arith.cmpf olt, %286, %296 : vector<8x128xf32>
    %cst_87 = arith.constant 0.000000e+00 : f32
    %298 = vector.broadcast %cst_87 : f32 to vector<8x128xf32>
    %299 = arith.cmpf olt, %153, %298 : vector<8x128xf32>
    %cst_88 = arith.constant 2.000000e+00 : f32
    %cst_89 = arith.constant 0.000000e+00 : f32
    %300 = vector.broadcast %cst_88 : f32 to vector<8x128xf32>
    %301 = vector.broadcast %cst_89 : f32 to vector<8x128xf32>
    %302 = arith.select %299, %300, %301 : vector<8x128xi1>, vector<8x128xf32>
    %303 = arith.select %297, %295, %302 : vector<8x128xi1>, vector<8x128xf32>
    %cst_90 = arith.constant 0.000000e+00 : f32
    %304 = vector.broadcast %cst_90 : f32 to vector<8x128xf32>
    %305 = arith.cmpf ogt, %286, %304 : vector<8x128xf32>
    %cst_91 = arith.constant 1.000000e+00 : f32
    %306 = vector.broadcast %cst_91 : f32 to vector<8x128xf32>
    %307 = arith.select %305, %295, %306 : vector<8x128xi1>, vector<8x128xf32>
    %308 = arith.maximumf %284, %303 : vector<8x128xf32>
    %309 = arith.minimumf %285, %307 : vector<8x128xf32>
    %310 = arith.subf %49, %37 : vector<8x128xf32>
    %311 = arith.subf %53, %41 : vector<8x128xf32>
    %312 = arith.mulf %308, %310 : vector<8x128xf32>
    %313 = arith.addf %37, %312 : vector<8x128xf32>
    %314 = arith.mulf %308, %311 : vector<8x128xf32>
    %315 = arith.addf %41, %314 : vector<8x128xf32>
    %316 = arith.mulf %309, %310 : vector<8x128xf32>
    %317 = arith.addf %37, %316 : vector<8x128xf32>
    %318 = arith.mulf %309, %311 : vector<8x128xf32>
    %319 = arith.addf %41, %318 : vector<8x128xf32>
    %320 = arith.mulf %313, %319 : vector<8x128xf32>
    %321 = arith.mulf %315, %317 : vector<8x128xf32>
    %322 = arith.subf %320, %321 : vector<8x128xf32>
    %323 = arith.cmpf olt, %308, %309 : vector<8x128xf32>
    %cst_92 = arith.constant 0.000000e+00 : f32
    %324 = vector.broadcast %cst_92 : f32 to vector<8x128xf32>
    %325 = arith.select %323, %322, %324 : vector<8x128xi1>, vector<8x128xf32>
    %326 = arith.addf %28, %325 : vector<8x128xf32>
    %327 = arith.subf %158, %178 : vector<8x128xf32>
    %cst_93 = arith.constant 0.000000e+00 : f32
    %328 = vector.broadcast %cst_93 : f32 to vector<8x128xf32>
    %329 = arith.cmpf oeq, %327, %328 : vector<8x128xf32>
    %cst_94 = arith.constant 1.000000e+00 : f32
    %330 = vector.broadcast %cst_94 : f32 to vector<8x128xf32>
    %331 = arith.select %329, %330, %327 : vector<8x128xi1>, vector<8x128xf32>
    %332 = arith.divf %158, %331 : vector<8x128xf32>
    %cst_95 = arith.constant -1.000000e+00 : f32
    %cst_96 = arith.constant 2.000000e+00 : f32
    %333 = vector.broadcast %cst_95 : f32 to vector<8x128xf32>
    %334 = arith.maximumf %333, %332 : vector<8x128xf32>
    %335 = vector.broadcast %cst_96 : f32 to vector<8x128xf32>
    %336 = arith.minimumf %335, %334 : vector<8x128xf32>
    %cst_97 = arith.constant 0.000000e+00 : f32
    %337 = vector.broadcast %cst_97 : f32 to vector<8x128xf32>
    %338 = arith.cmpf olt, %327, %337 : vector<8x128xf32>
    %cst_98 = arith.constant 0.000000e+00 : f32
    %339 = vector.broadcast %cst_98 : f32 to vector<8x128xf32>
    %340 = arith.cmpf olt, %158, %339 : vector<8x128xf32>
    %cst_99 = arith.constant 2.000000e+00 : f32
    %cst_100 = arith.constant 0.000000e+00 : f32
    %341 = vector.broadcast %cst_99 : f32 to vector<8x128xf32>
    %342 = vector.broadcast %cst_100 : f32 to vector<8x128xf32>
    %343 = arith.select %340, %341, %342 : vector<8x128xi1>, vector<8x128xf32>
    %344 = arith.select %338, %336, %343 : vector<8x128xi1>, vector<8x128xf32>
    %cst_101 = arith.constant 0.000000e+00 : f32
    %345 = vector.broadcast %cst_101 : f32 to vector<8x128xf32>
    %346 = arith.cmpf ogt, %327, %345 : vector<8x128xf32>
    %cst_102 = arith.constant 1.000000e+00 : f32
    %347 = vector.broadcast %cst_102 : f32 to vector<8x128xf32>
    %348 = arith.select %346, %336, %347 : vector<8x128xi1>, vector<8x128xf32>
    %349 = arith.maximumf %28, %344 : vector<8x128xf32>
    %350 = arith.minimumf %29, %348 : vector<8x128xf32>
    %351 = arith.subf %163, %183 : vector<8x128xf32>
    %cst_103 = arith.constant 0.000000e+00 : f32
    %352 = vector.broadcast %cst_103 : f32 to vector<8x128xf32>
    %353 = arith.cmpf oeq, %351, %352 : vector<8x128xf32>
    %cst_104 = arith.constant 1.000000e+00 : f32
    %354 = vector.broadcast %cst_104 : f32 to vector<8x128xf32>
    %355 = arith.select %353, %354, %351 : vector<8x128xi1>, vector<8x128xf32>
    %356 = arith.divf %163, %355 : vector<8x128xf32>
    %cst_105 = arith.constant -1.000000e+00 : f32
    %cst_106 = arith.constant 2.000000e+00 : f32
    %357 = vector.broadcast %cst_105 : f32 to vector<8x128xf32>
    %358 = arith.maximumf %357, %356 : vector<8x128xf32>
    %359 = vector.broadcast %cst_106 : f32 to vector<8x128xf32>
    %360 = arith.minimumf %359, %358 : vector<8x128xf32>
    %cst_107 = arith.constant 0.000000e+00 : f32
    %361 = vector.broadcast %cst_107 : f32 to vector<8x128xf32>
    %362 = arith.cmpf olt, %351, %361 : vector<8x128xf32>
    %cst_108 = arith.constant 0.000000e+00 : f32
    %363 = vector.broadcast %cst_108 : f32 to vector<8x128xf32>
    %364 = arith.cmpf olt, %163, %363 : vector<8x128xf32>
    %cst_109 = arith.constant 2.000000e+00 : f32
    %cst_110 = arith.constant 0.000000e+00 : f32
    %365 = vector.broadcast %cst_109 : f32 to vector<8x128xf32>
    %366 = vector.broadcast %cst_110 : f32 to vector<8x128xf32>
    %367 = arith.select %364, %365, %366 : vector<8x128xi1>, vector<8x128xf32>
    %368 = arith.select %362, %360, %367 : vector<8x128xi1>, vector<8x128xf32>
    %cst_111 = arith.constant 0.000000e+00 : f32
    %369 = vector.broadcast %cst_111 : f32 to vector<8x128xf32>
    %370 = arith.cmpf ogt, %351, %369 : vector<8x128xf32>
    %cst_112 = arith.constant 1.000000e+00 : f32
    %371 = vector.broadcast %cst_112 : f32 to vector<8x128xf32>
    %372 = arith.select %370, %360, %371 : vector<8x128xi1>, vector<8x128xf32>
    %373 = arith.maximumf %349, %368 : vector<8x128xf32>
    %374 = arith.minimumf %350, %372 : vector<8x128xf32>
    %375 = arith.subf %168, %188 : vector<8x128xf32>
    %cst_113 = arith.constant 0.000000e+00 : f32
    %376 = vector.broadcast %cst_113 : f32 to vector<8x128xf32>
    %377 = arith.cmpf oeq, %375, %376 : vector<8x128xf32>
    %cst_114 = arith.constant 1.000000e+00 : f32
    %378 = vector.broadcast %cst_114 : f32 to vector<8x128xf32>
    %379 = arith.select %377, %378, %375 : vector<8x128xi1>, vector<8x128xf32>
    %380 = arith.divf %168, %379 : vector<8x128xf32>
    %cst_115 = arith.constant -1.000000e+00 : f32
    %cst_116 = arith.constant 2.000000e+00 : f32
    %381 = vector.broadcast %cst_115 : f32 to vector<8x128xf32>
    %382 = arith.maximumf %381, %380 : vector<8x128xf32>
    %383 = vector.broadcast %cst_116 : f32 to vector<8x128xf32>
    %384 = arith.minimumf %383, %382 : vector<8x128xf32>
    %cst_117 = arith.constant 0.000000e+00 : f32
    %385 = vector.broadcast %cst_117 : f32 to vector<8x128xf32>
    %386 = arith.cmpf olt, %375, %385 : vector<8x128xf32>
    %cst_118 = arith.constant 0.000000e+00 : f32
    %387 = vector.broadcast %cst_118 : f32 to vector<8x128xf32>
    %388 = arith.cmpf olt, %168, %387 : vector<8x128xf32>
    %cst_119 = arith.constant 2.000000e+00 : f32
    %cst_120 = arith.constant 0.000000e+00 : f32
    %389 = vector.broadcast %cst_119 : f32 to vector<8x128xf32>
    %390 = vector.broadcast %cst_120 : f32 to vector<8x128xf32>
    %391 = arith.select %388, %389, %390 : vector<8x128xi1>, vector<8x128xf32>
    %392 = arith.select %386, %384, %391 : vector<8x128xi1>, vector<8x128xf32>
    %cst_121 = arith.constant 0.000000e+00 : f32
    %393 = vector.broadcast %cst_121 : f32 to vector<8x128xf32>
    %394 = arith.cmpf ogt, %375, %393 : vector<8x128xf32>
    %cst_122 = arith.constant 1.000000e+00 : f32
    %395 = vector.broadcast %cst_122 : f32 to vector<8x128xf32>
    %396 = arith.select %394, %384, %395 : vector<8x128xi1>, vector<8x128xf32>
    %397 = arith.maximumf %373, %392 : vector<8x128xf32>
    %398 = arith.minimumf %374, %396 : vector<8x128xf32>
    %399 = arith.subf %173, %193 : vector<8x128xf32>
    %cst_123 = arith.constant 0.000000e+00 : f32
    %400 = vector.broadcast %cst_123 : f32 to vector<8x128xf32>
    %401 = arith.cmpf oeq, %399, %400 : vector<8x128xf32>
    %cst_124 = arith.constant 1.000000e+00 : f32
    %402 = vector.broadcast %cst_124 : f32 to vector<8x128xf32>
    %403 = arith.select %401, %402, %399 : vector<8x128xi1>, vector<8x128xf32>
    %404 = arith.divf %173, %403 : vector<8x128xf32>
    %cst_125 = arith.constant -1.000000e+00 : f32
    %cst_126 = arith.constant 2.000000e+00 : f32
    %405 = vector.broadcast %cst_125 : f32 to vector<8x128xf32>
    %406 = arith.maximumf %405, %404 : vector<8x128xf32>
    %407 = vector.broadcast %cst_126 : f32 to vector<8x128xf32>
    %408 = arith.minimumf %407, %406 : vector<8x128xf32>
    %cst_127 = arith.constant 0.000000e+00 : f32
    %409 = vector.broadcast %cst_127 : f32 to vector<8x128xf32>
    %410 = arith.cmpf olt, %399, %409 : vector<8x128xf32>
    %cst_128 = arith.constant 0.000000e+00 : f32
    %411 = vector.broadcast %cst_128 : f32 to vector<8x128xf32>
    %412 = arith.cmpf olt, %173, %411 : vector<8x128xf32>
    %cst_129 = arith.constant 2.000000e+00 : f32
    %cst_130 = arith.constant 0.000000e+00 : f32
    %413 = vector.broadcast %cst_129 : f32 to vector<8x128xf32>
    %414 = vector.broadcast %cst_130 : f32 to vector<8x128xf32>
    %415 = arith.select %412, %413, %414 : vector<8x128xi1>, vector<8x128xf32>
    %416 = arith.select %410, %408, %415 : vector<8x128xi1>, vector<8x128xf32>
    %cst_131 = arith.constant 0.000000e+00 : f32
    %417 = vector.broadcast %cst_131 : f32 to vector<8x128xf32>
    %418 = arith.cmpf ogt, %399, %417 : vector<8x128xf32>
    %cst_132 = arith.constant 1.000000e+00 : f32
    %419 = vector.broadcast %cst_132 : f32 to vector<8x128xf32>
    %420 = arith.select %418, %408, %419 : vector<8x128xi1>, vector<8x128xf32>
    %421 = arith.maximumf %397, %416 : vector<8x128xf32>
    %422 = arith.minimumf %398, %420 : vector<8x128xf32>
    %423 = arith.subf %61, %49 : vector<8x128xf32>
    %424 = arith.subf %65, %53 : vector<8x128xf32>
    %425 = arith.mulf %421, %423 : vector<8x128xf32>
    %426 = arith.addf %49, %425 : vector<8x128xf32>
    %427 = arith.mulf %421, %424 : vector<8x128xf32>
    %428 = arith.addf %53, %427 : vector<8x128xf32>
    %429 = arith.mulf %422, %423 : vector<8x128xf32>
    %430 = arith.addf %49, %429 : vector<8x128xf32>
    %431 = arith.mulf %422, %424 : vector<8x128xf32>
    %432 = arith.addf %53, %431 : vector<8x128xf32>
    %433 = arith.mulf %426, %432 : vector<8x128xf32>
    %434 = arith.mulf %428, %430 : vector<8x128xf32>
    %435 = arith.subf %433, %434 : vector<8x128xf32>
    %436 = arith.cmpf olt, %421, %422 : vector<8x128xf32>
    %cst_133 = arith.constant 0.000000e+00 : f32
    %437 = vector.broadcast %cst_133 : f32 to vector<8x128xf32>
    %438 = arith.select %436, %435, %437 : vector<8x128xi1>, vector<8x128xf32>
    %439 = arith.addf %326, %438 : vector<8x128xf32>
    %440 = arith.subf %178, %198 : vector<8x128xf32>
    %cst_134 = arith.constant 0.000000e+00 : f32
    %441 = vector.broadcast %cst_134 : f32 to vector<8x128xf32>
    %442 = arith.cmpf oeq, %440, %441 : vector<8x128xf32>
    %cst_135 = arith.constant 1.000000e+00 : f32
    %443 = vector.broadcast %cst_135 : f32 to vector<8x128xf32>
    %444 = arith.select %442, %443, %440 : vector<8x128xi1>, vector<8x128xf32>
    %445 = arith.divf %178, %444 : vector<8x128xf32>
    %cst_136 = arith.constant -1.000000e+00 : f32
    %cst_137 = arith.constant 2.000000e+00 : f32
    %446 = vector.broadcast %cst_136 : f32 to vector<8x128xf32>
    %447 = arith.maximumf %446, %445 : vector<8x128xf32>
    %448 = vector.broadcast %cst_137 : f32 to vector<8x128xf32>
    %449 = arith.minimumf %448, %447 : vector<8x128xf32>
    %cst_138 = arith.constant 0.000000e+00 : f32
    %450 = vector.broadcast %cst_138 : f32 to vector<8x128xf32>
    %451 = arith.cmpf olt, %440, %450 : vector<8x128xf32>
    %cst_139 = arith.constant 0.000000e+00 : f32
    %452 = vector.broadcast %cst_139 : f32 to vector<8x128xf32>
    %453 = arith.cmpf olt, %178, %452 : vector<8x128xf32>
    %cst_140 = arith.constant 2.000000e+00 : f32
    %cst_141 = arith.constant 0.000000e+00 : f32
    %454 = vector.broadcast %cst_140 : f32 to vector<8x128xf32>
    %455 = vector.broadcast %cst_141 : f32 to vector<8x128xf32>
    %456 = arith.select %453, %454, %455 : vector<8x128xi1>, vector<8x128xf32>
    %457 = arith.select %451, %449, %456 : vector<8x128xi1>, vector<8x128xf32>
    %cst_142 = arith.constant 0.000000e+00 : f32
    %458 = vector.broadcast %cst_142 : f32 to vector<8x128xf32>
    %459 = arith.cmpf ogt, %440, %458 : vector<8x128xf32>
    %cst_143 = arith.constant 1.000000e+00 : f32
    %460 = vector.broadcast %cst_143 : f32 to vector<8x128xf32>
    %461 = arith.select %459, %449, %460 : vector<8x128xi1>, vector<8x128xf32>
    %462 = arith.maximumf %28, %457 : vector<8x128xf32>
    %463 = arith.minimumf %29, %461 : vector<8x128xf32>
    %464 = arith.subf %183, %203 : vector<8x128xf32>
    %cst_144 = arith.constant 0.000000e+00 : f32
    %465 = vector.broadcast %cst_144 : f32 to vector<8x128xf32>
    %466 = arith.cmpf oeq, %464, %465 : vector<8x128xf32>
    %cst_145 = arith.constant 1.000000e+00 : f32
    %467 = vector.broadcast %cst_145 : f32 to vector<8x128xf32>
    %468 = arith.select %466, %467, %464 : vector<8x128xi1>, vector<8x128xf32>
    %469 = arith.divf %183, %468 : vector<8x128xf32>
    %cst_146 = arith.constant -1.000000e+00 : f32
    %cst_147 = arith.constant 2.000000e+00 : f32
    %470 = vector.broadcast %cst_146 : f32 to vector<8x128xf32>
    %471 = arith.maximumf %470, %469 : vector<8x128xf32>
    %472 = vector.broadcast %cst_147 : f32 to vector<8x128xf32>
    %473 = arith.minimumf %472, %471 : vector<8x128xf32>
    %cst_148 = arith.constant 0.000000e+00 : f32
    %474 = vector.broadcast %cst_148 : f32 to vector<8x128xf32>
    %475 = arith.cmpf olt, %464, %474 : vector<8x128xf32>
    %cst_149 = arith.constant 0.000000e+00 : f32
    %476 = vector.broadcast %cst_149 : f32 to vector<8x128xf32>
    %477 = arith.cmpf olt, %183, %476 : vector<8x128xf32>
    %cst_150 = arith.constant 2.000000e+00 : f32
    %cst_151 = arith.constant 0.000000e+00 : f32
    %478 = vector.broadcast %cst_150 : f32 to vector<8x128xf32>
    %479 = vector.broadcast %cst_151 : f32 to vector<8x128xf32>
    %480 = arith.select %477, %478, %479 : vector<8x128xi1>, vector<8x128xf32>
    %481 = arith.select %475, %473, %480 : vector<8x128xi1>, vector<8x128xf32>
    %cst_152 = arith.constant 0.000000e+00 : f32
    %482 = vector.broadcast %cst_152 : f32 to vector<8x128xf32>
    %483 = arith.cmpf ogt, %464, %482 : vector<8x128xf32>
    %cst_153 = arith.constant 1.000000e+00 : f32
    %484 = vector.broadcast %cst_153 : f32 to vector<8x128xf32>
    %485 = arith.select %483, %473, %484 : vector<8x128xi1>, vector<8x128xf32>
    %486 = arith.maximumf %462, %481 : vector<8x128xf32>
    %487 = arith.minimumf %463, %485 : vector<8x128xf32>
    %488 = arith.subf %188, %208 : vector<8x128xf32>
    %cst_154 = arith.constant 0.000000e+00 : f32
    %489 = vector.broadcast %cst_154 : f32 to vector<8x128xf32>
    %490 = arith.cmpf oeq, %488, %489 : vector<8x128xf32>
    %cst_155 = arith.constant 1.000000e+00 : f32
    %491 = vector.broadcast %cst_155 : f32 to vector<8x128xf32>
    %492 = arith.select %490, %491, %488 : vector<8x128xi1>, vector<8x128xf32>
    %493 = arith.divf %188, %492 : vector<8x128xf32>
    %cst_156 = arith.constant -1.000000e+00 : f32
    %cst_157 = arith.constant 2.000000e+00 : f32
    %494 = vector.broadcast %cst_156 : f32 to vector<8x128xf32>
    %495 = arith.maximumf %494, %493 : vector<8x128xf32>
    %496 = vector.broadcast %cst_157 : f32 to vector<8x128xf32>
    %497 = arith.minimumf %496, %495 : vector<8x128xf32>
    %cst_158 = arith.constant 0.000000e+00 : f32
    %498 = vector.broadcast %cst_158 : f32 to vector<8x128xf32>
    %499 = arith.cmpf olt, %488, %498 : vector<8x128xf32>
    %cst_159 = arith.constant 0.000000e+00 : f32
    %500 = vector.broadcast %cst_159 : f32 to vector<8x128xf32>
    %501 = arith.cmpf olt, %188, %500 : vector<8x128xf32>
    %cst_160 = arith.constant 2.000000e+00 : f32
    %cst_161 = arith.constant 0.000000e+00 : f32
    %502 = vector.broadcast %cst_160 : f32 to vector<8x128xf32>
    %503 = vector.broadcast %cst_161 : f32 to vector<8x128xf32>
    %504 = arith.select %501, %502, %503 : vector<8x128xi1>, vector<8x128xf32>
    %505 = arith.select %499, %497, %504 : vector<8x128xi1>, vector<8x128xf32>
    %cst_162 = arith.constant 0.000000e+00 : f32
    %506 = vector.broadcast %cst_162 : f32 to vector<8x128xf32>
    %507 = arith.cmpf ogt, %488, %506 : vector<8x128xf32>
    %cst_163 = arith.constant 1.000000e+00 : f32
    %508 = vector.broadcast %cst_163 : f32 to vector<8x128xf32>
    %509 = arith.select %507, %497, %508 : vector<8x128xi1>, vector<8x128xf32>
    %510 = arith.maximumf %486, %505 : vector<8x128xf32>
    %511 = arith.minimumf %487, %509 : vector<8x128xf32>
    %512 = arith.subf %193, %213 : vector<8x128xf32>
    %cst_164 = arith.constant 0.000000e+00 : f32
    %513 = vector.broadcast %cst_164 : f32 to vector<8x128xf32>
    %514 = arith.cmpf oeq, %512, %513 : vector<8x128xf32>
    %cst_165 = arith.constant 1.000000e+00 : f32
    %515 = vector.broadcast %cst_165 : f32 to vector<8x128xf32>
    %516 = arith.select %514, %515, %512 : vector<8x128xi1>, vector<8x128xf32>
    %517 = arith.divf %193, %516 : vector<8x128xf32>
    %cst_166 = arith.constant -1.000000e+00 : f32
    %cst_167 = arith.constant 2.000000e+00 : f32
    %518 = vector.broadcast %cst_166 : f32 to vector<8x128xf32>
    %519 = arith.maximumf %518, %517 : vector<8x128xf32>
    %520 = vector.broadcast %cst_167 : f32 to vector<8x128xf32>
    %521 = arith.minimumf %520, %519 : vector<8x128xf32>
    %cst_168 = arith.constant 0.000000e+00 : f32
    %522 = vector.broadcast %cst_168 : f32 to vector<8x128xf32>
    %523 = arith.cmpf olt, %512, %522 : vector<8x128xf32>
    %cst_169 = arith.constant 0.000000e+00 : f32
    %524 = vector.broadcast %cst_169 : f32 to vector<8x128xf32>
    %525 = arith.cmpf olt, %193, %524 : vector<8x128xf32>
    %cst_170 = arith.constant 2.000000e+00 : f32
    %cst_171 = arith.constant 0.000000e+00 : f32
    %526 = vector.broadcast %cst_170 : f32 to vector<8x128xf32>
    %527 = vector.broadcast %cst_171 : f32 to vector<8x128xf32>
    %528 = arith.select %525, %526, %527 : vector<8x128xi1>, vector<8x128xf32>
    %529 = arith.select %523, %521, %528 : vector<8x128xi1>, vector<8x128xf32>
    %cst_172 = arith.constant 0.000000e+00 : f32
    %530 = vector.broadcast %cst_172 : f32 to vector<8x128xf32>
    %531 = arith.cmpf ogt, %512, %530 : vector<8x128xf32>
    %cst_173 = arith.constant 1.000000e+00 : f32
    %532 = vector.broadcast %cst_173 : f32 to vector<8x128xf32>
    %533 = arith.select %531, %521, %532 : vector<8x128xi1>, vector<8x128xf32>
    %534 = arith.maximumf %510, %529 : vector<8x128xf32>
    %535 = arith.minimumf %511, %533 : vector<8x128xf32>
    %536 = arith.subf %73, %61 : vector<8x128xf32>
    %537 = arith.subf %77, %65 : vector<8x128xf32>
    %538 = arith.mulf %534, %536 : vector<8x128xf32>
    %539 = arith.addf %61, %538 : vector<8x128xf32>
    %540 = arith.mulf %534, %537 : vector<8x128xf32>
    %541 = arith.addf %65, %540 : vector<8x128xf32>
    %542 = arith.mulf %535, %536 : vector<8x128xf32>
    %543 = arith.addf %61, %542 : vector<8x128xf32>
    %544 = arith.mulf %535, %537 : vector<8x128xf32>
    %545 = arith.addf %65, %544 : vector<8x128xf32>
    %546 = arith.mulf %539, %545 : vector<8x128xf32>
    %547 = arith.mulf %541, %543 : vector<8x128xf32>
    %548 = arith.subf %546, %547 : vector<8x128xf32>
    %549 = arith.cmpf olt, %534, %535 : vector<8x128xf32>
    %cst_174 = arith.constant 0.000000e+00 : f32
    %550 = vector.broadcast %cst_174 : f32 to vector<8x128xf32>
    %551 = arith.select %549, %548, %550 : vector<8x128xi1>, vector<8x128xf32>
    %552 = arith.addf %439, %551 : vector<8x128xf32>
    %553 = arith.subf %198, %138 : vector<8x128xf32>
    %cst_175 = arith.constant 0.000000e+00 : f32
    %554 = vector.broadcast %cst_175 : f32 to vector<8x128xf32>
    %555 = arith.cmpf oeq, %553, %554 : vector<8x128xf32>
    %cst_176 = arith.constant 1.000000e+00 : f32
    %556 = vector.broadcast %cst_176 : f32 to vector<8x128xf32>
    %557 = arith.select %555, %556, %553 : vector<8x128xi1>, vector<8x128xf32>
    %558 = arith.divf %198, %557 : vector<8x128xf32>
    %cst_177 = arith.constant -1.000000e+00 : f32
    %cst_178 = arith.constant 2.000000e+00 : f32
    %559 = vector.broadcast %cst_177 : f32 to vector<8x128xf32>
    %560 = arith.maximumf %559, %558 : vector<8x128xf32>
    %561 = vector.broadcast %cst_178 : f32 to vector<8x128xf32>
    %562 = arith.minimumf %561, %560 : vector<8x128xf32>
    %cst_179 = arith.constant 0.000000e+00 : f32
    %563 = vector.broadcast %cst_179 : f32 to vector<8x128xf32>
    %564 = arith.cmpf olt, %553, %563 : vector<8x128xf32>
    %cst_180 = arith.constant 0.000000e+00 : f32
    %565 = vector.broadcast %cst_180 : f32 to vector<8x128xf32>
    %566 = arith.cmpf olt, %198, %565 : vector<8x128xf32>
    %cst_181 = arith.constant 2.000000e+00 : f32
    %cst_182 = arith.constant 0.000000e+00 : f32
    %567 = vector.broadcast %cst_181 : f32 to vector<8x128xf32>
    %568 = vector.broadcast %cst_182 : f32 to vector<8x128xf32>
    %569 = arith.select %566, %567, %568 : vector<8x128xi1>, vector<8x128xf32>
    %570 = arith.select %564, %562, %569 : vector<8x128xi1>, vector<8x128xf32>
    %cst_183 = arith.constant 0.000000e+00 : f32
    %571 = vector.broadcast %cst_183 : f32 to vector<8x128xf32>
    %572 = arith.cmpf ogt, %553, %571 : vector<8x128xf32>
    %cst_184 = arith.constant 1.000000e+00 : f32
    %573 = vector.broadcast %cst_184 : f32 to vector<8x128xf32>
    %574 = arith.select %572, %562, %573 : vector<8x128xi1>, vector<8x128xf32>
    %575 = arith.maximumf %28, %570 : vector<8x128xf32>
    %576 = arith.minimumf %29, %574 : vector<8x128xf32>
    %577 = arith.subf %203, %143 : vector<8x128xf32>
    %cst_185 = arith.constant 0.000000e+00 : f32
    %578 = vector.broadcast %cst_185 : f32 to vector<8x128xf32>
    %579 = arith.cmpf oeq, %577, %578 : vector<8x128xf32>
    %cst_186 = arith.constant 1.000000e+00 : f32
    %580 = vector.broadcast %cst_186 : f32 to vector<8x128xf32>
    %581 = arith.select %579, %580, %577 : vector<8x128xi1>, vector<8x128xf32>
    %582 = arith.divf %203, %581 : vector<8x128xf32>
    %cst_187 = arith.constant -1.000000e+00 : f32
    %cst_188 = arith.constant 2.000000e+00 : f32
    %583 = vector.broadcast %cst_187 : f32 to vector<8x128xf32>
    %584 = arith.maximumf %583, %582 : vector<8x128xf32>
    %585 = vector.broadcast %cst_188 : f32 to vector<8x128xf32>
    %586 = arith.minimumf %585, %584 : vector<8x128xf32>
    %cst_189 = arith.constant 0.000000e+00 : f32
    %587 = vector.broadcast %cst_189 : f32 to vector<8x128xf32>
    %588 = arith.cmpf olt, %577, %587 : vector<8x128xf32>
    %cst_190 = arith.constant 0.000000e+00 : f32
    %589 = vector.broadcast %cst_190 : f32 to vector<8x128xf32>
    %590 = arith.cmpf olt, %203, %589 : vector<8x128xf32>
    %cst_191 = arith.constant 2.000000e+00 : f32
    %cst_192 = arith.constant 0.000000e+00 : f32
    %591 = vector.broadcast %cst_191 : f32 to vector<8x128xf32>
    %592 = vector.broadcast %cst_192 : f32 to vector<8x128xf32>
    %593 = arith.select %590, %591, %592 : vector<8x128xi1>, vector<8x128xf32>
    %594 = arith.select %588, %586, %593 : vector<8x128xi1>, vector<8x128xf32>
    %cst_193 = arith.constant 0.000000e+00 : f32
    %595 = vector.broadcast %cst_193 : f32 to vector<8x128xf32>
    %596 = arith.cmpf ogt, %577, %595 : vector<8x128xf32>
    %cst_194 = arith.constant 1.000000e+00 : f32
    %597 = vector.broadcast %cst_194 : f32 to vector<8x128xf32>
    %598 = arith.select %596, %586, %597 : vector<8x128xi1>, vector<8x128xf32>
    %599 = arith.maximumf %575, %594 : vector<8x128xf32>
    %600 = arith.minimumf %576, %598 : vector<8x128xf32>
    %601 = arith.subf %208, %148 : vector<8x128xf32>
    %cst_195 = arith.constant 0.000000e+00 : f32
    %602 = vector.broadcast %cst_195 : f32 to vector<8x128xf32>
    %603 = arith.cmpf oeq, %601, %602 : vector<8x128xf32>
    %cst_196 = arith.constant 1.000000e+00 : f32
    %604 = vector.broadcast %cst_196 : f32 to vector<8x128xf32>
    %605 = arith.select %603, %604, %601 : vector<8x128xi1>, vector<8x128xf32>
    %606 = arith.divf %208, %605 : vector<8x128xf32>
    %cst_197 = arith.constant -1.000000e+00 : f32
    %cst_198 = arith.constant 2.000000e+00 : f32
    %607 = vector.broadcast %cst_197 : f32 to vector<8x128xf32>
    %608 = arith.maximumf %607, %606 : vector<8x128xf32>
    %609 = vector.broadcast %cst_198 : f32 to vector<8x128xf32>
    %610 = arith.minimumf %609, %608 : vector<8x128xf32>
    %cst_199 = arith.constant 0.000000e+00 : f32
    %611 = vector.broadcast %cst_199 : f32 to vector<8x128xf32>
    %612 = arith.cmpf olt, %601, %611 : vector<8x128xf32>
    %cst_200 = arith.constant 0.000000e+00 : f32
    %613 = vector.broadcast %cst_200 : f32 to vector<8x128xf32>
    %614 = arith.cmpf olt, %208, %613 : vector<8x128xf32>
    %cst_201 = arith.constant 2.000000e+00 : f32
    %cst_202 = arith.constant 0.000000e+00 : f32
    %615 = vector.broadcast %cst_201 : f32 to vector<8x128xf32>
    %616 = vector.broadcast %cst_202 : f32 to vector<8x128xf32>
    %617 = arith.select %614, %615, %616 : vector<8x128xi1>, vector<8x128xf32>
    %618 = arith.select %612, %610, %617 : vector<8x128xi1>, vector<8x128xf32>
    %cst_203 = arith.constant 0.000000e+00 : f32
    %619 = vector.broadcast %cst_203 : f32 to vector<8x128xf32>
    %620 = arith.cmpf ogt, %601, %619 : vector<8x128xf32>
    %cst_204 = arith.constant 1.000000e+00 : f32
    %621 = vector.broadcast %cst_204 : f32 to vector<8x128xf32>
    %622 = arith.select %620, %610, %621 : vector<8x128xi1>, vector<8x128xf32>
    %623 = arith.maximumf %599, %618 : vector<8x128xf32>
    %624 = arith.minimumf %600, %622 : vector<8x128xf32>
    %625 = arith.subf %213, %153 : vector<8x128xf32>
    %cst_205 = arith.constant 0.000000e+00 : f32
    %626 = vector.broadcast %cst_205 : f32 to vector<8x128xf32>
    %627 = arith.cmpf oeq, %625, %626 : vector<8x128xf32>
    %cst_206 = arith.constant 1.000000e+00 : f32
    %628 = vector.broadcast %cst_206 : f32 to vector<8x128xf32>
    %629 = arith.select %627, %628, %625 : vector<8x128xi1>, vector<8x128xf32>
    %630 = arith.divf %213, %629 : vector<8x128xf32>
    %cst_207 = arith.constant -1.000000e+00 : f32
    %cst_208 = arith.constant 2.000000e+00 : f32
    %631 = vector.broadcast %cst_207 : f32 to vector<8x128xf32>
    %632 = arith.maximumf %631, %630 : vector<8x128xf32>
    %633 = vector.broadcast %cst_208 : f32 to vector<8x128xf32>
    %634 = arith.minimumf %633, %632 : vector<8x128xf32>
    %cst_209 = arith.constant 0.000000e+00 : f32
    %635 = vector.broadcast %cst_209 : f32 to vector<8x128xf32>
    %636 = arith.cmpf olt, %625, %635 : vector<8x128xf32>
    %cst_210 = arith.constant 0.000000e+00 : f32
    %637 = vector.broadcast %cst_210 : f32 to vector<8x128xf32>
    %638 = arith.cmpf olt, %213, %637 : vector<8x128xf32>
    %cst_211 = arith.constant 2.000000e+00 : f32
    %cst_212 = arith.constant 0.000000e+00 : f32
    %639 = vector.broadcast %cst_211 : f32 to vector<8x128xf32>
    %640 = vector.broadcast %cst_212 : f32 to vector<8x128xf32>
    %641 = arith.select %638, %639, %640 : vector<8x128xi1>, vector<8x128xf32>
    %642 = arith.select %636, %634, %641 : vector<8x128xi1>, vector<8x128xf32>
    %cst_213 = arith.constant 0.000000e+00 : f32
    %643 = vector.broadcast %cst_213 : f32 to vector<8x128xf32>
    %644 = arith.cmpf ogt, %625, %643 : vector<8x128xf32>
    %cst_214 = arith.constant 1.000000e+00 : f32
    %645 = vector.broadcast %cst_214 : f32 to vector<8x128xf32>
    %646 = arith.select %644, %634, %645 : vector<8x128xi1>, vector<8x128xf32>
    %647 = arith.maximumf %623, %642 : vector<8x128xf32>
    %648 = arith.minimumf %624, %646 : vector<8x128xf32>
    %649 = arith.subf %37, %73 : vector<8x128xf32>
    %650 = arith.subf %41, %77 : vector<8x128xf32>
    %651 = arith.mulf %647, %649 : vector<8x128xf32>
    %652 = arith.addf %73, %651 : vector<8x128xf32>
    %653 = arith.mulf %647, %650 : vector<8x128xf32>
    %654 = arith.addf %77, %653 : vector<8x128xf32>
    %655 = arith.mulf %648, %649 : vector<8x128xf32>
    %656 = arith.addf %73, %655 : vector<8x128xf32>
    %657 = arith.mulf %648, %650 : vector<8x128xf32>
    %658 = arith.addf %77, %657 : vector<8x128xf32>
    %659 = arith.mulf %652, %658 : vector<8x128xf32>
    %660 = arith.mulf %654, %656 : vector<8x128xf32>
    %661 = arith.subf %659, %660 : vector<8x128xf32>
    %662 = arith.cmpf olt, %647, %648 : vector<8x128xf32>
    %cst_215 = arith.constant 0.000000e+00 : f32
    %663 = vector.broadcast %cst_215 : f32 to vector<8x128xf32>
    %664 = arith.select %662, %661, %663 : vector<8x128xi1>, vector<8x128xf32>
    %665 = arith.addf %552, %664 : vector<8x128xf32>
    %666 = arith.subf %49, %37 : vector<8x128xf32>
    %667 = arith.subf %61, %49 : vector<8x128xf32>
    %668 = arith.subf %73, %61 : vector<8x128xf32>
    %669 = arith.subf %37, %73 : vector<8x128xf32>
    %670 = arith.subf %53, %41 : vector<8x128xf32>
    %671 = arith.subf %65, %53 : vector<8x128xf32>
    %672 = arith.subf %77, %65 : vector<8x128xf32>
    %673 = arith.subf %41, %77 : vector<8x128xf32>
    %674 = arith.subf %89, %41 : vector<8x128xf32>
    %675 = arith.mulf %666, %674 : vector<8x128xf32>
    %676 = arith.subf %85, %37 : vector<8x128xf32>
    %677 = arith.mulf %670, %676 : vector<8x128xf32>
    %678 = arith.subf %675, %677 : vector<8x128xf32>
    %679 = arith.subf %89, %53 : vector<8x128xf32>
    %680 = arith.mulf %667, %679 : vector<8x128xf32>
    %681 = arith.subf %85, %49 : vector<8x128xf32>
    %682 = arith.mulf %671, %681 : vector<8x128xf32>
    %683 = arith.subf %680, %682 : vector<8x128xf32>
    %684 = arith.subf %89, %65 : vector<8x128xf32>
    %685 = arith.mulf %668, %684 : vector<8x128xf32>
    %686 = arith.subf %85, %61 : vector<8x128xf32>
    %687 = arith.mulf %672, %686 : vector<8x128xf32>
    %688 = arith.subf %685, %687 : vector<8x128xf32>
    %689 = arith.subf %89, %77 : vector<8x128xf32>
    %690 = arith.mulf %669, %689 : vector<8x128xf32>
    %691 = arith.subf %85, %73 : vector<8x128xf32>
    %692 = arith.mulf %673, %691 : vector<8x128xf32>
    %693 = arith.subf %690, %692 : vector<8x128xf32>
    %694 = arith.subf %101, %41 : vector<8x128xf32>
    %695 = arith.mulf %666, %694 : vector<8x128xf32>
    %696 = arith.subf %97, %37 : vector<8x128xf32>
    %697 = arith.mulf %670, %696 : vector<8x128xf32>
    %698 = arith.subf %695, %697 : vector<8x128xf32>
    %699 = arith.subf %101, %53 : vector<8x128xf32>
    %700 = arith.mulf %667, %699 : vector<8x128xf32>
    %701 = arith.subf %97, %49 : vector<8x128xf32>
    %702 = arith.mulf %671, %701 : vector<8x128xf32>
    %703 = arith.subf %700, %702 : vector<8x128xf32>
    %704 = arith.subf %101, %65 : vector<8x128xf32>
    %705 = arith.mulf %668, %704 : vector<8x128xf32>
    %706 = arith.subf %97, %61 : vector<8x128xf32>
    %707 = arith.mulf %672, %706 : vector<8x128xf32>
    %708 = arith.subf %705, %707 : vector<8x128xf32>
    %709 = arith.subf %101, %77 : vector<8x128xf32>
    %710 = arith.mulf %669, %709 : vector<8x128xf32>
    %711 = arith.subf %97, %73 : vector<8x128xf32>
    %712 = arith.mulf %673, %711 : vector<8x128xf32>
    %713 = arith.subf %710, %712 : vector<8x128xf32>
    %714 = arith.subf %113, %41 : vector<8x128xf32>
    %715 = arith.mulf %666, %714 : vector<8x128xf32>
    %716 = arith.subf %109, %37 : vector<8x128xf32>
    %717 = arith.mulf %670, %716 : vector<8x128xf32>
    %718 = arith.subf %715, %717 : vector<8x128xf32>
    %719 = arith.subf %113, %53 : vector<8x128xf32>
    %720 = arith.mulf %667, %719 : vector<8x128xf32>
    %721 = arith.subf %109, %49 : vector<8x128xf32>
    %722 = arith.mulf %671, %721 : vector<8x128xf32>
    %723 = arith.subf %720, %722 : vector<8x128xf32>
    %724 = arith.subf %113, %65 : vector<8x128xf32>
    %725 = arith.mulf %668, %724 : vector<8x128xf32>
    %726 = arith.subf %109, %61 : vector<8x128xf32>
    %727 = arith.mulf %672, %726 : vector<8x128xf32>
    %728 = arith.subf %725, %727 : vector<8x128xf32>
    %729 = arith.subf %113, %77 : vector<8x128xf32>
    %730 = arith.mulf %669, %729 : vector<8x128xf32>
    %731 = arith.subf %109, %73 : vector<8x128xf32>
    %732 = arith.mulf %673, %731 : vector<8x128xf32>
    %733 = arith.subf %730, %732 : vector<8x128xf32>
    %734 = arith.subf %125, %41 : vector<8x128xf32>
    %735 = arith.mulf %666, %734 : vector<8x128xf32>
    %736 = arith.subf %121, %37 : vector<8x128xf32>
    %737 = arith.mulf %670, %736 : vector<8x128xf32>
    %738 = arith.subf %735, %737 : vector<8x128xf32>
    %739 = arith.subf %125, %53 : vector<8x128xf32>
    %740 = arith.mulf %667, %739 : vector<8x128xf32>
    %741 = arith.subf %121, %49 : vector<8x128xf32>
    %742 = arith.mulf %671, %741 : vector<8x128xf32>
    %743 = arith.subf %740, %742 : vector<8x128xf32>
    %744 = arith.subf %125, %65 : vector<8x128xf32>
    %745 = arith.mulf %668, %744 : vector<8x128xf32>
    %746 = arith.subf %121, %61 : vector<8x128xf32>
    %747 = arith.mulf %672, %746 : vector<8x128xf32>
    %748 = arith.subf %745, %747 : vector<8x128xf32>
    %749 = arith.subf %125, %77 : vector<8x128xf32>
    %750 = arith.mulf %669, %749 : vector<8x128xf32>
    %751 = arith.subf %121, %73 : vector<8x128xf32>
    %752 = arith.mulf %673, %751 : vector<8x128xf32>
    %753 = arith.subf %750, %752 : vector<8x128xf32>
    %754 = arith.subf %678, %698 : vector<8x128xf32>
    %cst_216 = arith.constant 0.000000e+00 : f32
    %755 = vector.broadcast %cst_216 : f32 to vector<8x128xf32>
    %756 = arith.cmpf oeq, %754, %755 : vector<8x128xf32>
    %cst_217 = arith.constant 1.000000e+00 : f32
    %757 = vector.broadcast %cst_217 : f32 to vector<8x128xf32>
    %758 = arith.select %756, %757, %754 : vector<8x128xi1>, vector<8x128xf32>
    %759 = arith.divf %678, %758 : vector<8x128xf32>
    %cst_218 = arith.constant -1.000000e+00 : f32
    %cst_219 = arith.constant 2.000000e+00 : f32
    %760 = vector.broadcast %cst_218 : f32 to vector<8x128xf32>
    %761 = arith.maximumf %760, %759 : vector<8x128xf32>
    %762 = vector.broadcast %cst_219 : f32 to vector<8x128xf32>
    %763 = arith.minimumf %762, %761 : vector<8x128xf32>
    %cst_220 = arith.constant 0.000000e+00 : f32
    %764 = vector.broadcast %cst_220 : f32 to vector<8x128xf32>
    %765 = arith.cmpf olt, %754, %764 : vector<8x128xf32>
    %cst_221 = arith.constant 0.000000e+00 : f32
    %766 = vector.broadcast %cst_221 : f32 to vector<8x128xf32>
    %767 = arith.cmpf olt, %678, %766 : vector<8x128xf32>
    %cst_222 = arith.constant 2.000000e+00 : f32
    %cst_223 = arith.constant 0.000000e+00 : f32
    %768 = vector.broadcast %cst_222 : f32 to vector<8x128xf32>
    %769 = vector.broadcast %cst_223 : f32 to vector<8x128xf32>
    %770 = arith.select %767, %768, %769 : vector<8x128xi1>, vector<8x128xf32>
    %771 = arith.select %765, %763, %770 : vector<8x128xi1>, vector<8x128xf32>
    %cst_224 = arith.constant 0.000000e+00 : f32
    %772 = vector.broadcast %cst_224 : f32 to vector<8x128xf32>
    %773 = arith.cmpf ogt, %754, %772 : vector<8x128xf32>
    %cst_225 = arith.constant 1.000000e+00 : f32
    %774 = vector.broadcast %cst_225 : f32 to vector<8x128xf32>
    %775 = arith.select %773, %763, %774 : vector<8x128xi1>, vector<8x128xf32>
    %776 = arith.maximumf %28, %771 : vector<8x128xf32>
    %777 = arith.minimumf %29, %775 : vector<8x128xf32>
    %778 = arith.subf %683, %703 : vector<8x128xf32>
    %cst_226 = arith.constant 0.000000e+00 : f32
    %779 = vector.broadcast %cst_226 : f32 to vector<8x128xf32>
    %780 = arith.cmpf oeq, %778, %779 : vector<8x128xf32>
    %cst_227 = arith.constant 1.000000e+00 : f32
    %781 = vector.broadcast %cst_227 : f32 to vector<8x128xf32>
    %782 = arith.select %780, %781, %778 : vector<8x128xi1>, vector<8x128xf32>
    %783 = arith.divf %683, %782 : vector<8x128xf32>
    %cst_228 = arith.constant -1.000000e+00 : f32
    %cst_229 = arith.constant 2.000000e+00 : f32
    %784 = vector.broadcast %cst_228 : f32 to vector<8x128xf32>
    %785 = arith.maximumf %784, %783 : vector<8x128xf32>
    %786 = vector.broadcast %cst_229 : f32 to vector<8x128xf32>
    %787 = arith.minimumf %786, %785 : vector<8x128xf32>
    %cst_230 = arith.constant 0.000000e+00 : f32
    %788 = vector.broadcast %cst_230 : f32 to vector<8x128xf32>
    %789 = arith.cmpf olt, %778, %788 : vector<8x128xf32>
    %cst_231 = arith.constant 0.000000e+00 : f32
    %790 = vector.broadcast %cst_231 : f32 to vector<8x128xf32>
    %791 = arith.cmpf olt, %683, %790 : vector<8x128xf32>
    %cst_232 = arith.constant 2.000000e+00 : f32
    %cst_233 = arith.constant 0.000000e+00 : f32
    %792 = vector.broadcast %cst_232 : f32 to vector<8x128xf32>
    %793 = vector.broadcast %cst_233 : f32 to vector<8x128xf32>
    %794 = arith.select %791, %792, %793 : vector<8x128xi1>, vector<8x128xf32>
    %795 = arith.select %789, %787, %794 : vector<8x128xi1>, vector<8x128xf32>
    %cst_234 = arith.constant 0.000000e+00 : f32
    %796 = vector.broadcast %cst_234 : f32 to vector<8x128xf32>
    %797 = arith.cmpf ogt, %778, %796 : vector<8x128xf32>
    %cst_235 = arith.constant 1.000000e+00 : f32
    %798 = vector.broadcast %cst_235 : f32 to vector<8x128xf32>
    %799 = arith.select %797, %787, %798 : vector<8x128xi1>, vector<8x128xf32>
    %800 = arith.maximumf %776, %795 : vector<8x128xf32>
    %801 = arith.minimumf %777, %799 : vector<8x128xf32>
    %802 = arith.subf %688, %708 : vector<8x128xf32>
    %cst_236 = arith.constant 0.000000e+00 : f32
    %803 = vector.broadcast %cst_236 : f32 to vector<8x128xf32>
    %804 = arith.cmpf oeq, %802, %803 : vector<8x128xf32>
    %cst_237 = arith.constant 1.000000e+00 : f32
    %805 = vector.broadcast %cst_237 : f32 to vector<8x128xf32>
    %806 = arith.select %804, %805, %802 : vector<8x128xi1>, vector<8x128xf32>
    %807 = arith.divf %688, %806 : vector<8x128xf32>
    %cst_238 = arith.constant -1.000000e+00 : f32
    %cst_239 = arith.constant 2.000000e+00 : f32
    %808 = vector.broadcast %cst_238 : f32 to vector<8x128xf32>
    %809 = arith.maximumf %808, %807 : vector<8x128xf32>
    %810 = vector.broadcast %cst_239 : f32 to vector<8x128xf32>
    %811 = arith.minimumf %810, %809 : vector<8x128xf32>
    %cst_240 = arith.constant 0.000000e+00 : f32
    %812 = vector.broadcast %cst_240 : f32 to vector<8x128xf32>
    %813 = arith.cmpf olt, %802, %812 : vector<8x128xf32>
    %cst_241 = arith.constant 0.000000e+00 : f32
    %814 = vector.broadcast %cst_241 : f32 to vector<8x128xf32>
    %815 = arith.cmpf olt, %688, %814 : vector<8x128xf32>
    %cst_242 = arith.constant 2.000000e+00 : f32
    %cst_243 = arith.constant 0.000000e+00 : f32
    %816 = vector.broadcast %cst_242 : f32 to vector<8x128xf32>
    %817 = vector.broadcast %cst_243 : f32 to vector<8x128xf32>
    %818 = arith.select %815, %816, %817 : vector<8x128xi1>, vector<8x128xf32>
    %819 = arith.select %813, %811, %818 : vector<8x128xi1>, vector<8x128xf32>
    %cst_244 = arith.constant 0.000000e+00 : f32
    %820 = vector.broadcast %cst_244 : f32 to vector<8x128xf32>
    %821 = arith.cmpf ogt, %802, %820 : vector<8x128xf32>
    %cst_245 = arith.constant 1.000000e+00 : f32
    %822 = vector.broadcast %cst_245 : f32 to vector<8x128xf32>
    %823 = arith.select %821, %811, %822 : vector<8x128xi1>, vector<8x128xf32>
    %824 = arith.maximumf %800, %819 : vector<8x128xf32>
    %825 = arith.minimumf %801, %823 : vector<8x128xf32>
    %826 = arith.subf %693, %713 : vector<8x128xf32>
    %cst_246 = arith.constant 0.000000e+00 : f32
    %827 = vector.broadcast %cst_246 : f32 to vector<8x128xf32>
    %828 = arith.cmpf oeq, %826, %827 : vector<8x128xf32>
    %cst_247 = arith.constant 1.000000e+00 : f32
    %829 = vector.broadcast %cst_247 : f32 to vector<8x128xf32>
    %830 = arith.select %828, %829, %826 : vector<8x128xi1>, vector<8x128xf32>
    %831 = arith.divf %693, %830 : vector<8x128xf32>
    %cst_248 = arith.constant -1.000000e+00 : f32
    %cst_249 = arith.constant 2.000000e+00 : f32
    %832 = vector.broadcast %cst_248 : f32 to vector<8x128xf32>
    %833 = arith.maximumf %832, %831 : vector<8x128xf32>
    %834 = vector.broadcast %cst_249 : f32 to vector<8x128xf32>
    %835 = arith.minimumf %834, %833 : vector<8x128xf32>
    %cst_250 = arith.constant 0.000000e+00 : f32
    %836 = vector.broadcast %cst_250 : f32 to vector<8x128xf32>
    %837 = arith.cmpf olt, %826, %836 : vector<8x128xf32>
    %cst_251 = arith.constant 0.000000e+00 : f32
    %838 = vector.broadcast %cst_251 : f32 to vector<8x128xf32>
    %839 = arith.cmpf olt, %693, %838 : vector<8x128xf32>
    %cst_252 = arith.constant 2.000000e+00 : f32
    %cst_253 = arith.constant 0.000000e+00 : f32
    %840 = vector.broadcast %cst_252 : f32 to vector<8x128xf32>
    %841 = vector.broadcast %cst_253 : f32 to vector<8x128xf32>
    %842 = arith.select %839, %840, %841 : vector<8x128xi1>, vector<8x128xf32>
    %843 = arith.select %837, %835, %842 : vector<8x128xi1>, vector<8x128xf32>
    %cst_254 = arith.constant 0.000000e+00 : f32
    %844 = vector.broadcast %cst_254 : f32 to vector<8x128xf32>
    %845 = arith.cmpf ogt, %826, %844 : vector<8x128xf32>
    %cst_255 = arith.constant 1.000000e+00 : f32
    %846 = vector.broadcast %cst_255 : f32 to vector<8x128xf32>
    %847 = arith.select %845, %835, %846 : vector<8x128xi1>, vector<8x128xf32>
    %848 = arith.maximumf %824, %843 : vector<8x128xf32>
    %849 = arith.minimumf %825, %847 : vector<8x128xf32>
    %850 = arith.subf %97, %85 : vector<8x128xf32>
    %851 = arith.subf %101, %89 : vector<8x128xf32>
    %852 = arith.mulf %848, %850 : vector<8x128xf32>
    %853 = arith.addf %85, %852 : vector<8x128xf32>
    %854 = arith.mulf %848, %851 : vector<8x128xf32>
    %855 = arith.addf %89, %854 : vector<8x128xf32>
    %856 = arith.mulf %849, %850 : vector<8x128xf32>
    %857 = arith.addf %85, %856 : vector<8x128xf32>
    %858 = arith.mulf %849, %851 : vector<8x128xf32>
    %859 = arith.addf %89, %858 : vector<8x128xf32>
    %860 = arith.mulf %853, %859 : vector<8x128xf32>
    %861 = arith.mulf %855, %857 : vector<8x128xf32>
    %862 = arith.subf %860, %861 : vector<8x128xf32>
    %863 = arith.cmpf olt, %848, %849 : vector<8x128xf32>
    %cst_256 = arith.constant 0.000000e+00 : f32
    %864 = vector.broadcast %cst_256 : f32 to vector<8x128xf32>
    %865 = arith.select %863, %862, %864 : vector<8x128xi1>, vector<8x128xf32>
    %866 = arith.addf %28, %865 : vector<8x128xf32>
    %867 = arith.subf %698, %718 : vector<8x128xf32>
    %cst_257 = arith.constant 0.000000e+00 : f32
    %868 = vector.broadcast %cst_257 : f32 to vector<8x128xf32>
    %869 = arith.cmpf oeq, %867, %868 : vector<8x128xf32>
    %cst_258 = arith.constant 1.000000e+00 : f32
    %870 = vector.broadcast %cst_258 : f32 to vector<8x128xf32>
    %871 = arith.select %869, %870, %867 : vector<8x128xi1>, vector<8x128xf32>
    %872 = arith.divf %698, %871 : vector<8x128xf32>
    %cst_259 = arith.constant -1.000000e+00 : f32
    %cst_260 = arith.constant 2.000000e+00 : f32
    %873 = vector.broadcast %cst_259 : f32 to vector<8x128xf32>
    %874 = arith.maximumf %873, %872 : vector<8x128xf32>
    %875 = vector.broadcast %cst_260 : f32 to vector<8x128xf32>
    %876 = arith.minimumf %875, %874 : vector<8x128xf32>
    %cst_261 = arith.constant 0.000000e+00 : f32
    %877 = vector.broadcast %cst_261 : f32 to vector<8x128xf32>
    %878 = arith.cmpf olt, %867, %877 : vector<8x128xf32>
    %cst_262 = arith.constant 0.000000e+00 : f32
    %879 = vector.broadcast %cst_262 : f32 to vector<8x128xf32>
    %880 = arith.cmpf olt, %698, %879 : vector<8x128xf32>
    %cst_263 = arith.constant 2.000000e+00 : f32
    %cst_264 = arith.constant 0.000000e+00 : f32
    %881 = vector.broadcast %cst_263 : f32 to vector<8x128xf32>
    %882 = vector.broadcast %cst_264 : f32 to vector<8x128xf32>
    %883 = arith.select %880, %881, %882 : vector<8x128xi1>, vector<8x128xf32>
    %884 = arith.select %878, %876, %883 : vector<8x128xi1>, vector<8x128xf32>
    %cst_265 = arith.constant 0.000000e+00 : f32
    %885 = vector.broadcast %cst_265 : f32 to vector<8x128xf32>
    %886 = arith.cmpf ogt, %867, %885 : vector<8x128xf32>
    %cst_266 = arith.constant 1.000000e+00 : f32
    %887 = vector.broadcast %cst_266 : f32 to vector<8x128xf32>
    %888 = arith.select %886, %876, %887 : vector<8x128xi1>, vector<8x128xf32>
    %889 = arith.maximumf %28, %884 : vector<8x128xf32>
    %890 = arith.minimumf %29, %888 : vector<8x128xf32>
    %891 = arith.subf %703, %723 : vector<8x128xf32>
    %cst_267 = arith.constant 0.000000e+00 : f32
    %892 = vector.broadcast %cst_267 : f32 to vector<8x128xf32>
    %893 = arith.cmpf oeq, %891, %892 : vector<8x128xf32>
    %cst_268 = arith.constant 1.000000e+00 : f32
    %894 = vector.broadcast %cst_268 : f32 to vector<8x128xf32>
    %895 = arith.select %893, %894, %891 : vector<8x128xi1>, vector<8x128xf32>
    %896 = arith.divf %703, %895 : vector<8x128xf32>
    %cst_269 = arith.constant -1.000000e+00 : f32
    %cst_270 = arith.constant 2.000000e+00 : f32
    %897 = vector.broadcast %cst_269 : f32 to vector<8x128xf32>
    %898 = arith.maximumf %897, %896 : vector<8x128xf32>
    %899 = vector.broadcast %cst_270 : f32 to vector<8x128xf32>
    %900 = arith.minimumf %899, %898 : vector<8x128xf32>
    %cst_271 = arith.constant 0.000000e+00 : f32
    %901 = vector.broadcast %cst_271 : f32 to vector<8x128xf32>
    %902 = arith.cmpf olt, %891, %901 : vector<8x128xf32>
    %cst_272 = arith.constant 0.000000e+00 : f32
    %903 = vector.broadcast %cst_272 : f32 to vector<8x128xf32>
    %904 = arith.cmpf olt, %703, %903 : vector<8x128xf32>
    %cst_273 = arith.constant 2.000000e+00 : f32
    %cst_274 = arith.constant 0.000000e+00 : f32
    %905 = vector.broadcast %cst_273 : f32 to vector<8x128xf32>
    %906 = vector.broadcast %cst_274 : f32 to vector<8x128xf32>
    %907 = arith.select %904, %905, %906 : vector<8x128xi1>, vector<8x128xf32>
    %908 = arith.select %902, %900, %907 : vector<8x128xi1>, vector<8x128xf32>
    %cst_275 = arith.constant 0.000000e+00 : f32
    %909 = vector.broadcast %cst_275 : f32 to vector<8x128xf32>
    %910 = arith.cmpf ogt, %891, %909 : vector<8x128xf32>
    %cst_276 = arith.constant 1.000000e+00 : f32
    %911 = vector.broadcast %cst_276 : f32 to vector<8x128xf32>
    %912 = arith.select %910, %900, %911 : vector<8x128xi1>, vector<8x128xf32>
    %913 = arith.maximumf %889, %908 : vector<8x128xf32>
    %914 = arith.minimumf %890, %912 : vector<8x128xf32>
    %915 = arith.subf %708, %728 : vector<8x128xf32>
    %cst_277 = arith.constant 0.000000e+00 : f32
    %916 = vector.broadcast %cst_277 : f32 to vector<8x128xf32>
    %917 = arith.cmpf oeq, %915, %916 : vector<8x128xf32>
    %cst_278 = arith.constant 1.000000e+00 : f32
    %918 = vector.broadcast %cst_278 : f32 to vector<8x128xf32>
    %919 = arith.select %917, %918, %915 : vector<8x128xi1>, vector<8x128xf32>
    %920 = arith.divf %708, %919 : vector<8x128xf32>
    %cst_279 = arith.constant -1.000000e+00 : f32
    %cst_280 = arith.constant 2.000000e+00 : f32
    %921 = vector.broadcast %cst_279 : f32 to vector<8x128xf32>
    %922 = arith.maximumf %921, %920 : vector<8x128xf32>
    %923 = vector.broadcast %cst_280 : f32 to vector<8x128xf32>
    %924 = arith.minimumf %923, %922 : vector<8x128xf32>
    %cst_281 = arith.constant 0.000000e+00 : f32
    %925 = vector.broadcast %cst_281 : f32 to vector<8x128xf32>
    %926 = arith.cmpf olt, %915, %925 : vector<8x128xf32>
    %cst_282 = arith.constant 0.000000e+00 : f32
    %927 = vector.broadcast %cst_282 : f32 to vector<8x128xf32>
    %928 = arith.cmpf olt, %708, %927 : vector<8x128xf32>
    %cst_283 = arith.constant 2.000000e+00 : f32
    %cst_284 = arith.constant 0.000000e+00 : f32
    %929 = vector.broadcast %cst_283 : f32 to vector<8x128xf32>
    %930 = vector.broadcast %cst_284 : f32 to vector<8x128xf32>
    %931 = arith.select %928, %929, %930 : vector<8x128xi1>, vector<8x128xf32>
    %932 = arith.select %926, %924, %931 : vector<8x128xi1>, vector<8x128xf32>
    %cst_285 = arith.constant 0.000000e+00 : f32
    %933 = vector.broadcast %cst_285 : f32 to vector<8x128xf32>
    %934 = arith.cmpf ogt, %915, %933 : vector<8x128xf32>
    %cst_286 = arith.constant 1.000000e+00 : f32
    %935 = vector.broadcast %cst_286 : f32 to vector<8x128xf32>
    %936 = arith.select %934, %924, %935 : vector<8x128xi1>, vector<8x128xf32>
    %937 = arith.maximumf %913, %932 : vector<8x128xf32>
    %938 = arith.minimumf %914, %936 : vector<8x128xf32>
    %939 = arith.subf %713, %733 : vector<8x128xf32>
    %cst_287 = arith.constant 0.000000e+00 : f32
    %940 = vector.broadcast %cst_287 : f32 to vector<8x128xf32>
    %941 = arith.cmpf oeq, %939, %940 : vector<8x128xf32>
    %cst_288 = arith.constant 1.000000e+00 : f32
    %942 = vector.broadcast %cst_288 : f32 to vector<8x128xf32>
    %943 = arith.select %941, %942, %939 : vector<8x128xi1>, vector<8x128xf32>
    %944 = arith.divf %713, %943 : vector<8x128xf32>
    %cst_289 = arith.constant -1.000000e+00 : f32
    %cst_290 = arith.constant 2.000000e+00 : f32
    %945 = vector.broadcast %cst_289 : f32 to vector<8x128xf32>
    %946 = arith.maximumf %945, %944 : vector<8x128xf32>
    %947 = vector.broadcast %cst_290 : f32 to vector<8x128xf32>
    %948 = arith.minimumf %947, %946 : vector<8x128xf32>
    %cst_291 = arith.constant 0.000000e+00 : f32
    %949 = vector.broadcast %cst_291 : f32 to vector<8x128xf32>
    %950 = arith.cmpf olt, %939, %949 : vector<8x128xf32>
    %cst_292 = arith.constant 0.000000e+00 : f32
    %951 = vector.broadcast %cst_292 : f32 to vector<8x128xf32>
    %952 = arith.cmpf olt, %713, %951 : vector<8x128xf32>
    %cst_293 = arith.constant 2.000000e+00 : f32
    %cst_294 = arith.constant 0.000000e+00 : f32
    %953 = vector.broadcast %cst_293 : f32 to vector<8x128xf32>
    %954 = vector.broadcast %cst_294 : f32 to vector<8x128xf32>
    %955 = arith.select %952, %953, %954 : vector<8x128xi1>, vector<8x128xf32>
    %956 = arith.select %950, %948, %955 : vector<8x128xi1>, vector<8x128xf32>
    %cst_295 = arith.constant 0.000000e+00 : f32
    %957 = vector.broadcast %cst_295 : f32 to vector<8x128xf32>
    %958 = arith.cmpf ogt, %939, %957 : vector<8x128xf32>
    %cst_296 = arith.constant 1.000000e+00 : f32
    %959 = vector.broadcast %cst_296 : f32 to vector<8x128xf32>
    %960 = arith.select %958, %948, %959 : vector<8x128xi1>, vector<8x128xf32>
    %961 = arith.maximumf %937, %956 : vector<8x128xf32>
    %962 = arith.minimumf %938, %960 : vector<8x128xf32>
    %963 = arith.subf %109, %97 : vector<8x128xf32>
    %964 = arith.subf %113, %101 : vector<8x128xf32>
    %965 = arith.mulf %961, %963 : vector<8x128xf32>
    %966 = arith.addf %97, %965 : vector<8x128xf32>
    %967 = arith.mulf %961, %964 : vector<8x128xf32>
    %968 = arith.addf %101, %967 : vector<8x128xf32>
    %969 = arith.mulf %962, %963 : vector<8x128xf32>
    %970 = arith.addf %97, %969 : vector<8x128xf32>
    %971 = arith.mulf %962, %964 : vector<8x128xf32>
    %972 = arith.addf %101, %971 : vector<8x128xf32>
    %973 = arith.mulf %966, %972 : vector<8x128xf32>
    %974 = arith.mulf %968, %970 : vector<8x128xf32>
    %975 = arith.subf %973, %974 : vector<8x128xf32>
    %976 = arith.cmpf olt, %961, %962 : vector<8x128xf32>
    %cst_297 = arith.constant 0.000000e+00 : f32
    %977 = vector.broadcast %cst_297 : f32 to vector<8x128xf32>
    %978 = arith.select %976, %975, %977 : vector<8x128xi1>, vector<8x128xf32>
    %979 = arith.addf %866, %978 : vector<8x128xf32>
    %980 = arith.subf %718, %738 : vector<8x128xf32>
    %cst_298 = arith.constant 0.000000e+00 : f32
    %981 = vector.broadcast %cst_298 : f32 to vector<8x128xf32>
    %982 = arith.cmpf oeq, %980, %981 : vector<8x128xf32>
    %cst_299 = arith.constant 1.000000e+00 : f32
    %983 = vector.broadcast %cst_299 : f32 to vector<8x128xf32>
    %984 = arith.select %982, %983, %980 : vector<8x128xi1>, vector<8x128xf32>
    %985 = arith.divf %718, %984 : vector<8x128xf32>
    %cst_300 = arith.constant -1.000000e+00 : f32
    %cst_301 = arith.constant 2.000000e+00 : f32
    %986 = vector.broadcast %cst_300 : f32 to vector<8x128xf32>
    %987 = arith.maximumf %986, %985 : vector<8x128xf32>
    %988 = vector.broadcast %cst_301 : f32 to vector<8x128xf32>
    %989 = arith.minimumf %988, %987 : vector<8x128xf32>
    %cst_302 = arith.constant 0.000000e+00 : f32
    %990 = vector.broadcast %cst_302 : f32 to vector<8x128xf32>
    %991 = arith.cmpf olt, %980, %990 : vector<8x128xf32>
    %cst_303 = arith.constant 0.000000e+00 : f32
    %992 = vector.broadcast %cst_303 : f32 to vector<8x128xf32>
    %993 = arith.cmpf olt, %718, %992 : vector<8x128xf32>
    %cst_304 = arith.constant 2.000000e+00 : f32
    %cst_305 = arith.constant 0.000000e+00 : f32
    %994 = vector.broadcast %cst_304 : f32 to vector<8x128xf32>
    %995 = vector.broadcast %cst_305 : f32 to vector<8x128xf32>
    %996 = arith.select %993, %994, %995 : vector<8x128xi1>, vector<8x128xf32>
    %997 = arith.select %991, %989, %996 : vector<8x128xi1>, vector<8x128xf32>
    %cst_306 = arith.constant 0.000000e+00 : f32
    %998 = vector.broadcast %cst_306 : f32 to vector<8x128xf32>
    %999 = arith.cmpf ogt, %980, %998 : vector<8x128xf32>
    %cst_307 = arith.constant 1.000000e+00 : f32
    %1000 = vector.broadcast %cst_307 : f32 to vector<8x128xf32>
    %1001 = arith.select %999, %989, %1000 : vector<8x128xi1>, vector<8x128xf32>
    %1002 = arith.maximumf %28, %997 : vector<8x128xf32>
    %1003 = arith.minimumf %29, %1001 : vector<8x128xf32>
    %1004 = arith.subf %723, %743 : vector<8x128xf32>
    %cst_308 = arith.constant 0.000000e+00 : f32
    %1005 = vector.broadcast %cst_308 : f32 to vector<8x128xf32>
    %1006 = arith.cmpf oeq, %1004, %1005 : vector<8x128xf32>
    %cst_309 = arith.constant 1.000000e+00 : f32
    %1007 = vector.broadcast %cst_309 : f32 to vector<8x128xf32>
    %1008 = arith.select %1006, %1007, %1004 : vector<8x128xi1>, vector<8x128xf32>
    %1009 = arith.divf %723, %1008 : vector<8x128xf32>
    %cst_310 = arith.constant -1.000000e+00 : f32
    %cst_311 = arith.constant 2.000000e+00 : f32
    %1010 = vector.broadcast %cst_310 : f32 to vector<8x128xf32>
    %1011 = arith.maximumf %1010, %1009 : vector<8x128xf32>
    %1012 = vector.broadcast %cst_311 : f32 to vector<8x128xf32>
    %1013 = arith.minimumf %1012, %1011 : vector<8x128xf32>
    %cst_312 = arith.constant 0.000000e+00 : f32
    %1014 = vector.broadcast %cst_312 : f32 to vector<8x128xf32>
    %1015 = arith.cmpf olt, %1004, %1014 : vector<8x128xf32>
    %cst_313 = arith.constant 0.000000e+00 : f32
    %1016 = vector.broadcast %cst_313 : f32 to vector<8x128xf32>
    %1017 = arith.cmpf olt, %723, %1016 : vector<8x128xf32>
    %cst_314 = arith.constant 2.000000e+00 : f32
    %cst_315 = arith.constant 0.000000e+00 : f32
    %1018 = vector.broadcast %cst_314 : f32 to vector<8x128xf32>
    %1019 = vector.broadcast %cst_315 : f32 to vector<8x128xf32>
    %1020 = arith.select %1017, %1018, %1019 : vector<8x128xi1>, vector<8x128xf32>
    %1021 = arith.select %1015, %1013, %1020 : vector<8x128xi1>, vector<8x128xf32>
    %cst_316 = arith.constant 0.000000e+00 : f32
    %1022 = vector.broadcast %cst_316 : f32 to vector<8x128xf32>
    %1023 = arith.cmpf ogt, %1004, %1022 : vector<8x128xf32>
    %cst_317 = arith.constant 1.000000e+00 : f32
    %1024 = vector.broadcast %cst_317 : f32 to vector<8x128xf32>
    %1025 = arith.select %1023, %1013, %1024 : vector<8x128xi1>, vector<8x128xf32>
    %1026 = arith.maximumf %1002, %1021 : vector<8x128xf32>
    %1027 = arith.minimumf %1003, %1025 : vector<8x128xf32>
    %1028 = arith.subf %728, %748 : vector<8x128xf32>
    %cst_318 = arith.constant 0.000000e+00 : f32
    %1029 = vector.broadcast %cst_318 : f32 to vector<8x128xf32>
    %1030 = arith.cmpf oeq, %1028, %1029 : vector<8x128xf32>
    %cst_319 = arith.constant 1.000000e+00 : f32
    %1031 = vector.broadcast %cst_319 : f32 to vector<8x128xf32>
    %1032 = arith.select %1030, %1031, %1028 : vector<8x128xi1>, vector<8x128xf32>
    %1033 = arith.divf %728, %1032 : vector<8x128xf32>
    %cst_320 = arith.constant -1.000000e+00 : f32
    %cst_321 = arith.constant 2.000000e+00 : f32
    %1034 = vector.broadcast %cst_320 : f32 to vector<8x128xf32>
    %1035 = arith.maximumf %1034, %1033 : vector<8x128xf32>
    %1036 = vector.broadcast %cst_321 : f32 to vector<8x128xf32>
    %1037 = arith.minimumf %1036, %1035 : vector<8x128xf32>
    %cst_322 = arith.constant 0.000000e+00 : f32
    %1038 = vector.broadcast %cst_322 : f32 to vector<8x128xf32>
    %1039 = arith.cmpf olt, %1028, %1038 : vector<8x128xf32>
    %cst_323 = arith.constant 0.000000e+00 : f32
    %1040 = vector.broadcast %cst_323 : f32 to vector<8x128xf32>
    %1041 = arith.cmpf olt, %728, %1040 : vector<8x128xf32>
    %cst_324 = arith.constant 2.000000e+00 : f32
    %cst_325 = arith.constant 0.000000e+00 : f32
    %1042 = vector.broadcast %cst_324 : f32 to vector<8x128xf32>
    %1043 = vector.broadcast %cst_325 : f32 to vector<8x128xf32>
    %1044 = arith.select %1041, %1042, %1043 : vector<8x128xi1>, vector<8x128xf32>
    %1045 = arith.select %1039, %1037, %1044 : vector<8x128xi1>, vector<8x128xf32>
    %cst_326 = arith.constant 0.000000e+00 : f32
    %1046 = vector.broadcast %cst_326 : f32 to vector<8x128xf32>
    %1047 = arith.cmpf ogt, %1028, %1046 : vector<8x128xf32>
    %cst_327 = arith.constant 1.000000e+00 : f32
    %1048 = vector.broadcast %cst_327 : f32 to vector<8x128xf32>
    %1049 = arith.select %1047, %1037, %1048 : vector<8x128xi1>, vector<8x128xf32>
    %1050 = arith.maximumf %1026, %1045 : vector<8x128xf32>
    %1051 = arith.minimumf %1027, %1049 : vector<8x128xf32>
    %1052 = arith.subf %733, %753 : vector<8x128xf32>
    %cst_328 = arith.constant 0.000000e+00 : f32
    %1053 = vector.broadcast %cst_328 : f32 to vector<8x128xf32>
    %1054 = arith.cmpf oeq, %1052, %1053 : vector<8x128xf32>
    %cst_329 = arith.constant 1.000000e+00 : f32
    %1055 = vector.broadcast %cst_329 : f32 to vector<8x128xf32>
    %1056 = arith.select %1054, %1055, %1052 : vector<8x128xi1>, vector<8x128xf32>
    %1057 = arith.divf %733, %1056 : vector<8x128xf32>
    %cst_330 = arith.constant -1.000000e+00 : f32
    %cst_331 = arith.constant 2.000000e+00 : f32
    %1058 = vector.broadcast %cst_330 : f32 to vector<8x128xf32>
    %1059 = arith.maximumf %1058, %1057 : vector<8x128xf32>
    %1060 = vector.broadcast %cst_331 : f32 to vector<8x128xf32>
    %1061 = arith.minimumf %1060, %1059 : vector<8x128xf32>
    %cst_332 = arith.constant 0.000000e+00 : f32
    %1062 = vector.broadcast %cst_332 : f32 to vector<8x128xf32>
    %1063 = arith.cmpf olt, %1052, %1062 : vector<8x128xf32>
    %cst_333 = arith.constant 0.000000e+00 : f32
    %1064 = vector.broadcast %cst_333 : f32 to vector<8x128xf32>
    %1065 = arith.cmpf olt, %733, %1064 : vector<8x128xf32>
    %cst_334 = arith.constant 2.000000e+00 : f32
    %cst_335 = arith.constant 0.000000e+00 : f32
    %1066 = vector.broadcast %cst_334 : f32 to vector<8x128xf32>
    %1067 = vector.broadcast %cst_335 : f32 to vector<8x128xf32>
    %1068 = arith.select %1065, %1066, %1067 : vector<8x128xi1>, vector<8x128xf32>
    %1069 = arith.select %1063, %1061, %1068 : vector<8x128xi1>, vector<8x128xf32>
    %cst_336 = arith.constant 0.000000e+00 : f32
    %1070 = vector.broadcast %cst_336 : f32 to vector<8x128xf32>
    %1071 = arith.cmpf ogt, %1052, %1070 : vector<8x128xf32>
    %cst_337 = arith.constant 1.000000e+00 : f32
    %1072 = vector.broadcast %cst_337 : f32 to vector<8x128xf32>
    %1073 = arith.select %1071, %1061, %1072 : vector<8x128xi1>, vector<8x128xf32>
    %1074 = arith.maximumf %1050, %1069 : vector<8x128xf32>
    %1075 = arith.minimumf %1051, %1073 : vector<8x128xf32>
    %1076 = arith.subf %121, %109 : vector<8x128xf32>
    %1077 = arith.subf %125, %113 : vector<8x128xf32>
    %1078 = arith.mulf %1074, %1076 : vector<8x128xf32>
    %1079 = arith.addf %109, %1078 : vector<8x128xf32>
    %1080 = arith.mulf %1074, %1077 : vector<8x128xf32>
    %1081 = arith.addf %113, %1080 : vector<8x128xf32>
    %1082 = arith.mulf %1075, %1076 : vector<8x128xf32>
    %1083 = arith.addf %109, %1082 : vector<8x128xf32>
    %1084 = arith.mulf %1075, %1077 : vector<8x128xf32>
    %1085 = arith.addf %113, %1084 : vector<8x128xf32>
    %1086 = arith.mulf %1079, %1085 : vector<8x128xf32>
    %1087 = arith.mulf %1081, %1083 : vector<8x128xf32>
    %1088 = arith.subf %1086, %1087 : vector<8x128xf32>
    %1089 = arith.cmpf olt, %1074, %1075 : vector<8x128xf32>
    %cst_338 = arith.constant 0.000000e+00 : f32
    %1090 = vector.broadcast %cst_338 : f32 to vector<8x128xf32>
    %1091 = arith.select %1089, %1088, %1090 : vector<8x128xi1>, vector<8x128xf32>
    %1092 = arith.addf %979, %1091 : vector<8x128xf32>
    %1093 = arith.subf %738, %678 : vector<8x128xf32>
    %cst_339 = arith.constant 0.000000e+00 : f32
    %1094 = vector.broadcast %cst_339 : f32 to vector<8x128xf32>
    %1095 = arith.cmpf oeq, %1093, %1094 : vector<8x128xf32>
    %cst_340 = arith.constant 1.000000e+00 : f32
    %1096 = vector.broadcast %cst_340 : f32 to vector<8x128xf32>
    %1097 = arith.select %1095, %1096, %1093 : vector<8x128xi1>, vector<8x128xf32>
    %1098 = arith.divf %738, %1097 : vector<8x128xf32>
    %cst_341 = arith.constant -1.000000e+00 : f32
    %cst_342 = arith.constant 2.000000e+00 : f32
    %1099 = vector.broadcast %cst_341 : f32 to vector<8x128xf32>
    %1100 = arith.maximumf %1099, %1098 : vector<8x128xf32>
    %1101 = vector.broadcast %cst_342 : f32 to vector<8x128xf32>
    %1102 = arith.minimumf %1101, %1100 : vector<8x128xf32>
    %cst_343 = arith.constant 0.000000e+00 : f32
    %1103 = vector.broadcast %cst_343 : f32 to vector<8x128xf32>
    %1104 = arith.cmpf olt, %1093, %1103 : vector<8x128xf32>
    %cst_344 = arith.constant 0.000000e+00 : f32
    %1105 = vector.broadcast %cst_344 : f32 to vector<8x128xf32>
    %1106 = arith.cmpf olt, %738, %1105 : vector<8x128xf32>
    %cst_345 = arith.constant 2.000000e+00 : f32
    %cst_346 = arith.constant 0.000000e+00 : f32
    %1107 = vector.broadcast %cst_345 : f32 to vector<8x128xf32>
    %1108 = vector.broadcast %cst_346 : f32 to vector<8x128xf32>
    %1109 = arith.select %1106, %1107, %1108 : vector<8x128xi1>, vector<8x128xf32>
    %1110 = arith.select %1104, %1102, %1109 : vector<8x128xi1>, vector<8x128xf32>
    %cst_347 = arith.constant 0.000000e+00 : f32
    %1111 = vector.broadcast %cst_347 : f32 to vector<8x128xf32>
    %1112 = arith.cmpf ogt, %1093, %1111 : vector<8x128xf32>
    %cst_348 = arith.constant 1.000000e+00 : f32
    %1113 = vector.broadcast %cst_348 : f32 to vector<8x128xf32>
    %1114 = arith.select %1112, %1102, %1113 : vector<8x128xi1>, vector<8x128xf32>
    %1115 = arith.maximumf %28, %1110 : vector<8x128xf32>
    %1116 = arith.minimumf %29, %1114 : vector<8x128xf32>
    %1117 = arith.subf %743, %683 : vector<8x128xf32>
    %cst_349 = arith.constant 0.000000e+00 : f32
    %1118 = vector.broadcast %cst_349 : f32 to vector<8x128xf32>
    %1119 = arith.cmpf oeq, %1117, %1118 : vector<8x128xf32>
    %cst_350 = arith.constant 1.000000e+00 : f32
    %1120 = vector.broadcast %cst_350 : f32 to vector<8x128xf32>
    %1121 = arith.select %1119, %1120, %1117 : vector<8x128xi1>, vector<8x128xf32>
    %1122 = arith.divf %743, %1121 : vector<8x128xf32>
    %cst_351 = arith.constant -1.000000e+00 : f32
    %cst_352 = arith.constant 2.000000e+00 : f32
    %1123 = vector.broadcast %cst_351 : f32 to vector<8x128xf32>
    %1124 = arith.maximumf %1123, %1122 : vector<8x128xf32>
    %1125 = vector.broadcast %cst_352 : f32 to vector<8x128xf32>
    %1126 = arith.minimumf %1125, %1124 : vector<8x128xf32>
    %cst_353 = arith.constant 0.000000e+00 : f32
    %1127 = vector.broadcast %cst_353 : f32 to vector<8x128xf32>
    %1128 = arith.cmpf olt, %1117, %1127 : vector<8x128xf32>
    %cst_354 = arith.constant 0.000000e+00 : f32
    %1129 = vector.broadcast %cst_354 : f32 to vector<8x128xf32>
    %1130 = arith.cmpf olt, %743, %1129 : vector<8x128xf32>
    %cst_355 = arith.constant 2.000000e+00 : f32
    %cst_356 = arith.constant 0.000000e+00 : f32
    %1131 = vector.broadcast %cst_355 : f32 to vector<8x128xf32>
    %1132 = vector.broadcast %cst_356 : f32 to vector<8x128xf32>
    %1133 = arith.select %1130, %1131, %1132 : vector<8x128xi1>, vector<8x128xf32>
    %1134 = arith.select %1128, %1126, %1133 : vector<8x128xi1>, vector<8x128xf32>
    %cst_357 = arith.constant 0.000000e+00 : f32
    %1135 = vector.broadcast %cst_357 : f32 to vector<8x128xf32>
    %1136 = arith.cmpf ogt, %1117, %1135 : vector<8x128xf32>
    %cst_358 = arith.constant 1.000000e+00 : f32
    %1137 = vector.broadcast %cst_358 : f32 to vector<8x128xf32>
    %1138 = arith.select %1136, %1126, %1137 : vector<8x128xi1>, vector<8x128xf32>
    %1139 = arith.maximumf %1115, %1134 : vector<8x128xf32>
    %1140 = arith.minimumf %1116, %1138 : vector<8x128xf32>
    %1141 = arith.subf %748, %688 : vector<8x128xf32>
    %cst_359 = arith.constant 0.000000e+00 : f32
    %1142 = vector.broadcast %cst_359 : f32 to vector<8x128xf32>
    %1143 = arith.cmpf oeq, %1141, %1142 : vector<8x128xf32>
    %cst_360 = arith.constant 1.000000e+00 : f32
    %1144 = vector.broadcast %cst_360 : f32 to vector<8x128xf32>
    %1145 = arith.select %1143, %1144, %1141 : vector<8x128xi1>, vector<8x128xf32>
    %1146 = arith.divf %748, %1145 : vector<8x128xf32>
    %cst_361 = arith.constant -1.000000e+00 : f32
    %cst_362 = arith.constant 2.000000e+00 : f32
    %1147 = vector.broadcast %cst_361 : f32 to vector<8x128xf32>
    %1148 = arith.maximumf %1147, %1146 : vector<8x128xf32>
    %1149 = vector.broadcast %cst_362 : f32 to vector<8x128xf32>
    %1150 = arith.minimumf %1149, %1148 : vector<8x128xf32>
    %cst_363 = arith.constant 0.000000e+00 : f32
    %1151 = vector.broadcast %cst_363 : f32 to vector<8x128xf32>
    %1152 = arith.cmpf olt, %1141, %1151 : vector<8x128xf32>
    %cst_364 = arith.constant 0.000000e+00 : f32
    %1153 = vector.broadcast %cst_364 : f32 to vector<8x128xf32>
    %1154 = arith.cmpf olt, %748, %1153 : vector<8x128xf32>
    %cst_365 = arith.constant 2.000000e+00 : f32
    %cst_366 = arith.constant 0.000000e+00 : f32
    %1155 = vector.broadcast %cst_365 : f32 to vector<8x128xf32>
    %1156 = vector.broadcast %cst_366 : f32 to vector<8x128xf32>
    %1157 = arith.select %1154, %1155, %1156 : vector<8x128xi1>, vector<8x128xf32>
    %1158 = arith.select %1152, %1150, %1157 : vector<8x128xi1>, vector<8x128xf32>
    %cst_367 = arith.constant 0.000000e+00 : f32
    %1159 = vector.broadcast %cst_367 : f32 to vector<8x128xf32>
    %1160 = arith.cmpf ogt, %1141, %1159 : vector<8x128xf32>
    %cst_368 = arith.constant 1.000000e+00 : f32
    %1161 = vector.broadcast %cst_368 : f32 to vector<8x128xf32>
    %1162 = arith.select %1160, %1150, %1161 : vector<8x128xi1>, vector<8x128xf32>
    %1163 = arith.maximumf %1139, %1158 : vector<8x128xf32>
    %1164 = arith.minimumf %1140, %1162 : vector<8x128xf32>
    %1165 = arith.subf %753, %693 : vector<8x128xf32>
    %cst_369 = arith.constant 0.000000e+00 : f32
    %1166 = vector.broadcast %cst_369 : f32 to vector<8x128xf32>
    %1167 = arith.cmpf oeq, %1165, %1166 : vector<8x128xf32>
    %cst_370 = arith.constant 1.000000e+00 : f32
    %1168 = vector.broadcast %cst_370 : f32 to vector<8x128xf32>
    %1169 = arith.select %1167, %1168, %1165 : vector<8x128xi1>, vector<8x128xf32>
    %1170 = arith.divf %753, %1169 : vector<8x128xf32>
    %cst_371 = arith.constant -1.000000e+00 : f32
    %cst_372 = arith.constant 2.000000e+00 : f32
    %1171 = vector.broadcast %cst_371 : f32 to vector<8x128xf32>
    %1172 = arith.maximumf %1171, %1170 : vector<8x128xf32>
    %1173 = vector.broadcast %cst_372 : f32 to vector<8x128xf32>
    %1174 = arith.minimumf %1173, %1172 : vector<8x128xf32>
    %cst_373 = arith.constant 0.000000e+00 : f32
    %1175 = vector.broadcast %cst_373 : f32 to vector<8x128xf32>
    %1176 = arith.cmpf olt, %1165, %1175 : vector<8x128xf32>
    %cst_374 = arith.constant 0.000000e+00 : f32
    %1177 = vector.broadcast %cst_374 : f32 to vector<8x128xf32>
    %1178 = arith.cmpf olt, %753, %1177 : vector<8x128xf32>
    %cst_375 = arith.constant 2.000000e+00 : f32
    %cst_376 = arith.constant 0.000000e+00 : f32
    %1179 = vector.broadcast %cst_375 : f32 to vector<8x128xf32>
    %1180 = vector.broadcast %cst_376 : f32 to vector<8x128xf32>
    %1181 = arith.select %1178, %1179, %1180 : vector<8x128xi1>, vector<8x128xf32>
    %1182 = arith.select %1176, %1174, %1181 : vector<8x128xi1>, vector<8x128xf32>
    %cst_377 = arith.constant 0.000000e+00 : f32
    %1183 = vector.broadcast %cst_377 : f32 to vector<8x128xf32>
    %1184 = arith.cmpf ogt, %1165, %1183 : vector<8x128xf32>
    %cst_378 = arith.constant 1.000000e+00 : f32
    %1185 = vector.broadcast %cst_378 : f32 to vector<8x128xf32>
    %1186 = arith.select %1184, %1174, %1185 : vector<8x128xi1>, vector<8x128xf32>
    %1187 = arith.maximumf %1163, %1182 : vector<8x128xf32>
    %1188 = arith.minimumf %1164, %1186 : vector<8x128xf32>
    %1189 = arith.subf %85, %121 : vector<8x128xf32>
    %1190 = arith.subf %89, %125 : vector<8x128xf32>
    %1191 = arith.mulf %1187, %1189 : vector<8x128xf32>
    %1192 = arith.addf %121, %1191 : vector<8x128xf32>
    %1193 = arith.mulf %1187, %1190 : vector<8x128xf32>
    %1194 = arith.addf %125, %1193 : vector<8x128xf32>
    %1195 = arith.mulf %1188, %1189 : vector<8x128xf32>
    %1196 = arith.addf %121, %1195 : vector<8x128xf32>
    %1197 = arith.mulf %1188, %1190 : vector<8x128xf32>
    %1198 = arith.addf %125, %1197 : vector<8x128xf32>
    %1199 = arith.mulf %1192, %1198 : vector<8x128xf32>
    %1200 = arith.mulf %1194, %1196 : vector<8x128xf32>
    %1201 = arith.subf %1199, %1200 : vector<8x128xf32>
    %1202 = arith.cmpf olt, %1187, %1188 : vector<8x128xf32>
    %cst_379 = arith.constant 0.000000e+00 : f32
    %1203 = vector.broadcast %cst_379 : f32 to vector<8x128xf32>
    %1204 = arith.select %1202, %1201, %1203 : vector<8x128xi1>, vector<8x128xf32>
    %1205 = arith.addf %1092, %1204 : vector<8x128xf32>
    %1206 = arith.addf %665, %1205 : vector<8x128xf32>
    %1207 = math.absf %1206 : vector<8x128xf32>
    %cst_380 = arith.constant 5.000000e-01 : f32
    %1208 = vector.broadcast %cst_380 : f32 to vector<8x128xf32>
    %1209 = arith.mulf %1208, %1207 : vector<8x128xf32>
    %1210 = arith.mulf %5, %7 : vector<8x128xf32>
    %1211 = arith.mulf %19, %21 : vector<8x128xf32>
    %1212 = arith.addf %1210, %1211 : vector<8x128xf32>
    %1213 = arith.subf %1212, %1209 : vector<8x128xf32>
    %cst_381 = arith.constant 9.99999996E-13 : f32
    %1214 = vector.broadcast %cst_381 : f32 to vector<8x128xf32>
    %1215 = arith.maximumf %1213, %1214 : vector<8x128xf32>
    %1216 = arith.divf %1209, %1215 : vector<8x128xf32>
    %cst_382 = arith.constant 9.99999997E-7 : f32
    %cst_383 = arith.constant 1.000000e+00 : f32
    %1217 = vector.broadcast %cst_382 : f32 to vector<8x128xf32>
    %1218 = arith.maximumf %1217, %1216 : vector<8x128xf32>
    %1219 = vector.broadcast %cst_383 : f32 to vector<8x128xf32>
    %1220 = arith.minimumf %1219, %1218 : vector<8x128xf32>
    %1221 = arith.subf %9, %23 : vector<8x128xf32>
    %cst_384 = arith.constant 0.318309903 : f32
    %1222 = vector.broadcast %cst_384 : f32 to vector<8x128xf32>
    %1223 = arith.mulf %1221, %1222 : vector<8x128xf32>
    %cst_385 = arith.constant 5.000000e-01 : f32
    %1224 = vector.broadcast %cst_385 : f32 to vector<8x128xf32>
    %1225 = arith.mulf %1224, %5 : vector<8x128xf32>
    %1226 = arith.mulf %1225, %11 : vector<8x128xf32>
    %1227 = math.absf %1226 : vector<8x128xf32>
    %cst_386 = arith.constant 5.000000e-01 : f32
    %1228 = vector.broadcast %cst_386 : f32 to vector<8x128xf32>
    %1229 = arith.mulf %1228, %7 : vector<8x128xf32>
    %1230 = arith.mulf %1229, %13 : vector<8x128xf32>
    %1231 = math.absf %1230 : vector<8x128xf32>
    %1232 = arith.addf %1227, %1231 : vector<8x128xf32>
    %cst_387 = arith.constant 5.000000e-01 : f32
    %1233 = vector.broadcast %cst_387 : f32 to vector<8x128xf32>
    %1234 = arith.mulf %1233, %5 : vector<8x128xf32>
    %1235 = arith.mulf %1234, %13 : vector<8x128xf32>
    %1236 = math.absf %1235 : vector<8x128xf32>
    %cst_388 = arith.constant 5.000000e-01 : f32
    %1237 = vector.broadcast %cst_388 : f32 to vector<8x128xf32>
    %1238 = arith.mulf %1237, %7 : vector<8x128xf32>
    %1239 = arith.mulf %1238, %11 : vector<8x128xf32>
    %1240 = math.absf %1239 : vector<8x128xf32>
    %1241 = arith.addf %1236, %1240 : vector<8x128xf32>
    %cst_389 = arith.constant 5.000000e-01 : f32
    %1242 = vector.broadcast %cst_389 : f32 to vector<8x128xf32>
    %1243 = arith.mulf %1242, %19 : vector<8x128xf32>
    %1244 = arith.mulf %1243, %25 : vector<8x128xf32>
    %1245 = math.absf %1244 : vector<8x128xf32>
    %cst_390 = arith.constant 5.000000e-01 : f32
    %1246 = vector.broadcast %cst_390 : f32 to vector<8x128xf32>
    %1247 = arith.mulf %1246, %21 : vector<8x128xf32>
    %1248 = arith.mulf %1247, %27 : vector<8x128xf32>
    %1249 = math.absf %1248 : vector<8x128xf32>
    %1250 = arith.addf %1245, %1249 : vector<8x128xf32>
    %cst_391 = arith.constant 5.000000e-01 : f32
    %1251 = vector.broadcast %cst_391 : f32 to vector<8x128xf32>
    %1252 = arith.mulf %1251, %19 : vector<8x128xf32>
    %1253 = arith.mulf %1252, %27 : vector<8x128xf32>
    %1254 = math.absf %1253 : vector<8x128xf32>
    %cst_392 = arith.constant 5.000000e-01 : f32
    %1255 = vector.broadcast %cst_392 : f32 to vector<8x128xf32>
    %1256 = arith.mulf %1255, %21 : vector<8x128xf32>
    %1257 = arith.mulf %1256, %25 : vector<8x128xf32>
    %1258 = math.absf %1257 : vector<8x128xf32>
    %1259 = arith.addf %1254, %1258 : vector<8x128xf32>
    %1260 = arith.subf %1, %1232 : vector<8x128xf32>
    %1261 = arith.subf %3, %1241 : vector<8x128xf32>
    %1262 = arith.addf %1, %1232 : vector<8x128xf32>
    %1263 = arith.addf %3, %1241 : vector<8x128xf32>
    %1264 = arith.subf %15, %1250 : vector<8x128xf32>
    %1265 = arith.subf %17, %1259 : vector<8x128xf32>
    %1266 = arith.addf %15, %1250 : vector<8x128xf32>
    %1267 = arith.addf %17, %1259 : vector<8x128xf32>
    %1268 = arith.addf %1264, %1266 : vector<8x128xf32>
    %1269 = arith.addf %1260, %1262 : vector<8x128xf32>
    %1270 = arith.subf %1268, %1269 : vector<8x128xf32>
    %1271 = arith.mulf %1270, %1270 : vector<8x128xf32>
    %cst_393 = arith.constant 2.500000e-01 : f32
    %1272 = vector.broadcast %cst_393 : f32 to vector<8x128xf32>
    %1273 = arith.mulf %1271, %1272 : vector<8x128xf32>
    %1274 = arith.addf %1265, %1267 : vector<8x128xf32>
    %1275 = arith.addf %1261, %1263 : vector<8x128xf32>
    %1276 = arith.subf %1274, %1275 : vector<8x128xf32>
    %1277 = arith.mulf %1276, %1276 : vector<8x128xf32>
    %cst_394 = arith.constant 2.500000e-01 : f32
    %1278 = vector.broadcast %cst_394 : f32 to vector<8x128xf32>
    %1279 = arith.mulf %1277, %1278 : vector<8x128xf32>
    %1280 = arith.maximumf %1262, %1266 : vector<8x128xf32>
    %1281 = arith.minimumf %1260, %1264 : vector<8x128xf32>
    %1282 = arith.subf %1280, %1281 : vector<8x128xf32>
    %cst_395 = arith.constant 0.000000e+00 : f32
    %1283 = vector.broadcast %cst_395 : f32 to vector<8x128xf32>
    %1284 = arith.maximumf %1282, %1283 : vector<8x128xf32>
    %1285 = arith.maximumf %1263, %1267 : vector<8x128xf32>
    %1286 = arith.minimumf %1261, %1265 : vector<8x128xf32>
    %1287 = arith.subf %1285, %1286 : vector<8x128xf32>
    %cst_396 = arith.constant 0.000000e+00 : f32
    %1288 = vector.broadcast %cst_396 : f32 to vector<8x128xf32>
    %1289 = arith.maximumf %1287, %1288 : vector<8x128xf32>
    %1290 = arith.mulf %1284, %1284 : vector<8x128xf32>
    %1291 = arith.mulf %1289, %1289 : vector<8x128xf32>
    %1292 = arith.addf %1290, %1291 : vector<8x128xf32>
    %cst_397 = arith.constant 9.99999997E-7 : f32
    %1293 = vector.broadcast %cst_397 : f32 to vector<8x128xf32>
    %1294 = arith.addf %1292, %1293 : vector<8x128xf32>
    %1295 = arith.addf %1273, %1279 : vector<8x128xf32>
    %1296 = arith.divf %1295, %1294 : vector<8x128xf32>
    %1297 = math.absf %1223 : vector<8x128xf32>
    %cst_398 = arith.constant 1.000000e+00 : f32
    %1298 = vector.broadcast %cst_398 : f32 to vector<8x128xf32>
    %1299 = arith.subf %1297, %1298 : vector<8x128xf32>
    %1300 = math.exp %1299 : vector<8x128xf32>
    %1301 = arith.mulf %1296, %1300 : vector<8x128xf32>
    %cst_399 = arith.constant 1.000000e+00 : f32
    %1302 = vector.broadcast %cst_399 : f32 to vector<8x128xf32>
    %1303 = arith.subf %1302, %1220 : vector<8x128xf32>
    %1304 = arith.addf %1303, %1301 : vector<8x128xf32>
    %c0_400 = arith.constant 0 : index
    %c0_401 = arith.constant 0 : index
    %1305 = vector.load %arg3[%c0_400, %c0_401] : memref<8x128xf32, #tpu.memory_space<vmem>>, vector<8x128xf32>
    tpu.vector_store %arg3[%c0_400, %c0_401], %1304 {strides = array<i32>} : memref<8x128xf32, #tpu.memory_space<vmem>>, vector<8x128xf32>,
    return
  }
  func.func @transform_0(%arg0: i32) -> (i32, i32, i32) {
    %c0_i32 = arith.constant 0 : i32
    %c0_i32_0 = arith.constant 0 : i32
    %c0_i32_1 = arith.constant 0 : i32
    return %c0_i32, %arg0, %c0_i32_0 : i32, i32, i32
  }
  func.func @transform_1(%arg0: i32) -> (i32, i32, i32) {
    %c0_i32 = arith.constant 0 : i32
    %c0_i32_0 = arith.constant 0 : i32
    %c0_i32_1 = arith.constant 0 : i32
    return %c0_i32, %arg0, %c0_i32_0 : i32, i32, i32
  }
  func.func @transform_2(%arg0: i32) -> (i32, i32) {
    %c0_i32 = arith.constant 0 : i32
    %c0_i32_0 = arith.constant 0 : i32
    return %arg0, %c0_i32 : i32, i32
  }
}

</mosaic_0001>

<bundles_post_ra>
// kernel: tpu_custom_call.1
= control target key start
LH: loop header
LB: loop body
LE: loop exit
PB: predicated region body
PF: predicated region fallthrough
CT: control target
= control target key end

     0   :  { %7 = vsyncpa [#allocation3], 0  ;;  %s2287_s0 = inlined_call_operand.hbm [shape: f32[7,8,128], index: 0, kind: input, shape index: {}]   ;;  %s2288_s1 = inlined_call_operand.hbm [shape: f32[7,8,128], index: 1, kind: input, shape index: {}]   ;;  %s2289_s2 = inlined_call_operand.hbm [shape: f32[8,128], index: 2, kind: output, shape index: {}]  }
   0x1   :  { %8 = vsyncpa [#allocation6], 0 }
   0x2   :  { %9 = vsyncpa [#allocation4], 0  ;;  %s1122_s9 = smov [#allocation2]   ;;  %s1050_s13 = scalar_lea.hbm %s2287_s0, 896 }
   0x3   :  { %s15_s10 = sshll.u32 %s1122_s9, 4  ;;  %p1051_p0 = scmp.ne.s32.totalorder %s2287_s0, %s1050_s13  ;;  %s16_s10 = int_to_ptr.vmem [resolvable:$true] %s15_s10 }
   0x4   :  { %p1054_p1 = scmp.lt.u32.totalorder %s1050_s13, %s2287_s0 }
   0x6   :  { %p1056_p2 = pnand %p1054_p1, %p1051_p0 }
   0x8   :  { %1059 = shalt.err (!%p1056_p2)
}
   0x9   :  { %s1060_s18 = scalar_lea.vmem %s16_s10, 896  ;;  %p1065_p4 = scmp.lt.s32.totalorder %s16_s10, %s16_s10 }
   0xa   :  { %p1061_p3 = scmp.ne.s32.totalorder %s16_s10, %s1060_s18  ;;  %p1066_p5 = scmp.lt.s32.totalorder %s1060_s18, %s1060_s18 }
   0xc   :  { %p1067_p6 = por %p1066_p5, %p1065_p4 }
   0xe   :  { %p1068_p7 = pnand %p1067_p6, %p1061_p3 }
  0x10   :  { %1071 = shalt.err (!%p1068_p7)
}
  0x11   :  { %s1123_s19 = smov 128   ;;  %s1124_s20 = smov 8  }
  0x12   :  { %21 = dma.hbm_to_vmem [thread:$0]  %s2287_s0, 896, %s16_s10, [#allocation3], %s1123_s19, %s1123_s19, %s1124_s20  }
  0x13   :  { %s1125_s23 = smov [#allocation5]   ;;  %s1072_s27 = scalar_lea.hbm %s2288_s1, 896 }
  0x14   :  { %s27_s24 = sshll.u32 %s1125_s23, 4  ;;  %p1073_p8 = scmp.ne.s32.totalorder %s2288_s1, %s1072_s27  ;;  %s28_s24 = int_to_ptr.vmem [resolvable:$true] %s27_s24 }
  0x15   :  { %p1076_p9 = scmp.lt.u32.totalorder %s1072_s27, %s2288_s1 }
  0x17   :  { %p1078_p10 = pnand %p1076_p9, %p1073_p8 }
  0x19   :  { %1081 = shalt.err (!%p1078_p10)
}
  0x1a   :  { %s1082_s4 = scalar_lea.vmem %s28_s24, 896  ;;  %p1087_p12 = scmp.lt.s32.totalorder %s28_s24, %s28_s24 }
  0x1b   :  { %p1083_p11 = scmp.ne.s32.totalorder %s28_s24, %s1082_s4  ;;  %p1088_p13 = scmp.lt.s32.totalorder %s1082_s4, %s1082_s4 }
  0x1d   :  { %p1089_p0 = por %p1088_p13, %p1087_p12 }
  0x1f   :  { %p1090_p1 = pnand %p1089_p0, %p1083_p11 }
  0x21   :  { %1093 = shalt.err (!%p1090_p1)
}
  0x22   :  { %33 = dma.hbm_to_vmem [thread:$0]  %s2288_s1, 896, %s28_s24, [#allocation6], %s1123_s19, %s1123_s19, %s1124_s20  }
  0x23   :  { %1116 = dma.done.wait [#allocation3], 896  }
  0x24   :  { %1117 = vsyncadd [#allocation3], 4294966400 }
  0x25   :  { %1118 = dma.done.wait [#allocation6], 896  }
  0x26   :  { %1119 = vsyncadd [#allocation6], 4294966400  ;;  %v44_v0 = vld [vmem:[#allocation2 + $0x10] sm:$0xff]  ;;  %v46_v1 = vld [vmem:[#allocation2 + $0x18] sm:$0xff]  ;;  %s1127_s1 = smov [#allocation7]  }
  0x27   :  { %v66_v2 = vmul.f32 0.5, %v44_v0  ;;  %v50_v3 = vld [vmem:[#allocation2 + $0x28] sm:$0xff]  ;;  %v52_v5 = vld [vmem:[#allocation2 + $0x30] sm:$0xff]  ;;  %v76_v7 = vmul.f32 -0.5, %v44_v0  ;;  %v67_v8 = vmul.f32 0.5, %v46_v1  ;;  %v63_v9 = vld [vmem:[#allocation5 + $0x28] sm:$0xff] }
  0x28   :  { %v57_v4 = vld [vmem:[#allocation5 + $0x10] sm:$0xff]  ;;  %v59_v6 = vld [vmem:[#allocation5 + $0x18] sm:$0xff]  ;;  %v40_v14 = vld [vmem:[#allocation2] sm:$0xff]  ;;  %v83_v39 = vmul.f32 -0.5, %v46_v1  ;;  %s955_s6 = sshll.u32 %s1127_s1, 4  ;;  %s956_s6 = int_to_ptr.vmem [resolvable:$true] %s955_s6 }
  0x29   :  { %v65_v10 = vld [vmem:[#allocation5 + $0x30] sm:$0xff]  ;;  %v1167_v11 = vmul.f32 %v66_v2, %v50_v3  ;;  %v90_v12 = vmul.f32 0.5, %v57_v4  ;;  %v100_v13 = vmul.f32 -0.5, %v57_v4  ;;  %v1169_v15 = vmul.f32 %v66_v2, %v52_v5  ;;  %v53_v19 = vld [vmem:[#allocation5] sm:$0xff]  ;;  %v55_v20 = vld [vmem:[#allocation5 + $0x8] sm:$0xff]  ;;  %s1094_s7 = scalar_lea.vmem %s956_s6, 128  ;;  %p1099_p3 = scmp.lt.s32.totalorder %s956_s6, %s956_s6 }
  0x2a   :  { %v91_v16 = vmul.f32 0.5, %v59_v6  ;;  %v42_v17 = vld [vmem:[#allocation2 + $0x8] sm:$0xff]  ;;  %v77_v18 = vmul.f32 %v76_v7, %v50_v3  ;;  %v1171_v21 = vmul.f32 %v67_v8, %v52_v5  ;;  %v80_v22 = vmul.f32 %v76_v7, %v52_v5  ;;  %p1095_p2 = scmp.ne.s32.totalorder %s956_s6, %s1094_s7  ;;  %p1100_p4 = scmp.lt.s32.totalorder %s1094_s7, %s1094_s7 }
  0x2b   :  { %2326 = vst [vmem:[#allocation11_spill] sm:$0xff] %v1167_v11  ;;  %2327 = vst [vmem:[#allocation12_spill] sm:$0xff] %v1169_v15  ;;  %v1173_v23 = vmul.f32 %v90_v12, %v63_v9  ;;  %v1175_v24 = vmul.f32 %v90_v12, %v65_v10  ;;  %v1178_v25 = vadd.f32 %v1167_v11, %v40_v14  ;;  %v107_v32 = vmul.f32 -0.5, %v59_v6 }
  0x2c   :  { %2328 = vst [vmem:[#allocation13_spill] sm:$0xff] %v1171_v21  ;;  %v1180_v26 = vmul.f32 %v67_v8, %v50_v3  ;;  %v101_v27 = vmul.f32 %v100_v13, %v63_v9  ;;  %v104_v28 = vmul.f32 %v100_v13, %v65_v10  ;;  %v73_v29 = vadd.f32 %v1169_v15, %v42_v17  ;;  %p1101_p5 = por %p1100_p4, %p1099_p3 }
  0x2d   :  { %2329 = vst [vmem:[#allocation14_spill] sm:$0xff] %v1173_v23  ;;  %2330 = vst [vmem:[#allocation15_spill] sm:$0xff] %v1175_v24  ;;  %v1183_v30 = vmul.f32 %v91_v16, %v65_v10  ;;  %v1185_v31 = vmul.f32 %v91_v16, %v63_v9  ;;  %v93_v33 = vadd.f32 %v1173_v23, %v53_v19 }
  0x2e   :  { %2331 = vst [vmem:[#allocation16_spill] sm:$0xff] %v1180_v26  ;;  %v97_v34 = vadd.f32 %v1175_v24, %v55_v20  ;;  %v102_v35 = vadd.f32 %v101_v27, %v53_v19  ;;  %v105_v36 = vadd.f32 %v104_v28, %v55_v20  ;;  %v78_v37 = vadd.f32 %v77_v18, %v40_v14  ;;  %p1102_p6 = pnand %p1101_p5, %p1095_p2 }
  0x2f   :  { %2332 = vst [vmem:[#allocation17_spill] sm:$0xff] %v1183_v30  ;;  %2333 = vst [vmem:[#allocation18_spill] sm:$0xff] %v1185_v31  ;;  %v81_v38 = vadd.f32 %v80_v22, %v42_v17  ;;  %v1191_v40 = vsub.f32 %v1178_v25, %v1171_v21  ;;  %v1194_v41 = vadd.f32 %v1180_v26, %v73_v29 }
  0x30   :  { %v108_v42 = vmul.f32 %v107_v32, %v65_v10  ;;  %v110_v43 = vmul.f32 %v107_v32, %v63_v9  ;;  %v1197_v44 = vsub.f32 %v93_v33, %v1183_v30  ;;  %v1200_v45 = vadd.f32 %v1185_v31, %v97_v34 }
  0x31   :  { %v1203_v46 = vsub.f32 %v102_v35, %v1183_v30  ;;  %v1206_v47 = vadd.f32 %v105_v36, %v1185_v31  ;;  %v1209_v48 = vsub.f32 %v78_v37, %v1171_v21  ;;  %v1212_v49 = vadd.f32 %v81_v38, %v1180_v26 }
  0x32   :  { %v84_v50 = vmul.f32 %v83_v39, %v52_v5  ;;  %v86_v51 = vmul.f32 %v83_v39, %v50_v3  ;;  %v1214_v52 = vsub.f32 %v102_v35, %v108_v42  ;;  %v1216_v53 = vadd.f32 %v110_v43, %v105_v36 }
  0x33   :  { %v1218_v54 = vsub.f32 %v93_v33, %v108_v42  ;;  %v1220_v55 = vadd.f32 %v110_v43, %v97_v34  ;;  %v1224_v56 = vsub.f32 %v1203_v46, %v1197_v44  ;;  %v1228_v57 = vsub.f32 %v1206_v47, %v1200_v45 }
  0x34   :  { %2334 = vst [vmem:[#allocation19_spill] sm:$0xff] %v1216_v53  ;;  %v122_v58 = vsub.f32 %v1194_v41, %v1200_v45  ;;  %v124_v59 = vsub.f32 %v1191_v40, %v1197_v44  ;;  %v1236_v60 = vsub.f32 %v1214_v52, %v1203_v46  ;;  %v1240_v61 = vsub.f32 %v1216_v53, %v1206_v47 }
  0x35   :  { %2335 = vst [vmem:[#allocation20_spill] sm:$0xff] %v1218_v54  ;;  %2336 = vst [vmem:[#allocation21_spill] sm:$0xff] %v1220_v55  ;;  %v127_v62 = vsub.f32 %v1194_v41, %v1206_v47  ;;  %v129_v63 = vsub.f32 %v1191_v40, %v1203_v46  ;;  %v1246_v0 = vsub.f32 %v78_v37, %v84_v50 }
  0x36   :  { %2337 = vst [vmem:[#allocation22_spill] sm:$0xff] %v1224_v56  ;;  %2338 = vst [vmem:[#allocation23_spill] sm:$0xff] %v1228_v57  ;;  %v1248_v1 = vadd.f32 %v86_v51, %v81_v38  ;;  %v1250_v2 = vadd.f32 %v86_v51, %v73_v29  ;;  %v1254_v3 = vsub.f32 %v1197_v44, %v1218_v54 }
  0x37   :  { %2339 = vst [vmem:[#allocation24_spill] sm:$0xff] %v1236_v60  ;;  %2340 = vst [vmem:[#allocation25_spill] sm:$0xff] %v1240_v61  ;;  %v1258_v4 = vsub.f32 %v1200_v45, %v1220_v55  ;;  %v142_v5 = vsub.f32 %v1212_v49, %v1200_v45  ;;  %v144_v6 = vsub.f32 %v1209_v48, %v1197_v44 }
  0x38   :  { %2341 = vst [vmem:[#allocation26_spill] sm:$0xff] %v1254_v3  ;;  %v1266_v7 = vsub.f32 %v1218_v54, %v1214_v52  ;;  %v123_v8 = vmul.f32 %v122_v58, %v1224_v56  ;;  %v125_v9 = vmul.f32 %v124_v59, %v1228_v57  ;;  %v132_v10 = vsub.f32 %v1194_v41, %v1216_v53 }
  0x39   :  { %2342 = vst [vmem:[#allocation27_spill] sm:$0xff] %v1258_v4  ;;  %v1274_v12 = vsub.f32 %v1220_v55, %v1216_v53  ;;  %v128_v13 = vmul.f32 %v127_v62, %v1236_v60  ;;  %v130_v14 = vmul.f32 %v129_v63, %v1240_v61  ;;  %v134_v16 = vsub.f32 %v1191_v40, %v1214_v52 }
  0x3a   :  { %2343 = vst [vmem:[#allocation28_spill] sm:$0xff] %v1266_v7  ;;  %v137_v17 = vsub.f32 %v1194_v41, %v1220_v55  ;;  %v139_v18 = vsub.f32 %v1191_v40, %v1218_v54  ;;  %v147_v19 = vsub.f32 %v1212_v49, %v1206_v47  ;;  %v149_v20 = vsub.f32 %v1209_v48, %v1203_v46 }
  0x3b   :  { %2344 = vst [vmem:[#allocation29_spill] sm:$0xff] %v1274_v12  ;;  %v143_v22 = vmul.f32 %v142_v5, %v1224_v56  ;;  %v145_v27 = vmul.f32 %v144_v6, %v1228_v57  ;;  %v152_v28 = vsub.f32 %v1212_v49, %v1216_v53  ;;  %v154_v29 = vsub.f32 %v1209_v48, %v1214_v52 }
  0x3c   :  { %v1294_v32 = vsub.f32 %v123_v8, %v125_v9  ;;  %v133_v33 = vmul.f32 %v132_v10, %v1266_v7  ;;  %v157_v34 = vsub.f32 %v1212_v49, %v1220_v55  ;;  %v159_v35 = vsub.f32 %v1209_v48, %v1218_v54 }
  0x3d   :  { %v162_v36 = vsub.f32 %v1248_v1, %v1200_v45  ;;  %v164_v37 = vsub.f32 %v1246_v0, %v1197_v44  ;;  %v167_v38 = vsub.f32 %v1248_v1, %v1206_v47  ;;  %v169_v39 = vsub.f32 %v1246_v0, %v1203_v46 }
  0x3e   :  { %v135_v42 = vmul.f32 %v134_v16, %v1274_v12  ;;  %v138_v43 = vmul.f32 %v137_v17, %v1254_v3  ;;  %v148_v51 = vmul.f32 %v147_v19, %v1236_v60  ;;  %v150_v58 = vmul.f32 %v149_v20, %v1240_v61 }
  0x3f   :  { %v140_v59 = vmul.f32 %v139_v18, %v1258_v4  ;;  %v1314_v62 = vsub.f32 %v143_v22, %v145_v27  ;;  %v153_v63 = vmul.f32 %v152_v28, %v1266_v7  ;;  %v155_v5 = vmul.f32 %v154_v29, %v1274_v12 }
  0x40   :  { %v158_v6 = vmul.f32 %v157_v34, %v1254_v3  ;;  %v160_v8 = vmul.f32 %v159_v35, %v1258_v4  ;;  %v172_v9 = vsub.f32 %v1248_v1, %v1216_v53  ;;  %v174_v10 = vsub.f32 %v1246_v0, %v1214_v52 }
  0x41   :  { %v163_v16 = vmul.f32 %v162_v36, %v1224_v56  ;;  %v165_v17 = vmul.f32 %v164_v37, %v1228_v57  ;;  %v168_v18 = vmul.f32 %v167_v38, %v1236_v60  ;;  %v170_v19 = vmul.f32 %v169_v39, %v1240_v61 }
  0x42   :  { %v1329_v20 = vsub.f32 %v1178_v25, %v84_v50  ;;  %v1331_v22 = vsub.f32 %v128_v13, %v130_v14  ;;  %v1333_v27 = vsub.f32 %v148_v51, %v150_v58  ;;  %v177_v28 = vsub.f32 %v1248_v1, %v1220_v55 }
  0x43   :  { %v1337_v29 = vsub.f32 %v133_v33, %v135_v42  ;;  %v1339_v34 = vsub.f32 %v138_v43, %v140_v59  ;;  %v1341_v35 = vsub.f32 %v153_v63, %v155_v5  ;;  %v1345_v36 = vsub.f32 %v1294_v32, %v1314_v62 }
  0x44   :  { %v173_v25 = vmul.f32 %v172_v9, %v1266_v7  ;;  %v175_v50 = vmul.f32 %v174_v10, %v1274_v12  ;;  %v179_v13 = vsub.f32 %v1246_v0, %v1218_v54  ;;  %v182_v14 = vsub.f32 %v1250_v2, %v1200_v45 }
  0x45   :  { %v1353_v33 = vsub.f32 %v158_v6, %v160_v8  ;;  %v1355_v37 = vsub.f32 %v163_v16, %v165_v17  ;;  %v1357_v38 = vsub.f32 %v168_v18, %v170_v19  ;;  %vm203_vm0 = vcmp.eq.f32.partialorder %v1345_v36, 0.0 }
  0x46   :  { %v178_v39 = vmul.f32 %v177_v28, %v1254_v3  ;;  %v184_v42 = vsub.f32 %v1329_v20, %v1197_v44  ;;  %v204_v43 = vsel %vm203_vm0, 1.0, %v1345_v36  ;;  %v1366_v51 = vsub.f32 %v1331_v22, %v1333_v27 }
  0x47   :  { %v187_v58 = vsub.f32 %v1250_v2, %v1206_v47  ;;  %v189_v59 = vsub.f32 %v1329_v20, %v1203_v46  ;;  %972 = vrcp.f32 %v204_v43  ;;  %v1374_v63 = vsub.f32 %v1337_v29, %v1341_v35 }
  0x48   :  { %v1376_v5 = vsub.f32 %v173_v25, %v175_v50  ;;  %v180_v6 = vmul.f32 %v179_v13, %v1258_v4  ;;  %v183_v8 = vmul.f32 %v182_v14, %v1224_v56  ;;  %vm218_vm1 = vcmp.eq.f32.partialorder %v1366_v51, 0.0 }
  0x49   :  { %v192_v9 = vsub.f32 %v1250_v2, %v1216_v53  ;;  %v194_v10 = vsub.f32 %v1329_v20, %v1214_v52  ;;  %v219_v16 = vsel %vm218_vm1, 1.0, %v1366_v51  ;;  %vm233_vm2 = vcmp.eq.f32.partialorder %v1374_v63, 0.0 }
  0x4a   :  { %v185_v17 = vmul.f32 %v184_v42, %v1228_v57  ;;  %974 = vrcp.f32 %v219_v16  ;;  %v234_v18 = vsel %vm233_vm2, 1.0, %v1374_v63  ;;  %v1391_v19 = vsub.f32 %v1339_v34, %v1353_v33 }
  0x4b   :  { %v188_v28 = vmul.f32 %v187_v58, %v1236_v60  ;;  %v190_v25 = vmul.f32 %v189_v59, %v1240_v61  ;;  %976 = vrcp.f32 %v234_v18  ;;  %v1397_v50 = vsub.f32 %v1314_v62, %v1355_v37 }
  0x4c   :  { %v197_v13 = vsub.f32 %v1250_v2, %v1220_v55  ;;  %v199_v14 = vsub.f32 %v1329_v20, %v1218_v54  ;;  %vm248_vm3 = vcmp.eq.f32.partialorder %v1391_v19, 0.0  ;;  %v193_v42 = vmul.f32 %v192_v9, %v1266_v7 }
  0x4d   :  { %v195_v43 = vmul.f32 %v194_v10, %v1274_v12  ;;  %v249_v58 = vsel %vm248_vm3, 1.0, %v1391_v19  ;;  %vm279_vm4 = vcmp.eq.f32.partialorder %v1397_v50, 0.0  ;;  %v1408_v59 = vsub.f32 %v178_v39, %v180_v6 }
  0x4e   :  { %978 = vrcp.f32 %v249_v58  ;;  %v280_v16 = vsel %vm279_vm4, 1.0, %v1397_v50  ;;  %v1413_v18 = vsub.f32 %v1333_v27, %v1357_v38  ;;  %v1415_v31 = vsub.f32 %v183_v8, %v185_v17 }
  0x4f   :  { %v1417_v24 = vsub.f32 %v188_v28, %v190_v25  ;;  %980 = vrcp.f32 %v280_v16  ;;  %v1421_v9 = vsub.f32 %v1341_v35, %v1376_v5  ;;  %v1424_v10 = vmul.f32 %v197_v13, %v1254_v3 }
  0x50   :  { %v1427_v39 = vmul.f32 %v199_v14, %v1258_v4  ;;  %vm210_vm5 = vcmp.lt.f32.partialorder %v1294_v32, 0.0  ;;  %vm294_vm6 = vcmp.eq.f32.partialorder %v1413_v18, 0.0  ;;  %v1431_v8 = vsub.f32 %v193_v42, %v195_v43 }
  0x51   :  { %v973_v6 = vpop.eup %972  ;;  %vm209_vm7 = vcmp.lt.f32.partialorder %v1345_v36, 0.0  ;;  %v295_v17 = vsel %vm294_vm6, 1.0, %v1413_v18  ;;  %vm309_vm8 = vcmp.eq.f32.partialorder %v1421_v9, 0.0  ;;  %vm225_vm9 = vcmp.lt.f32.partialorder %v1331_v22, 0.0 }
  0x52   :  { %v206_v28 = vmul.f32 %v973_v6, %v1294_v32  ;;  %982 = vrcp.f32 %v295_v17  ;;  %v310_v25 = vsel %vm309_vm8, 1.0, %v1421_v9  ;;  %v2306_v13 = vmov 0.0  }
  0x53   :  { %v211_v14 = vsel %vm210_vm5, 2.0, %v2306_v13  ;;  %vm213_vm10 = vcmp.gt.f32.partialorder %v1345_v36, 0.0  ;;  %984 = vrcp.f32 %v310_v25  ;;  %v1443_v42 = vsub.f32 %v1353_v33, %v1408_v59 }
  0x54   :  { %v975_v43 = vpop.eup %974  ;;  %v207_v58 = vmax.f32 %v206_v28, -1.0  ;;  %vm224_vm11 = vcmp.lt.f32.partialorder %v1366_v51, 0.0  ;;  %vm240_vm12 = vcmp.lt.f32.partialorder %v1337_v29, 0.0  ;;  %v1449_v16 = vsub.f32 %v1355_v37, %v1415_v31 }
  0x55   :  { %v977_v6 = vpop.eup %976  ;;  %v221_v17 = vmul.f32 %v975_v43, %v1331_v22  ;;  %v226_v4 = vsel %vm225_vm9, 2.0, %v2306_v13  ;;  %vm228_vm13 = vcmp.gt.f32.partialorder %v1366_v51, 0.0  ;;  %vm324_vm14 = vcmp.eq.f32.partialorder %v1443_v42, 0.0 }
  0x56   :  { %v208_v25 = vmin.f32 %v207_v58, 2.0  ;;  %v236_v28 = vmul.f32 %v977_v6, %v1337_v29  ;;  %vm255_vm15 = vcmp.lt.f32.partialorder %v1339_v34, 0.0  ;;  %v325_v3 = vsel %vm324_vm14, 1.0, %v1443_v42 }
  0x57   :  { %v222_v12 = vmax.f32 %v221_v17, -1.0  ;;  %vm239_vm0 = vcmp.lt.f32.partialorder %v1374_v63, 0.0  ;;  %v241_v7 = vsel %vm240_vm12, 2.0, %v2306_v13  ;;  %vm286_vm1 = vcmp.lt.f32.partialorder %v1314_v62, 0.0 }
  0x58   :  { %v979_v43 = vpop.eup %978  ;;  %v237_v26 = vmax.f32 %v236_v28, -1.0  ;;  %vm243_vm2 = vcmp.gt.f32.partialorder %v1374_v63, 0.0  ;;  %986 = vrcp.f32 %v325_v3  ;;  %vm355_vm3 = vcmp.eq.f32.partialorder %v1449_v16, 0.0 }
  0x59   :  { %v981_v58 = vpop.eup %980  ;;  %v212_v6 = vsel %vm209_vm7, %v208_v25, %v211_v14  ;;  %v223_v30 = vmin.f32 %v222_v12, 2.0  ;;  %v256_v17 = vsel %vm255_vm15, 2.0, %v2306_v13  ;;  %v1468_v23 = vsub.f32 %v1357_v38, %v1417_v24 }
  0x5a   :  { %v251_v15 = vmul.f32 %v979_v43, %v1339_v34  ;;  %v282_v28 = vmul.f32 %v981_v58, %v1314_v62  ;;  %vm285_vm4 = vcmp.lt.f32.partialorder %v1397_v50, 0.0  ;;  %v287_v3 = vsel %vm286_vm1, 2.0, %v2306_v13 }
  0x5b   :  { %v214_v21 = vsel %vm213_vm10, %v208_v25, 1.0  ;;  %vm254_vm5 = vcmp.lt.f32.partialorder %v1391_v19, 0.0  ;;  %vm289_vm6 = vcmp.gt.f32.partialorder %v1397_v50, 0.0  ;;  %vm301_vm7 = vcmp.lt.f32.partialorder %v1333_v27, 0.0 }
  0x5c   :  { %v356_v12 = vsel %vm355_vm3, 1.0, %v1449_v16  ;;  %v983_v14 = vpop.eup %982  ;;  %v215_v11 = vmax.f32 %v212_v6, 0.0  ;;  %v238_v43 = vmin.f32 %v237_v26, 2.0  ;;  %vm258_vm8 = vcmp.gt.f32.partialorder %v1391_v19, 0.0 }
  0x5d   :  { %vm300_vm9 = vcmp.lt.f32.partialorder %v1413_v18, 0.0  ;;  %vm316_vm12 = vcmp.lt.f32.partialorder %v1341_v35, 0.0  ;;  %v985_v62 = vpop.eup %984  ;;  %v227_v36 = vsel %vm224_vm11, %v223_v30, %v226_v4  ;;  %v283_v25 = vmax.f32 %v282_v28, -1.0 }
  0x5e   :  { %v297_v58 = vmul.f32 %v983_v14, %v1333_v27  ;;  %vm370_vm10 = vcmp.eq.f32.partialorder %v1468_v23, 0.0  ;;  %v216_v13 = vmin.f32 %v214_v21, 1.0  ;;  %v252_v61 = vmax.f32 %v251_v15, -1.0 }
  0x5f   :  { %v312_v6 = vmul.f32 %v985_v62, %v1341_v35  ;;  %988 = vrcp.f32 %v356_v12  ;;  %v229_v26 = vsel %vm228_vm13, %v223_v30, 1.0  ;;  %v284_v60 = vmin.f32 %v283_v25, 2.0 }
  0x60   :  { %v298_v57 = vmax.f32 %v297_v58, -1.0  ;;  %v2345_v56 = vmov 0.0   ;;  %v230_v4 = vmax.f32 %v215_v11, %v227_v36  ;;  %v242_v28 = vsel %vm239_vm0, %v238_v43, %v241_v7 }
  0x61   :  { %v302_v54 = vsel %vm301_vm7, 2.0, %v2345_v56  ;;  %vm304_vm11 = vcmp.gt.f32.partialorder %v1413_v18, 0.0  ;;  %v371_v15 = vsel %vm370_vm10, 1.0, %v1468_v23  ;;  %v288_v21 = vsel %vm285_vm4, %v284_v60, %v287_v3 }
  0x62   :  { %v290_v30 = vsel %vm289_vm6, %v284_v60, 1.0  ;;  %v299_v51 = vmin.f32 %v298_v57, 2.0  ;;  %v313_v12 = vmax.f32 %v312_v6, -1.0  ;;  %v987_v14 = vpop.eup %986  ;;  %v231_v62 = vmin.f32 %v216_v13, %v229_v26 }
  0x63   :  { %v244_v11 = vsel %vm243_vm2, %v238_v43, 1.0  ;;  %v253_v27 = vmin.f32 %v252_v61, 2.0  ;;  %vm331_vm13 = vcmp.lt.f32.partialorder %v1353_v33, 0.0  ;;  %v291_v7 = vmax.f32 %v288_v21, 0.0 }
  0x64   :  { %v292_v36 = vmin.f32 %v290_v30, 1.0  ;;  %v303_v25 = vsel %vm300_vm9, %v299_v51, %v302_v54  ;;  %990 = vrcp.f32 %v371_v15  ;;  %v245_v3 = vmax.f32 %v230_v4, %v242_v28 }
  0x65   :  { %vm315_vm14 = vcmp.lt.f32.partialorder %v1421_v9, 0.0  ;;  %v317_v57 = vsel %vm316_vm12, 2.0, %v2345_v56  ;;  %vm319_vm15 = vcmp.gt.f32.partialorder %v1421_v9, 0.0  ;;  %v305_v60 = vsel %vm304_vm11, %v299_v51, 1.0 }
  0x66   :  { %v306_v61 = vmax.f32 %v291_v7, %v303_v25  ;;  %v314_v63 = vmin.f32 %v313_v12, 2.0  ;;  %v327_v50 = vmul.f32 %v987_v14, %v1353_v33  ;;  %v246_v13 = vmin.f32 %v231_v62, %v244_v11 }
  0x67   :  { %v257_v54 = vsel %vm254_vm5, %v253_v27, %v256_v17  ;;  %v307_v43 = vmin.f32 %v292_v36, %v305_v60  ;;  %v332_v58 = vsel %vm331_vm13, 2.0, %v2345_v56  ;;  %v259_v35 = vsel %vm258_vm8, %v253_v27, 1.0 }
  0x68   :  { %v318_v9 = vsel %vm315_vm14, %v314_v63, %v317_v57  ;;  %v320_v6 = vsel %vm319_vm15, %v314_v63, 1.0  ;;  %v328_v18 = vmax.f32 %v327_v50, -1.0  ;;  %vm330_vm0 = vcmp.lt.f32.partialorder %v1443_v42, 0.0 }
  0x69   :  { %v989_v26 = vpop.eup %988  ;;  %v321_v4 = vmax.f32 %v306_v61, %v318_v9  ;;  %v322_v28 = vmin.f32 %v307_v43, %v320_v6  ;;  %vm334_vm1 = vcmp.gt.f32.partialorder %v1443_v42, 0.0  ;;  %v1523_v15 = vmax.f32 %v245_v3, %v257_v54 }
  0x6a   :  { %v329_v17 = vmin.f32 %v328_v18, 2.0  ;;  %v1527_v33 = vsub.f32 %v1376_v5, %v1431_v8  ;;  %v1531_v19 = vsub.f32 %v1424_v10, %v1427_v39  ;;  %v1533_v21 = vmin.f32 %v246_v13, %v259_v35 }
  0x6b   :  { %v1537_v30 = vsub.f32 %v1209_v48, %v1191_v40  ;;  %v358_v42 = vmul.f32 %v989_v26, %v1355_v37  ;;  %v1543_v14 = vsub.f32 %v1212_v49, %v1194_v41  ;;  %v1551_v39 = vsub.f32 %v1246_v0, %v1209_v48 }
  0x6c   :  { %v333_v51 = vsel %vm330_vm0, %v329_v17, %v332_v58  ;;  %v335_v12 = vsel %vm334_vm1, %v329_v17, 1.0  ;;  %vm385_vm2 = vcmp.eq.f32.partialorder %v1527_v33, 0.0  ;;  %v1557_v7 = vsub.f32 %v1248_v1, %v1212_v49 }
  0x6d   :  { %v1545_v62 = vmax.f32 %v321_v4, %v333_v51  ;;  %v1547_v10 = vmin.f32 %v322_v28, %v335_v12  ;;  %v264_v27 = vmul.f32 %v1537_v30, %v1523_v15  ;;  %vm362_vm3 = vcmp.lt.f32.partialorder %v1355_v37, 0.0 }
  0x6e   :  { %v991_v11 = vpop.eup %990  ;;  %v386_v36 = vsel %vm385_vm2, 1.0, %v1527_v33  ;;  %v266_v25 = vmul.f32 %v1543_v14, %v1523_v15  ;;  %v268_v3 = vmul.f32 %v1537_v30, %v1533_v21  ;;  %v270_v57 = vmul.f32 %v1543_v14, %v1533_v21 }
  0x6f   :  { %v1569_v60 = vsub.f32 %v1408_v59, %v1531_v19  ;;  %v359_v61 = vmax.f32 %v358_v42, -1.0  ;;  %vm361_vm4 = vcmp.lt.f32.partialorder %v1449_v16, 0.0  ;;  %992 = vrcp.f32 %v386_v36 }
  0x70   :  { %v340_v37 = vmul.f32 %v1551_v39, %v1545_v62  ;;  %v346_v63 = vmul.f32 %v1557_v7, %v1547_v10  ;;  %v363_v50 = vsel %vm362_vm3, 2.0, %v2345_v56  ;;  %v373_v13 = vmul.f32 %v991_v11, %v1357_v38 }
  0x71   :  { %v265_v54 = vadd.f32 %v264_v27, %v1191_v40  ;;  %v342_v43 = vmul.f32 %v1557_v7, %v1545_v62  ;;  %v344_v58 = vmul.f32 %v1551_v39, %v1547_v10  ;;  %vm365_vm5 = vcmp.gt.f32.partialorder %v1449_v16, 0.0 }
  0x72   :  { %v267_v35 = vadd.f32 %v266_v25, %v1194_v41  ;;  %v269_v9 = vadd.f32 %v268_v3, %v1191_v40  ;;  %v271_v6 = vadd.f32 %v270_v57, %v1194_v41  ;;  %vm400_vm6 = vcmp.eq.f32.partialorder %v1569_v60, 0.0 }
  0x73   :  { %v360_v18 = vmin.f32 %v359_v61, 2.0  ;;  %vm376_vm7 = vcmp.lt.f32.partialorder %v1468_v23, 0.0  ;;  %vm377_vm8 = vcmp.lt.f32.partialorder %v1357_v38, 0.0  ;;  %v401_v26 = vsel %vm400_vm6, 1.0, %v1569_v60 }
  0x74   :  { %v341_v4 = vadd.f32 %v340_v37, %v1209_v48  ;;  %v347_v28 = vadd.f32 %v346_v63, %v1212_v49  ;;  %v374_v17 = vmax.f32 %v373_v13, -1.0  ;;  %994 = vrcp.f32 %v401_v26 }
  0x75   :  { %v343_v51 = vadd.f32 %v342_v43, %v1212_v49  ;;  %v345_v12 = vadd.f32 %v344_v58, %v1209_v48  ;;  %v1597_v42 = vsub.f32 %v1415_v31, %v1294_v32  ;;  %v1601_v11 = vsub.f32 %v1417_v24, %v1331_v22 }
  0x76   :  { %v272_v38 = vmul.f32 %v271_v6, %v265_v54  ;;  %v273_v27 = vmul.f32 %v269_v9, %v267_v35  ;;  %v378_v36 = vsel %vm377_vm8, 2.0, %v2345_v56  ;;  %v1606_v25 = vsub.f32 %v1431_v8, %v1337_v29 }
  0x77   :  { %v364_v3 = vsel %vm361_vm4, %v360_v18, %v363_v50  ;;  %v366_v57 = vsel %vm365_vm5, %v360_v18, 1.0  ;;  %vm380_vm9 = vcmp.gt.f32.partialorder %v1468_v23, 0.0  ;;  %vm431_vm12 = vcmp.eq.f32.partialorder %v1597_v42, 0.0 }
  0x78   :  { %v348_v32 = vmul.f32 %v347_v28, %v341_v4  ;;  %v375_v22 = vmin.f32 %v374_v17, 2.0  ;;  %v432_v61 = vsel %vm431_vm12, 1.0, %v1597_v42  ;;  %vm446_vm10 = vcmp.eq.f32.partialorder %v1601_v11, 0.0 }
  0x79   :  { %v993_v37 = vpop.eup %992  ;;  %v349_v63 = vmul.f32 %v345_v12, %v343_v51  ;;  %996 = vrcp.f32 %v432_v61  ;;  %v447_v29 = vsel %vm446_vm10, 1.0, %v1601_v11  ;;  %vm461_vm11 = vcmp.eq.f32.partialorder %v1606_v25, 0.0 }
  0x7a   :  { %v274_v50 = vsub.f32 %v272_v38, %v273_v27  ;;  %v388_v16 = vmul.f32 %v993_v37, %v1376_v5  ;;  %998 = vrcp.f32 %v447_v29  ;;  %v462_v13 = vsel %vm461_vm11, 1.0, %v1606_v25 }
  0x7b   :  { %v367_v54 = vmax.f32 %v364_v3, 0.0  ;;  %v368_v43 = vmin.f32 %v366_v57, 1.0  ;;  %1000 = vrcp.f32 %v462_v13  ;;  %v1622_v58 = vsub.f32 %v1531_v19, %v1339_v34 }
  0x7c   :  { %vm275_vm13 = vcmp.lt.f32.partialorder %v1523_v15, %v1533_v21  ;;  %v379_v35 = vsel %vm376_vm7, %v375_v22, %v378_v36  ;;  %v381_v9 = vsel %vm380_vm9, %v375_v22, 1.0  ;;  %v350_v6 = vsub.f32 %v348_v32, %v349_v63 }
  0x7d   :  { %vm476_vm14 = vcmp.eq.f32.partialorder %v1622_v58, 0.0  ;;  %vm351_vm15 = vcmp.lt.f32.partialorder %v1545_v62, %v1547_v10  ;;  %v389_v26 = vmax.f32 %v388_v16, -1.0  ;;  %vm392_vm0 = vcmp.lt.f32.partialorder %v1376_v5, 0.0 }
  0x7e   :  { %v995_v18 = vpop.eup %994  ;;  %v477_v34 = vsel %vm476_vm14, 1.0, %v1622_v58  ;;  %v276_v4 = vsel %vm275_vm13, %v274_v50, 0.0  ;;  %v382_v15 = vmax.f32 %v367_v54, %v379_v35  ;;  %v383_v21 = vmin.f32 %v368_v43, %v381_v9 }
  0x7f   :  { %v403_v28 = vmul.f32 %v995_v18, %v1408_v59  ;;  %vm391_vm1 = vcmp.lt.f32.partialorder %v1527_v33, 0.0  ;;  %vm407_vm2 = vcmp.lt.f32.partialorder %v1408_v59, 0.0  ;;  %vm438_vm3 = vcmp.lt.f32.partialorder %v1415_v31, 0.0 }
  0x80   :  { %1002 = vrcp.f32 %v477_v34  ;;  %v352_v23 = vsel %vm351_vm15, %v350_v6, 0.0  ;;  %v393_v62 = vsel %vm392_vm0, 2.0, %v2345_v56  ;;  %vm395_vm4 = vcmp.gt.f32.partialorder %v1527_v33, 0.0 }
  0x81   :  { %vm406_vm5 = vcmp.lt.f32.partialorder %v1569_v60, 0.0  ;;  %v390_v5 = vmin.f32 %v389_v26, 2.0  ;;  %v404_v10 = vmax.f32 %v403_v28, -1.0  ;;  %vm410_vm6 = vcmp.gt.f32.partialorder %v1569_v60, 0.0 }
  0x82   :  { %vm453_vm7 = vcmp.lt.f32.partialorder %v1417_v24, 0.0  ;;  %v408_v51 = vsel %vm407_vm2, 2.0, %v2345_v56  ;;  %v1647_v59 = vsub.f32 %v1329_v20, %v1246_v0  ;;  %v1651_v12 = vsub.f32 %v1250_v2, %v1248_v1 }
  0x83   :  { %v997_v17 = vpop.eup %996  ;;  %v439_v38 = vsel %vm438_vm3, 2.0, %v2345_v56  ;;  %v1654_v36 = vadd.f32 %v352_v23, %v276_v4  ;;  %vm437_vm8 = vcmp.lt.f32.partialorder %v1597_v42, 0.0  ;;  %vm441_vm9 = vcmp.gt.f32.partialorder %v1597_v42, 0.0 }
  0x84   :  { %v999_v27 = vpop.eup %998  ;;  %v434_v3 = vmul.f32 %v997_v17, %v1415_v31  ;;  %vm452_vm12 = vcmp.lt.f32.partialorder %v1601_v11, 0.0  ;;  %v454_v22 = vsel %vm453_vm7, 2.0, %v2345_v56  ;;  %vm468_vm10 = vcmp.lt.f32.partialorder %v1431_v8, 0.0 }
  0x85   :  { %2346 = vst [vmem:[#allocation30_spill] sm:$0xff] %v1654_v36  ;;  %v1001_v57 = vpop.eup %1000  ;;  %v449_v32 = vmul.f32 %v999_v27, %v1417_v24  ;;  %v394_v61 = vsel %vm391_vm1, %v390_v5, %v393_v62  ;;  %v396_v37 = vsel %vm395_vm4, %v390_v5, 1.0  ;;  %v405_v31 = vmin.f32 %v404_v10, 2.0 }
  0x86   :  { %v435_v63 = vmax.f32 %v434_v3, -1.0  ;;  %vm456_vm11 = vcmp.gt.f32.partialorder %v1601_v11, 0.0  ;;  %v464_v50 = vmul.f32 %v1001_v57, %v1431_v8  ;;  %vm483_vm13 = vcmp.lt.f32.partialorder %v1531_v19, 0.0 }
  0x87   :  { %v450_v29 = vmax.f32 %v449_v32, -1.0  ;;  %vm467_vm14 = vcmp.lt.f32.partialorder %v1606_v25, 0.0  ;;  %v469_v24 = vsel %vm468_vm10, 2.0, %v2345_v56  ;;  %v1674_v16 = vsub.f32 %v1191_v40, %v1329_v20 }
  0x88   :  { %v506_v33 = vsub.f32 %v1200_v45, %v1194_v41  ;;  %v397_v13 = vmax.f32 %v382_v15, %v394_v61  ;;  %v398_v54 = vmin.f32 %v383_v21, %v396_v37  ;;  %v436_v43 = vmin.f32 %v435_v63, 2.0 }
  0x89   :  { %vm471_vm15 = vcmp.gt.f32.partialorder %v1606_v25, 0.0  ;;  %v508_v8 = vsub.f32 %v1197_v44, %v1191_v40  ;;  %v409_v9 = vsel %vm406_vm5, %v405_v31, %v408_v51  ;;  %v411_v6 = vsel %vm410_vm6, %v405_v31, 1.0 }
  0x8a   :  { %v1003_v35 = vpop.eup %1002  ;;  %v484_v18 = vsel %vm483_vm13, 2.0, %v2345_v56  ;;  %v511_v26 = vsub.f32 %v1200_v45, %v1212_v49  ;;  %v440_v34 = vsel %vm437_vm8, %v436_v43, %v439_v38  ;;  %v451_v4 = vmin.f32 %v450_v29, 2.0 }
  0x8b   :  { %v465_v15 = vmax.f32 %v464_v50, -1.0  ;;  %v1692_v21 = vsub.f32 %v1194_v41, %v1250_v2  ;;  %v442_v28 = vsel %vm441_vm9, %v436_v43, 1.0  ;;  %vm482_vm0 = vcmp.lt.f32.partialorder %v1622_v58, 0.0 }
  0x8c   :  { %v507_v60 = vmul.f32 %v506_v33, %v1537_v30  ;;  %v513_v23 = vsub.f32 %v1197_v44, %v1209_v48  ;;  %v516_v62 = vsub.f32 %v1200_v45, %v1248_v1  ;;  %v1702_v5 = vmax.f32 %v397_v13, %v409_v9 }
  0x8d   :  { %v1704_v10 = vmin.f32 %v398_v54, %v411_v6  ;;  %v479_v17 = vmul.f32 %v1003_v35, %v1531_v19  ;;  %vm486_vm1 = vcmp.gt.f32.partialorder %v1622_v58, 0.0  ;;  %v509_v42 = vmul.f32 %v508_v8, %v1543_v14 }
  0x8e   :  { %2347 = vst [vmem:[#allocation31_spill] sm:$0xff] %v1702_v5  ;;  %v443_v51 = vmax.f32 %v440_v34, 0.0  ;;  %v512_v38 = vmul.f32 %v511_v26, %v1551_v39  ;;  %v518_v27 = vsub.f32 %v1197_v44, %v1246_v0  ;;  %v521_v3 = vsub.f32 %v1200_v45, %v1250_v2 }
  0x8f   :  { %2348 = vst [vmem:[#allocation32_spill] sm:$0xff] %v1704_v10  ;;  %v444_v57 = vmin.f32 %v442_v28, 1.0  ;;  %v455_v32 = vsel %vm452_vm12, %v451_v4, %v454_v22  ;;  %v466_v61 = vmin.f32 %v465_v15, 2.0  ;;  %v480_v37 = vmax.f32 %v479_v17, -1.0 }
  0x90   :  { %v457_v19 = vsel %vm456_vm11, %v451_v4, 1.0  ;;  %v514_v31 = vmul.f32 %v513_v23, %v1557_v7  ;;  %v517_v63 = vmul.f32 %v516_v62, %v1647_v59  ;;  %v523_v29 = vsub.f32 %v1197_v44, %v1329_v20 }
  0x91   :  { %v416_v50 = vmul.f32 %v1647_v59, %v1702_v5  ;;  %v418_v33 = vmul.f32 %v1651_v12, %v1702_v5  ;;  %v420_v22 = vmul.f32 %v1647_v59, %v1704_v10  ;;  %v422_v11 = vmul.f32 %v1651_v12, %v1704_v10 }
  0x92   :  { %v458_v13 = vmax.f32 %v443_v51, %v455_v32  ;;  %v519_v54 = vmul.f32 %v518_v27, %v1651_v12  ;;  %v526_v43 = vsub.f32 %v1206_v47, %v1194_v41  ;;  %v528_v8 = vsub.f32 %v1203_v46, %v1191_v40 }
  0x93   :  { %v459_v35 = vmin.f32 %v444_v57, %v457_v19  ;;  %v470_v9 = vsel %vm467_vm14, %v466_v61, %v469_v24  ;;  %v481_v6 = vmin.f32 %v480_v37, 2.0  ;;  %v522_v26 = vmul.f32 %v521_v3, %v1674_v16 }
  0x94   :  { %v472_v34 = vsel %vm471_vm15, %v466_v61, 1.0  ;;  %v524_v4 = vmul.f32 %v523_v29, %v1692_v21  ;;  %v531_v15 = vsub.f32 %v1206_v47, %v1212_v49  ;;  %v533_v28 = vsub.f32 %v1203_v46, %v1209_v48 }
  0x95   :  { %v417_v23 = vadd.f32 %v416_v50, %v1246_v0  ;;  %v419_v62 = vadd.f32 %v418_v33, %v1248_v1  ;;  %v421_v24 = vadd.f32 %v420_v22, %v1246_v0  ;;  %v423_v17 = vadd.f32 %v422_v11, %v1248_v1 }
  0x96   :  { %v473_v51 = vmax.f32 %v458_v13, %v470_v9  ;;  %v1749_v27 = vsub.f32 %v507_v60, %v509_v42  ;;  %v527_v25 = vmul.f32 %v526_v43, %v1537_v30  ;;  %v529_v3 = vmul.f32 %v528_v8, %v1543_v14 }
  0x97   :  { %v474_v57 = vmin.f32 %v459_v35, %v472_v34  ;;  %v485_v32 = vsel %vm482_vm0, %v481_v6, %v484_v18  ;;  %v1755_v61 = vsub.f32 %v512_v38, %v514_v31  ;;  %v536_v37 = vsub.f32 %v1206_v47, %v1248_v1 }
  0x98   :  { %v487_v19 = vsel %vm486_vm1, %v481_v6, 1.0  ;;  %v532_v29 = vmul.f32 %v531_v15, %v1551_v39  ;;  %v534_v60 = vmul.f32 %v533_v28, %v1557_v7  ;;  %v538_v42 = vsub.f32 %v1203_v46, %v1246_v0 }
  0x99   :  { %v1765_v50 = vmul.f32 %v423_v17, %v417_v23  ;;  %v1767_v33 = vmul.f32 %v421_v24, %v419_v62  ;;  %v1769_v18 = vsub.f32 %v517_v63, %v519_v54  ;;  %v1771_v38 = vsub.f32 %v522_v26, %v524_v4 }
  0x9a   :  { %v1773_v31 = vmax.f32 %v473_v51, %v485_v32  ;;  %v1775_v22 = vsub.f32 %v527_v25, %v529_v3  ;;  %v541_v58 = vsub.f32 %v1206_v47, %v1250_v2  ;;  %v543_v11 = vsub.f32 %v1203_v46, %v1329_v20 }
  0x9b   :  { %v1781_v13 = vmin.f32 %v474_v57, %v487_v19  ;;  %v537_v43 = vmul.f32 %v536_v37, %v1647_v59  ;;  %v546_v63 = vsub.f32 %v1216_v53, %v1194_v41  ;;  %v548_v54 = vsub.f32 %v1214_v52, %v1191_v40  ;;  %v2351_v19 = vld [vmem:[#allocation20_spill] sm:$0xff] }
  0x9c   :  { %2349 = vst [vmem:[#allocation33_spill] sm:$0xff] %v1773_v31  ;;  %v1788_v8 = vsub.f32 %v532_v29, %v534_v60  ;;  %v539_v35 = vmul.f32 %v538_v42, %v1651_v12  ;;  %v551_v9 = vsub.f32 %v1216_v53, %v1212_v49  ;;  %v553_v6 = vsub.f32 %v1214_v52, %v1209_v48 }
  0x9d   :  { %2350 = vst [vmem:[#allocation34_spill] sm:$0xff] %v1781_v13  ;;  %v556_v26 = vsub.f32 %v1216_v53, %v1248_v1  ;;  %v558_v34 = vsub.f32 %v1214_v52, %v1246_v0  ;;  %v561_v4 = vsub.f32 %v1216_v53, %v1250_v2  ;;  %v563_v15 = vsub.f32 %v1214_v52, %v1329_v20 }
  0x9e   :  { %v492_v28 = vmul.f32 %v1674_v16, %v1773_v31  ;;  %v1807_v23 = vmul.f32 %v1692_v21, %v1773_v31  ;;  %v542_v62 = vmul.f32 %v541_v58, %v1674_v16  ;;  %v544_v24 = vmul.f32 %v543_v11, %v1692_v21 }
  0x9f   :  { %v1813_v17 = vmul.f32 %v1674_v16, %v1781_v13  ;;  %v498_v51 = vmul.f32 %v1692_v21, %v1781_v13  ;;  %v547_v25 = vmul.f32 %v546_v63, %v1537_v30  ;;  %v549_v3 = vmul.f32 %v548_v54, %v1543_v14 }
  0xa0   :  { %v552_v57 = vmul.f32 %v551_v9, %v1551_v39  ;;  %v554_v32 = vmul.f32 %v553_v6, %v1557_v7  ;;  %v566_v37 = vsub.f32 %v1220_v55, %v1194_v41  ;;  %v568_v29 = vsub.f32 %v2351_v19, %v1191_v40 }
  0xa1   :  { %v557_v60 = vmul.f32 %v556_v26, %v1647_v59  ;;  %v559_v42 = vmul.f32 %v558_v34, %v1651_v12  ;;  %v562_v58 = vmul.f32 %v561_v4, %v1674_v16  ;;  %v564_v11 = vmul.f32 %v563_v15, %v1692_v21 }
  0xa2   :  { %v1830_v63 = vadd.f32 %v492_v28, %v1329_v20  ;;  %v1832_v54 = vsub.f32 %v537_v43, %v539_v35  ;;  %v1834_v9 = vsub.f32 %v542_v62, %v544_v24  ;;  %v1838_v41 = vsub.f32 %v1749_v27, %v1775_v22 }
  0xa3   :  { %v1841_v40 = vadd.f32 %v498_v51, %v1250_v2  ;;  %v1843_v6 = vsub.f32 %v547_v25, %v549_v3  ;;  %v571_v26 = vsub.f32 %v1220_v55, %v1212_v49  ;;  %v573_v34 = vsub.f32 %v2351_v19, %v1209_v48 }
  0xa4   :  { %v1849_v4 = vsub.f32 %v552_v57, %v554_v32  ;;  %v567_v43 = vmul.f32 %v566_v37, %v1537_v30  ;;  %v569_v35 = vmul.f32 %v568_v29, %v1543_v14  ;;  %vm587_vm2 = vcmp.eq.f32.partialorder %v1838_v41, 0.0 }
  0xa5   :  { %v1854_v15 = vsub.f32 %v557_v60, %v559_v42  ;;  %v1856_v28 = vsub.f32 %v562_v58, %v564_v11  ;;  %v588_v62 = vsel %vm587_vm2, 1.0, %v1838_v41  ;;  %v1861_v49 = vsub.f32 %v1755_v61, %v1788_v8 }
  0xa6   :  { %v576_v48 = vsub.f32 %v1220_v55, %v1248_v1  ;;  %v578_v30 = vsub.f32 %v2351_v19, %v1246_v0  ;;  %1004 = vrcp.f32 %v588_v62  ;;  %v1869_v14 = vsub.f32 %v1769_v18, %v1832_v54 }
  0xa7   :  { %v572_v24 = vmul.f32 %v571_v26, %v1551_v39  ;;  %v574_v51 = vmul.f32 %v573_v34, %v1557_v7  ;;  %v581_v25 = vsub.f32 %v1220_v55, %v1250_v2  ;;  %vm602_vm3 = vcmp.eq.f32.partialorder %v1861_v49, 0.0 }
  0xa8   :  { %v1876_v3 = vsub.f32 %v567_v43, %v569_v35  ;;  %v603_v0 = vsel %vm602_vm3, 1.0, %v1861_v49  ;;  %vm617_vm4 = vcmp.eq.f32.partialorder %v1869_v14, 0.0  ;;  %vm594_vm5 = vcmp.lt.f32.partialorder %v1749_v27, 0.0 }
  0xa9   :  { %1006 = vrcp.f32 %v603_v0  ;;  %v618_v39 = vsel %vm617_vm4, 1.0, %v1869_v14  ;;  %v1886_v7 = vsub.f32 %v1771_v38, %v1834_v9  ;;  %v1889_v57 = vmul.f32 %v576_v48, %v1647_v59 }
  0xaa   :  { %v1892_v32 = vmul.f32 %v578_v30, %v1651_v12  ;;  %1008 = vrcp.f32 %v618_v39  ;;  %v1896_v37 = vsub.f32 %v1775_v22, %v1843_v6  ;;  %v1898_v29 = vsub.f32 %v572_v24, %v574_v51 }
  0xab   :  { %v1901_v60 = vmul.f32 %v581_v25, %v1674_v16  ;;  %vm609_vm6 = vcmp.lt.f32.partialorder %v1755_v61, 0.0  ;;  %vm632_vm7 = vcmp.eq.f32.partialorder %v1886_v7, 0.0  ;;  %v595_v59 = vsel %vm594_vm5, 2.0, %v2345_v56 }
  0xac   :  { %vm624_vm8 = vcmp.lt.f32.partialorder %v1769_v18, 0.0  ;;  %v633_v12 = vsel %vm632_vm7, 1.0, %v1886_v7  ;;  %vm661_vm9 = vcmp.eq.f32.partialorder %v1896_v37, 0.0  ;;  %vm593_vm12 = vcmp.lt.f32.partialorder %v1838_v41, 0.0 }
  0xad   :  { %1010 = vrcp.f32 %v633_v12  ;;  %v662_v42 = vsel %vm661_vm9, 1.0, %v1896_v37  ;;  %v1913_v16 = vsub.f32 %v1788_v8, %v1849_v4  ;;  %vm597_vm10 = vcmp.gt.f32.partialorder %v1838_v41, 0.0 }
  0xae   :  { %v610_v58 = vsel %vm609_vm6, 2.0, %v2345_v56  ;;  %1012 = vrcp.f32 %v662_v42  ;;  %v1919_v11 = vsub.f32 %v1832_v54, %v1854_v15  ;;  %vm608_vm11 = vcmp.lt.f32.partialorder %v1861_v49, 0.0 }
  0xaf   :  { %vm612_vm13 = vcmp.gt.f32.partialorder %v1861_v49, 0.0  ;;  %v625_v26 = vsel %vm624_vm8, 2.0, %v2345_v56  ;;  %vm676_vm14 = vcmp.eq.f32.partialorder %v1913_v16, 0.0  ;;  %vm623_vm15 = vcmp.lt.f32.partialorder %v1869_v14, 0.0 }
  0xb0   :  { %v1005_v34 = vpop.eup %1004  ;;  %vm639_vm0 = vcmp.lt.f32.partialorder %v1771_v38, 0.0  ;;  %v677_v43 = vsel %vm676_vm14, 1.0, %v1913_v16  ;;  %vm691_vm1 = vcmp.eq.f32.partialorder %v1919_v11, 0.0  ;;  %v1933_v48 = vsub.f32 %v1834_v9, %v1856_v28 }
  0xb1   :  { %v590_v35 = vmul.f32 %v1005_v34, %v1749_v27  ;;  %1014 = vrcp.f32 %v677_v43  ;;  %v692_v62 = vsel %vm691_vm1, 1.0, %v1919_v11  ;;  %vm627_vm2 = vcmp.gt.f32.partialorder %v1869_v14, 0.0 }
  0xb2   :  { %vm668_vm3 = vcmp.lt.f32.partialorder %v1775_v22, 0.0  ;;  %1016 = vrcp.f32 %v692_v62  ;;  %v1939_v30 = vsub.f32 %v1843_v6, %v1876_v3  ;;  %vm638_vm4 = vcmp.lt.f32.partialorder %v1886_v7, 0.0 }
  0xb3   :  { %v1007_v24 = vpop.eup %1006  ;;  %v591_v51 = vmax.f32 %v590_v35, -1.0  ;;  %v640_v25 = vsel %vm639_vm0, 2.0, %v2345_v56  ;;  %vm706_vm5 = vcmp.eq.f32.partialorder %v1933_v48, 0.0  ;;  %vm642_vm6 = vcmp.gt.f32.partialorder %v1886_v7, 0.0 }
  0xb4   :  { %v1009_v0 = vpop.eup %1008  ;;  %v605_v39 = vmul.f32 %v1007_v24, %v1755_v61  ;;  %vm683_vm7 = vcmp.lt.f32.partialorder %v1788_v8, 0.0  ;;  %v707_v12 = vsel %vm706_vm5, 1.0, %v1933_v48  ;;  %vm735_vm8 = vcmp.eq.f32.partialorder %v1939_v30, 0.0 }
  0xb5   :  { %v592_v42 = vmin.f32 %v591_v51, 2.0  ;;  %v620_v34 = vmul.f32 %v1009_v0, %v1769_v18  ;;  %v669_v43 = vsel %vm668_vm3, 2.0, %v2345_v56  ;;  %1018 = vrcp.f32 %v707_v12 }
  0xb6   :  { %v606_v35 = vmax.f32 %v605_v39, -1.0  ;;  %vm667_vm9 = vcmp.lt.f32.partialorder %v1896_v37, 0.0  ;;  %vm671_vm14 = vcmp.gt.f32.partialorder %v1896_v37, 0.0  ;;  %v736_v62 = vsel %vm735_vm8, 1.0, %v1939_v30 }
  0xb7   :  { %v1011_v24 = vpop.eup %1010  ;;  %v596_v1 = vsel %vm593_vm12, %v592_v42, %v595_v59  ;;  %v598_v51 = vsel %vm597_vm10, %v592_v42, 1.0  ;;  %v621_v0 = vmax.f32 %v620_v34, -1.0  ;;  %v684_v36 = vsel %vm683_vm7, 2.0, %v2345_v56 }
  0xb8   :  { %v1013_v55 = vpop.eup %1012  ;;  %v599_v31 = vmax.f32 %v596_v1, 0.0  ;;  %v600_v12 = vmin.f32 %v598_v51, 1.0  ;;  %v607_v39 = vmin.f32 %v606_v35, 2.0  ;;  %v635_v13 = vmul.f32 %v1011_v24, %v1771_v38 }
  0xb9   :  { %v622_v5 = vmin.f32 %v621_v0, 2.0  ;;  %v664_v10 = vmul.f32 %v1013_v55, %v1775_v22  ;;  %1020 = vrcp.f32 %v736_v62  ;;  %v1965_v53 = vsub.f32 %v1849_v4, %v1898_v29 }
  0xba   :  { %v611_v41 = vsel %vm608_vm11, %v607_v39, %v610_v58  ;;  %v613_v59 = vsel %vm612_vm13, %v607_v39, 1.0  ;;  %v636_v42 = vmax.f32 %v635_v13, -1.0  ;;  %vm698_vm12 = vcmp.lt.f32.partialorder %v1832_v54, 0.0 }
  0xbb   :  { %v1015_v1 = vpop.eup %1014  ;;  %v614_v34 = vmax.f32 %v599_v31, %v611_v41  ;;  %v615_v35 = vmin.f32 %v600_v12, %v613_v59  ;;  %v626_v55 = vsel %vm623_vm15, %v622_v5, %v625_v26  ;;  %v628_v22 = vsel %vm627_vm2, %v622_v5, 1.0 }
  0xbc   :  { %v1017_v62 = vpop.eup %1016  ;;  %v637_v24 = vmin.f32 %v636_v42, 2.0  ;;  %v665_v51 = vmax.f32 %v664_v10, -1.0  ;;  %v679_v58 = vmul.f32 %v1015_v1, %v1788_v8  ;;  %vm750_vm10 = vcmp.eq.f32.partialorder %v1965_v53, 0.0 }
  0xbd   :  { %v629_v49 = vmax.f32 %v614_v34, %v626_v55  ;;  %vm682_vm11 = vcmp.lt.f32.partialorder %v1913_v16, 0.0  ;;  %v694_v13 = vmul.f32 %v1017_v62, %v1832_v54  ;;  %v751_v31 = vsel %vm750_vm10, 1.0, %v1965_v53 }
  0xbe   :  { %v641_v26 = vsel %vm638_vm4, %v637_v24, %v640_v25  ;;  %v666_v0 = vmin.f32 %v665_v51, 2.0  ;;  %v680_v14 = vmax.f32 %v679_v58, -1.0  ;;  %vm713_vm13 = vcmp.lt.f32.partialorder %v1834_v9, 0.0 }
  0xbf   :  { %v1019_v5 = vpop.eup %1018  ;;  %v630_v10 = vmin.f32 %v615_v35, %v628_v22  ;;  %v643_v8 = vsel %vm642_vm6, %v637_v24, 1.0  ;;  %v695_v12 = vmax.f32 %v694_v13, -1.0  ;;  %1022 = vrcp.f32 %v751_v31  ;;  %v2352_v24 = vld [vmem:[#allocation22_spill] sm:$0xff] }
  0xc0   :  { %v670_v39 = vsel %vm667_vm9, %v666_v0, %v669_v43  ;;  %v672_v41 = vsel %vm671_vm14, %v666_v0, 1.0  ;;  %v681_v59 = vmin.f32 %v680_v14, 2.0  ;;  %v709_v25 = vmul.f32 %v1019_v5, %v1834_v9 }
  0xc1   :  { %v1993_v42 = vsub.f32 %v1889_v57, %v1892_v32  ;;  %v1995_v1 = vmax.f32 %v629_v49, %v641_v26  ;;  %vm686_vm15 = vcmp.gt.f32.partialorder %v1913_v16, 0.0  ;;  %v699_v7 = vsel %vm698_vm12, 2.0, %v2345_v56  ;;  %v2353_v16 = vld [vmem:[#allocation23_spill] sm:$0xff] }
  0xc2   :  { %v673_v34 = vmax.f32 %v670_v39, 0.0  ;;  %v674_v43 = vmin.f32 %v672_v41, 1.0  ;;  %v685_v37 = vsel %vm682_vm11, %v681_v59, %v684_v36  ;;  %vm697_vm0 = vcmp.lt.f32.partialorder %v1919_v11, 0.0 }
  0xc3   :  { %v1021_v35 = vpop.eup %1020  ;;  %v2004_v55 = vmin.f32 %v630_v10, %v643_v8  ;;  %vm701_vm1 = vcmp.gt.f32.partialorder %v1919_v11, 0.0  ;;  %vm712_vm2 = vcmp.lt.f32.partialorder %v1933_v48, 0.0  ;;  %v714_v57 = vsel %vm713_vm13, 2.0, %v2345_v56 }
  0xc4   :  { %v687_v54 = vsel %vm686_vm15, %v681_v59, 1.0  ;;  %v688_v32 = vmax.f32 %v673_v34, %v685_v37  ;;  %v696_v22 = vmin.f32 %v695_v12, 2.0  ;;  %v710_v62 = vmax.f32 %v709_v25, -1.0 }
  0xc5   :  { %v646_v36 = vmul.f32 %v1995_v1, %v2352_v24  ;;  %v648_v51 = vmul.f32 %v1995_v1, %v2353_v16  ;;  %v689_v58 = vmin.f32 %v674_v43, %v687_v54  ;;  %vm716_vm3 = vcmp.gt.f32.partialorder %v1933_v48, 0.0 }
  0xc6   :  { %v700_v11 = vsel %vm697_vm0, %v696_v22, %v699_v7  ;;  %v702_v49 = vsel %vm701_vm1, %v696_v22, 1.0  ;;  %v711_v13 = vmin.f32 %v710_v62, 2.0  ;;  %v738_v31 = vmul.f32 %v1021_v35, %v1843_v6 }
  0xc7   :  { %v650_v9 = vmul.f32 %v2004_v55, %v2352_v24  ;;  %v652_v26 = vmul.f32 %v2004_v55, %v2353_v16  ;;  %v703_v0 = vmax.f32 %v688_v32, %v700_v11  ;;  %v704_v14 = vmin.f32 %v689_v58, %v702_v49  ;;  %v2356_v32 = vld [vmem:[#allocation25_spill] sm:$0xff] }
  0xc8   :  { %v2354_v5 = vsub.f32 %v2351_v19, %v1329_v20  ;;  %v715_v8 = vsel %vm712_vm2, %v711_v13, %v714_v57  ;;  %v717_v12 = vsel %vm716_vm3, %v711_v13, 1.0  ;;  %v2029_v39 = vsub.f32 %v1854_v15, %v1993_v42 }
  0xc9   :  { %v1023_v41 = vpop.eup %1022  ;;  %v426_v59 = vsub.f32 %v1765_v50, %v1767_v33  ;;  %v495_v25 = vadd.f32 %v1807_v23, %v1250_v2  ;;  %v2035_v7 = vmax.f32 %v703_v0, %v715_v8  ;;  %v2037_v34 = vmin.f32 %v704_v14, %v717_v12  ;;  %v2373_v50 = vld [vmem:[#allocation33_spill] sm:$0xff] }
  0xca   :  { %v584_v10 = vmul.f32 %v2354_v5, %v1692_v21  ;;  %v497_v21 = vadd.f32 %v1813_v17, %v1329_v20  ;;  %v647_v48 = vadd.f32 %v646_v36, %v1197_v44  ;;  %v739_v43 = vmax.f32 %v738_v31, -1.0  ;;  %v2355_v20 = vld [vmem:[#allocation24_spill] sm:$0xff] }
  0xcb   :  { %v753_v37 = vmul.f32 %v1023_v41, %v1849_v4  ;;  %v649_v35 = vadd.f32 %v648_v51, %v1200_v45  ;;  %v651_v57 = vadd.f32 %v650_v9, %v1197_v44  ;;  %v653_v54 = vadd.f32 %v652_v26, %v1200_v45 }
  0xcc   :  { %vm765_vm4 = vcmp.eq.f32.partialorder %v2029_v39, 0.0  ;;  %v2049_v2 = vmul.f32 %v1841_v40, %v1830_v63  ;;  %v2052_v23 = vsub.f32 %v1901_v60, %v584_v10  ;;  %vm742_vm5 = vcmp.lt.f32.partialorder %v1843_v6, 0.0 }
  0xcd   :  { %vm757_vm6 = vcmp.lt.f32.partialorder %v1849_v4, 0.0  ;;  %v720_v17 = vmul.f32 %v2035_v7, %v2355_v20  ;;  %v722_v44 = vmul.f32 %v2035_v7, %v2356_v32  ;;  %v724_v45 = vmul.f32 %v2037_v34, %v2355_v20  ;;  %v2357_v20 = vld [vmem:[#allocation11_spill] sm:$0xff] }
  0xce   :  { %v726_v63 = vmul.f32 %v2037_v34, %v2356_v32  ;;  %v740_v40 = vmin.f32 %v739_v43, 2.0  ;;  %vm741_vm7 = vcmp.lt.f32.partialorder %v1939_v30, 0.0  ;;  %v754_v60 = vmax.f32 %v753_v37, -1.0  ;;  %v2358_v32 = vld [vmem:[#allocation13_spill] sm:$0xff] }
  0xcf   :  { %v766_v6 = vsel %vm765_vm4, 1.0, %v2029_v39  ;;  %v2066_v22 = vmul.f32 %v653_v54, %v647_v48  ;;  %v2068_v4 = vmul.f32 %v651_v57, %v649_v35  ;;  %v743_v62 = vsel %vm742_vm5, 2.0, %v2345_v56 }
  0xd0   :  { %1024 = vrcp.f32 %v766_v6  ;;  %v2071_v24 = vmul.f32 %v497_v21, %v495_v25  ;;  %vm745_vm8 = vcmp.gt.f32.partialorder %v1939_v30, 0.0  ;;  %v758_v36 = vsel %vm757_vm6, 2.0, %v2345_v56  ;;  %v2359_v6 = vld [vmem:[#allocation12_spill] sm:$0xff] }
  0xd1   :  { %v2077_v16 = vsub.f32 %v1856_v28, %v2052_v23  ;;  %v721_v51 = vadd.f32 %v720_v17, %v1203_v46  ;;  %v723_v58 = vadd.f32 %v722_v44, %v1206_v47  ;;  %v725_v11 = vadd.f32 %v724_v45, %v1203_v46 }
  0xd2   :  { %v727_v49 = vadd.f32 %v726_v63, %v1206_v47  ;;  %v744_v13 = vsel %vm741_vm7, %v740_v40, %v743_v62  ;;  %v755_v31 = vmin.f32 %v754_v60, 2.0  ;;  %vm756_vm9 = vcmp.lt.f32.partialorder %v1965_v53, 0.0 }
  0xd3   :  { %vm780_vm14 = vcmp.eq.f32.partialorder %v2077_v16, 0.0  ;;  %v656_v30 = vsub.f32 %v2066_v22, %v2068_v4  ;;  %v746_v9 = vsel %vm745_vm8, %v740_v40, 1.0  ;;  %v2090_v0 = vsub.f32 %v1876_v3, %v1749_v27 }
  0xd4   :  { %v781_v26 = vsel %vm780_vm14, 1.0, %v2077_v16  ;;  %vm760_vm12 = vcmp.gt.f32.partialorder %v1965_v53, 0.0  ;;  %vm772_vm10 = vcmp.lt.f32.partialorder %v1854_v15, 0.0  ;;  %v2096_v46 = vsub.f32 %v1898_v29, %v1755_v61 }
  0xd5   :  { %1026 = vrcp.f32 %v781_v26  ;;  %v2098_v47 = vmul.f32 %v727_v49, %v721_v51  ;;  %v2100_v14 = vmul.f32 %v725_v11, %v723_v58  ;;  %v747_v5 = vmax.f32 %v744_v13, 0.0  ;;  %v2361_v58 = vld [vmem:[#allocation17_spill] sm:$0xff] }
  0xd6   :  { %vm771_vm11 = vcmp.lt.f32.partialorder %v2029_v39, 0.0  ;;  %vm809_vm13 = vcmp.eq.f32.partialorder %v2090_v0, 0.0  ;;  %v748_v27 = vmin.f32 %v746_v9, 1.0  ;;  %v759_v10 = vsel %vm756_vm9, %v755_v31, %v758_v36  ;;  %v2360_v36 = vld [vmem:[#allocation14_spill] sm:$0xff]  ;;  %v2362_v9 = vld [vmem:[#allocation16_spill] sm:$0xff] }
  0xd7   :  { %v810_v8 = vsel %vm809_vm13, 1.0, %v2090_v0  ;;  %vm824_vm15 = vcmp.eq.f32.partialorder %v2096_v46, 0.0  ;;  %v773_v61 = vsel %vm772_vm10, 2.0, %v2345_v56  ;;  %v2112_v41 = vsub.f32 %v1993_v42, %v1769_v18 }
  0xd8   :  { %1028 = vrcp.f32 %v810_v8  ;;  %v825_v12 = vsel %vm824_vm15, 1.0, %v2096_v46  ;;  %v761_v25 = vsel %vm760_vm12, %v755_v31, 1.0  ;;  %vm775_vm0 = vcmp.gt.f32.partialorder %v2029_v39, 0.0 }
  0xd9   :  { %1030 = vrcp.f32 %v825_v12  ;;  %v2119_v21 = vsub.f32 %v2052_v23, %v1771_v38  ;;  %v730_v43 = vsub.f32 %v2098_v47, %v2100_v14  ;;  %v2123_v37 = vmax.f32 %v747_v5, %v759_v10  ;;  %v61_v47 = vld [vmem:[#allocation5 + $0x20] sm:$0xff]  ;;  %v2370_v14 = vld [vmem:[#allocation26_spill] sm:$0xff] }
  0xda   :  { %v1025_v48 = vpop.eup %1024  ;;  %vm787_vm1 = vcmp.lt.f32.partialorder %v1856_v28, 0.0  ;;  %vm839_vm2 = vcmp.eq.f32.partialorder %v2112_v41, 0.0  ;;  %vm816_vm3 = vcmp.lt.f32.partialorder %v1876_v3, 0.0  ;;  %v763_v38 = vmin.f32 %v748_v27, %v761_v25 }
  0xdb   :  { %v768_v53 = vmul.f32 %v1025_v48, %v1854_v15  ;;  %v840_v18 = vsel %vm839_vm2, 1.0, %v2112_v41  ;;  %vm854_vm4 = vcmp.eq.f32.partialorder %v2119_v21, 0.0  ;;  %vm831_vm5 = vcmp.lt.f32.partialorder %v1898_v29, 0.0  ;;  %v2364_v48 = vld [vmem:[#allocation18_spill] sm:$0xff] }
  0xdc   :  { %1032 = vrcp.f32 %v840_v18  ;;  %v855_v35 = vsel %vm854_vm4, 1.0, %v2119_v21  ;;  %vm786_vm6 = vcmp.lt.f32.partialorder %v2077_v16, 0.0  ;;  %v788_v54 = vsel %vm787_vm1, 2.0, %v2345_v56 }
  0xdd   :  { %v769_v57 = vmax.f32 %v768_v53, -1.0  ;;  %1034 = vrcp.f32 %v855_v35  ;;  %vm790_vm7 = vcmp.gt.f32.partialorder %v2077_v16, 0.0  ;;  %v817_v15 = vsel %vm816_vm3, 2.0, %v2345_v56 }
  0xde   :  { %v896_v17 = vand.u32 2147483647, %v2357_v20  ;;  %v897_v44 = vand.u32 2147483647, %v2358_v32  ;;  %vm815_vm8 = vcmp.lt.f32.partialorder %v2090_v0, 0.0  ;;  %vm819_vm9 = vcmp.gt.f32.partialorder %v2090_v0, 0.0 }
  0xdf   :  { %v1027_v45 = vpop.eup %1026  ;;  %v770_v63 = vmin.f32 %v769_v57, 2.0  ;;  %vm830_vm14 = vcmp.lt.f32.partialorder %v2096_v46, 0.0  ;;  %v832_v40 = vsel %vm831_vm5, 2.0, %v2345_v56  ;;  %vm846_vm12 = vcmp.lt.f32.partialorder %v1993_v42, 0.0 }
  0xe0   :  { %v783_v60 = vmul.f32 %v1027_v45, %v1856_v28  ;;  %v899_v62 = vand.u32 2147483647, %v2359_v6  ;;  %v902_v51 = vand.u32 2147483647, %v2360_v36  ;;  %v903_v11 = vand.u32 2147483647, %v2361_v58 }
  0xe1   :  { %v774_v49 = vsel %vm771_vm11, %v770_v63, %v773_v61  ;;  %v776_v13 = vsel %vm775_vm0, %v770_v63, 1.0  ;;  %v898_v31 = vadd.f32 %v897_v44, %v896_v17  ;;  %v900_v26 = vand.u32 2147483647, %v2362_v9  ;;  %v2363_v28 = vld [vmem:[#allocation15_spill] sm:$0xff]  ;;  %v1042_v17 = vld [vmem:[#allocation2] sm:$0xff] }
  0xe2   :  { %v1029_v5 = vpop.eup %1028  ;;  %v784_v27 = vmax.f32 %v783_v60, -1.0  ;;  %vm834_vm10 = vcmp.gt.f32.partialorder %v2096_v46, 0.0  ;;  %vm861_vm13 = vcmp.lt.f32.partialorder %v2052_v23, 0.0  ;;  %v905_v10 = vand.u32 2147483647, %v2363_v28  ;;  %v1043_v58 = vld [vmem:[#allocation5] sm:$0xff] }
  0xe3   :  { %v1031_v8 = vpop.eup %1030  ;;  %v777_v12 = vmax.f32 %v2123_v37, %v774_v49  ;;  %v778_v25 = vmin.f32 %v763_v38, %v776_v13  ;;  %v812_v61 = vmul.f32 %v1029_v5, %v1876_v3  ;;  %v906_v39 = vand.u32 2147483647, %v2364_v48  ;;  %v2365_v49 = vld [vmem:[#allocation28_spill] sm:$0xff] }
  0xe4   :  { %v785_v53 = vmin.f32 %v784_v27, 2.0  ;;  %v827_v18 = vmul.f32 %v1031_v8, %v1898_v29  ;;  %v847_v35 = vsel %vm846_vm12, 2.0, %v2345_v56  ;;  %v904_v57 = vadd.f32 %v903_v11, %v902_v51  ;;  %v2367_v8 = vld [vmem:[#allocation19_spill] sm:$0xff] }
  0xe5   :  { %v813_v20 = vmax.f32 %v812_v61, -1.0  ;;  %vm845_vm11 = vcmp.lt.f32.partialorder %v2112_v41, 0.0  ;;  %vm849_vm15 = vcmp.gt.f32.partialorder %v2112_v41, 0.0  ;;  %v862_v37 = vsel %vm861_vm13, 2.0, %v2345_v56 }
  0xe6   :  { %v901_v38 = vadd.f32 %v900_v26, %v899_v62  ;;  %v2168_v3 = vsub.f32 %v1042_v17, %v898_v31  ;;  %v1033_v32 = vpop.eup %1032  ;;  %v789_v29 = vsel %vm786_vm6, %v785_v53, %v788_v54  ;;  %v791_v44 = vsel %vm790_vm7, %v785_v53, 1.0 }
  0xe7   :  { %v828_v45 = vmax.f32 %v827_v18, -1.0  ;;  %vm860_vm0 = vcmp.lt.f32.partialorder %v2119_v21, 0.0  ;;  %v2175_v63 = vadd.f32 %v1042_v17, %v898_v31  ;;  %v1035_v60 = vpop.eup %1034  ;;  %vm657_vm1 = vcmp.lt.f32.partialorder %v1995_v1, %v2004_v55  ;;  %v2366_v31 = vld [vmem:[#allocation29_spill] sm:$0xff] }
  0xe8   :  { %vm731_vm2 = vcmp.lt.f32.partialorder %v2035_v7, %v2037_v34  ;;  %v2181_v56 = vmax.f32 %v777_v12, %v789_v29  ;;  %v2183_v6 = vmin.f32 %v778_v25, %v791_v44  ;;  %v814_v54 = vmin.f32 %v813_v20, 2.0 }
  0xe9   :  { %v907_v62 = vadd.f32 %v906_v39, %v905_v10  ;;  %v829_v16 = vmin.f32 %v828_v45, 2.0  ;;  %v842_v36 = vmul.f32 %v1033_v32, %v1993_v42  ;;  %v857_v51 = vmul.f32 %v1035_v60, %v2052_v23  ;;  %v1045_v45 = vld [vmem:[#allocation5 + $0x8] sm:$0xff] }
  0xea   :  { %v2187_v11 = vsub.f32 %v1043_v58, %v904_v57  ;;  %v794_v13 = vmul.f32 %v2181_v56, %v2365_v49  ;;  %v796_v9 = vmul.f32 %v2181_v56, %v2366_v31  ;;  %v798_v26 = vmul.f32 %v2183_v6, %v2365_v49  ;;  %v2369_v49 = vld [vmem:[#allocation31_spill] sm:$0xff] }
  0xeb   :  { %v800_v5 = vmul.f32 %v2183_v6, %v2366_v31  ;;  %v818_v42 = vsel %vm815_vm8, %v814_v54, %v817_v15  ;;  %v820_v23 = vsel %vm819_vm9, %v814_v54, 1.0  ;;  %v833_v27 = vsel %vm830_vm14, %v829_v16, %v832_v40  ;;  %v1044_v40 = vld [vmem:[#allocation2 + $0x8] sm:$0xff] }
  0xec   :  { %v2203_v28 = vadd.f32 %v1043_v58, %v904_v57  ;;  %v795_v10 = vadd.f32 %v794_v13, %v1214_v52  ;;  %v797_v12 = vadd.f32 %v796_v9, %v2367_v8  ;;  %v799_v25 = vadd.f32 %v798_v26, %v1214_v52  ;;  %v2368_v58 = vld [vmem:[#allocation32_spill] sm:$0xff] }
  0xed   :  { %v801_v61 = vadd.f32 %v800_v5, %v2367_v8  ;;  %v821_v48 = vmax.f32 %v818_v42, 0.0  ;;  %v822_v39 = vmin.f32 %v820_v23, 1.0  ;;  %v835_v15 = vsel %vm834_vm10, %v829_v16, 1.0  ;;  %v2372_v23 = vld [vmem:[#allocation34_spill] sm:$0xff] }
  0xee   :  { %v843_v0 = vmax.f32 %v842_v36, -1.0  ;;  %v858_v18 = vmax.f32 %v857_v51, -1.0  ;;  %vm864_vm3 = vcmp.gt.f32.partialorder %v2119_v21, 0.0  ;;  %v2212_v57 = vsub.f32 %v1044_v40, %v901_v38 }
  0xef   :  { %v802_v53 = vmul.f32 %v801_v61, %v795_v10  ;;  %v803_v20 = vmul.f32 %v799_v25, %v797_v12  ;;  %v836_v17 = vmax.f32 %v821_v48, %v833_v27  ;;  %v837_v32 = vmin.f32 %v822_v39, %v835_v15  ;;  %v2374_v27 = vld [vmem:[#allocation21_spill] sm:$0xff]  ;;  %v2375_v25 = vld [vmem:[#allocation30_spill] sm:$0xff] }
  0xf0   :  { %v844_v29 = vmin.f32 %v843_v0, 2.0  ;;  %v859_v52 = vmin.f32 %v858_v18, 2.0  ;;  %v2214_v44 = vadd.f32 %v1044_v40, %v901_v38  ;;  %v2216_v60 = vsub.f32 %v1045_v45, %v907_v62 }
  0xf1   :  { %v915_v46 = vadd.f32 %v1045_v45, %v907_v62  ;;  %v926_v36 = vmax.f32 %v2175_v63, %v2203_v28  ;;  %v927_v51 = vmin.f32 %v2168_v3, %v2187_v11  ;;  %vm427_vm4 = vcmp.lt.f32.partialorder %v2369_v49, %v2368_v58  ;;  %v1047_v45 = vld [vmem:[#allocation2 + $0x18] sm:$0xff] }
  0xf2   :  { %v848_v54 = vsel %vm845_vm11, %v844_v29, %v847_v35  ;;  %v850_v16 = vsel %vm849_vm15, %v844_v29, 1.0  ;;  %v863_v62 = vsel %vm860_vm0, %v859_v52, %v862_v37  ;;  %v658_v41 = vsel %vm657_vm1, %v656_v30, 0.0  ;;  %v48_v30 = vld [vmem:[#allocation2 + $0x20] sm:$0xff] }
  0xf3   :  { %v851_v38 = vmax.f32 %v836_v17, %v848_v54  ;;  %v852_v13 = vmin.f32 %v837_v32, %v850_v16  ;;  %v732_v35 = vsel %vm731_vm2, %v730_v43, 0.0  ;;  %v804_v31 = vsub.f32 %v802_v53, %v803_v20  ;;  %v2371_v43 = vld [vmem:[#allocation27_spill] sm:$0xff]  ;;  %v1048_v16 = vld [vmem:[#allocation5 + $0x10] sm:$0xff] }
  0xf4   :  { %v865_v9 = vsel %vm864_vm3, %v859_v52, 1.0  ;;  %vm805_vm5 = vcmp.lt.f32.partialorder %v2181_v56, %v2183_v6  ;;  %v930_v4 = vmax.f32 %v2214_v44, %v915_v46  ;;  %v428_v1 = vsel %vm427_vm4, %v426_v59, 0.0 }
  0xf5   :  { %v866_v37 = vmax.f32 %v851_v38, %v863_v62  ;;  %v867_v22 = vmin.f32 %v852_v13, %v865_v9  ;;  %v502_v55 = vsub.f32 %v2049_v2, %v2071_v24  ;;  %v928_v7 = vsub.f32 %v926_v36, %v927_v51  ;;  %v1049_v36 = vld [vmem:[#allocation5 + $0x18] sm:$0xff] }
  0xf6   :  { %v931_v34 = vmin.f32 %v2212_v57, %v2216_v60  ;;  %vm503_vm6 = vcmp.lt.f32.partialorder %v2373_v50, %v2372_v23  ;;  %v733_v33 = vadd.f32 %v732_v35, %v658_v41  ;;  %v806_v59 = vsel %vm805_vm5, %v804_v31, 0.0 }
  0xf7   :  { %v868_v21 = vmul.f32 %v866_v37, %v2370_v14  ;;  %v870_v26 = vmul.f32 %v866_v37, %v2371_v43  ;;  %v872_v5 = vmul.f32 %v867_v22, %v2370_v14  ;;  %v874_v42 = vmul.f32 %v867_v22, %v2371_v43 }
  0xf8   :  { %v932_v2 = vsub.f32 %v930_v4, %v931_v34  ;;  %v429_v61 = vadd.f32 %v428_v1, %v2375_v25  ;;  %v894_v48 = vsub.f32 %v48_v30, %v61_v47  ;;  %v929_v39 = vmax.f32 %v928_v7, 0.0 }
  0xf9   :  { %v869_v24 = vadd.f32 %v868_v21, %v2351_v19  ;;  %v871_v10 = vadd.f32 %v870_v26, %v2374_v27  ;;  %v873_v8 = vadd.f32 %v872_v5, %v2351_v19  ;;  %v875_v12 = vadd.f32 %v874_v42, %v2374_v27  ;;  %v1046_v19 = vld [vmem:[#allocation2 + $0x10] sm:$0xff] }
  0xfa   :  { %v933_v15 = vmax.f32 %v932_v2, 0.0  ;;  %v504_v0 = vsel %vm503_vm6, %v502_v55, 0.0  ;;  %v807_v40 = vadd.f32 %v806_v59, %v733_v33  ;;  %vm879_vm7 = vcmp.lt.f32.partialorder %v866_v37, %v867_v22 }
  0xfb   :  { %v876_v53 = vmul.f32 %v875_v12, %v869_v24  ;;  %v877_v18 = vmul.f32 %v873_v8, %v871_v10  ;;  %v505_v6 = vadd.f32 %v504_v0, %v429_v61  ;;  %v895_v20 = vmul.f32 0.3183099, %v894_v48 }
  0xfc   :  { %v934_v17 = vmul.f32 %v929_v39, %v929_v39  ;;  %v935_v32 = vmul.f32 %v933_v15, %v933_v15  ;;  %v885_v54 = vmul.f32 %v1047_v45, %v1046_v19  ;;  %v886_v51 = vmul.f32 %v1049_v36, %v1048_v16 }
  0xfd   :  { %v878_v56 = vsub.f32 %v876_v53, %v877_v18  ;;  %v941_v38 = vand.u32 2147483647, %v895_v20  ;;  %v916_v13 = vadd.f32 %v2203_v28, %v2187_v11  ;;  %v917_v62 = vadd.f32 %v2175_v63, %v2168_v3 }
  0xfe   :  { %v936_v49 = vadd.f32 %v935_v32, %v934_v17  ;;  %v921_v41 = vadd.f32 %v915_v46, %v2216_v60  ;;  %v922_v35 = vadd.f32 %v2214_v44, %v2212_v57  ;;  %v887_v9 = vadd.f32 %v886_v51, %v885_v54 }
  0xff   :  { %v880_v29 = vsel %vm879_vm7, %v878_v56, 0.0  ;;  %v965_v4 = vadd.f32 -1.0, %v941_v38  ;;  %v918_v1 = vsub.f32 %v916_v13, %v917_v62 }
 0x100   :  { %v881_v52 = vadd.f32 %v880_v29, %v807_v40  ;;  %v937_v22 = vadd.f32 1e-06, %v936_v49  ;;  %v923_v55 = vsub.f32 %v921_v41, %v922_v35 }
 0x101   :  { %v943_v30 = vmul.f32 1.442695, %v965_v4  ;;  %v919_v11 = vmul.f32 %v918_v1, %v918_v1 }
 0x102   :  { %v882_v58 = vadd.f32 %v881_v52, %v505_v6  ;;  %1036 = vrcp.f32 %v937_v22  ;;  %v924_v28 = vmul.f32 %v923_v55, %v923_v55 }
 0x103   :  { %v920_v3 = vmul.f32 0.25, %v919_v11 }
 0x104   :  { %v883_v31 = vand.u32 2147483647, %v882_v58  ;;  %v925_v63 = vmul.f32 0.25, %v924_v28 }
 0x106   :  { %v884_v37 = vmul.f32 0.5, %v883_v31  ;;  %v938_v60 = vadd.f32 %v925_v63, %v920_v3 }
 0x108   :  { %v888_v7 = vsub.f32 %v887_v9, %v884_v37 }
 0x10a   :  { %v889_v34 = vmax.f32 %v888_v7, 1e-12 }
 0x10c   :  { %1038 = vrcp.f32 %v889_v34  ;;  %v1037_v46 = vpop.eup %1036 }
 0x10d   :  { %1040 = vpow2.f32 %v943_v30  ;;  %v940_v47 = vmul.f32 %v1037_v46, %v938_v60 }
 0x116   :  { %v1039_v57 = vpop.eup %1038 }
 0x117   :  { %v891_v44 = vmul.f32 %v1039_v57, %v884_v37  ;;  %v1041_v14 = vpop.eup %1040 }
 0x118   :  { %v945_v26 = vmul.f32 %v1041_v14, %v940_v47 }
 0x119   :  { %v892_v21 = vmax.f32 %v891_v44, 1e-06 }
 0x11b   :  { %v893_v43 = vmin.f32 %v892_v21, 1.0 }
 0x11d   :  { %v946_v5 = vsub.f32 1.0, %v893_v43 }
 0x11f   :  { %v947_v42 = vadd.f32 %v946_v5, %v945_v26 }
 0x121   :  { %948 = vst [vmem:[#allocation7] sm:$0xff] %v947_v42 }
 0x122   :  { %1105 = shalt.err (!%p1102_p6)
}
 0x123   :  { %s1106_s10 = scalar_lea.hbm %s2289_s2, 128 }
 0x124   :  { %p1107_p7 = scmp.ne.s32.totalorder %s2289_s2, %s1106_s10  ;;  %p1110_p8 = scmp.lt.u32.totalorder %s1106_s10, %s2289_s2 }
 0x126   :  { %p1112_p9 = pnand %p1110_p8, %p1107_p7 }
 0x128   :  { %1115 = shalt.err (!%p1112_p9)
}
 0x129   :  { %958 = dma.vmem_to_hbm [thread:$0]  %s956_s6, 128, %s2289_s2, [#allocation4]  }
 0x12a   :  { %1120 = dma.done.wait [#allocation4], 128  }
 0x12b   :  { %1121 = vsyncadd [#allocation4], 4294967168 }
 0x12c   :  { %962 = vsyncpa [#allocation3], 1 }
 0x12d   :  { %963 = vsyncpa [#allocation6], 1 }
 0x12e   :  { %964 = vsyncpa [#allocation4], 1 }

</bundles_post_ra>
